<compile_context>
chip_gen: v6e
topology: v6e:2x2x1
jax: 0.10.0
libtpu: 0.0.40
codegen_flags: <defaults>
</compile_context>

<pallas_src>
import functools

import jax
import jax.numpy as jnp
from jax.experimental import pallas as pl
from jax.experimental.pallas import tpu as pltpu

VMEM_SPEC = pl.BlockSpec(memory_space=pltpu.MemorySpace.VMEM)
_LN_EPS = 1e-6


def _vmem_limit_bytes():
    # Leave headroom for compiler-internal scratch (critical on v7x's 64 MiB / TensorCore).
    try:
        cap = int(pltpu.get_tpu_info().vmem_capacity_bytes)
    except Exception:
        cap = 64 * 1024 * 1024
    return min(int(cap * 3 // 4), 96 * 1024 * 1024)


_VMEM_LIMIT = _vmem_limit_bytes()


# ----------------------------- Pallas kernels ---------------------------------------

def _matmul_bias_kernel(x_ref, w_ref, b_ref, o_ref):
    # Patch embedding: [tile_m, K] bf16 @ [K, D] bf16 + bias (f32 accumulate).
    y = jnp.dot(x_ref[...], w_ref[...], preferred_element_type=jnp.float32) + b_ref[...]
    o_ref[...] = y.astype(o_ref.dtype)


def _layernorm(x, gamma, beta):
    mu = jnp.mean(x, axis=-1, keepdims=True)
    xc = x - mu
    var = jnp.mean(xc * xc, axis=-1, keepdims=True)
    return xc * jax.lax.rsqrt(var + _LN_EPS) * gamma + beta


def _blocks_kernel(x_ref, g1_ref, b1_ref, qkv_w_ref, qkv_b_ref,
                   pw_ref, pb_ref, g2_ref, b2_ref,
                   w1_ref, fb1_ref, w2_ref, fb2_ref, o_ref,
                   *, num_heads, head_dim):
    """Depth-fused transformer stack. grid=(N, depth); o_ref holds the residual stream.

    Weight refs carry a leading size-1 depth block dim (indexed by the depth grid coord).
    """
    d = pl.program_id(1)

    @pl.when(d == 0)
    def _():
        o_ref[...] = x_ref[...].astype(o_ref.dtype)   # init residual stream from embeddings

    x = o_ref[0]                                       # [T, D] f32 (VMEM-resident across depth)
    D = num_heads * head_dim

    # ---- LN1 + QKV projection (MXU, bf16 operands, f32 accumulate) ----
    xn = _layernorm(x, g1_ref[0], b1_ref[0])
    qkv = jnp.dot(xn.astype(jnp.bfloat16), qkv_w_ref[0],
                  preferred_element_type=jnp.float32) + qkv_b_ref[0]     # [T, 3D]

    # ---- multi-head self-attention: per-head accumulation straight into proj output ----
    scale = head_dim ** -0.5
    pw = pw_ref[0]                                     # [D, D] bf16
    attn_out = jnp.zeros_like(x)                       # [T, D] f32
    for h in range(num_heads):
        q = qkv[:, h * head_dim:(h + 1) * head_dim] * scale              # scale folded into q
        k = qkv[:, D + h * head_dim:D + (h + 1) * head_dim]
        v = qkv[:, 2 * D + h * head_dim:2 * D + (h + 1) * head_dim]
        s = jax.lax.dot_general(q.astype(jnp.bfloat16), k.astype(jnp.bfloat16),
                                (((1,), (1,)), ((), ())),
                                preferred_element_type=jnp.float32)      # [T, T]
        s = s - jnp.max(s, axis=-1, keepdims=True)
        p = jnp.exp(s)
        p = p * pl.reciprocal(jnp.sum(p, axis=-1, keepdims=True), approx=True)
        ctx = jnp.dot(p.astype(jnp.bfloat16), v.astype(jnp.bfloat16),
                      preferred_element_type=jnp.float32)                # [T, dh]
        attn_out = attn_out + jnp.dot(
            ctx.astype(jnp.bfloat16), pw[h * head_dim:(h + 1) * head_dim, :],
            preferred_element_type=jnp.float32)                          # += ctx_h @ W_proj[h]
    x = x + attn_out + pb_ref[0]                       # residual 1 (f32)

    # ---- LN2 + MLP (fc1 -> GELU -> fc2); expanded activation never leaves VMEM ----
    xn2 = _layernorm(x, g2_ref[0], b2_ref[0])
    h1 = jnp.dot(xn2.astype(jnp.bfloat16), w1_ref[0],
                 preferred_element_type=jnp.float32) + fb1_ref[0]
    # TODO(synk): timm's vit_base uses exact erf GELU; tanh approximation used here (EUP path).
    h1 = jax.nn.gelu(h1, approximate=True)
    mlp_out = jnp.dot(h1.astype(jnp.bfloat16), w2_ref[0],
                      preferred_element_type=jnp.float32) + fb2_ref[0]

    o_ref[0] = (x + mlp_out).astype(o_ref.dtype)       # residual 2, stays in VMEM until n changes


def _head_kernel(cls_ref, g_ref, b_ref, w_ref, hb_ref, o_ref):
    # final LayerNorm + classifier on the CLS token only ([N, D] -> [N, num_classes])
    cls = cls_ref[...].astype(jnp.float32)
    xn = _layernorm(cls, g_ref[...], b_ref[...])
    y = jnp.dot(xn.astype(jnp.bfloat16), w_ref[...],
                preferred_element_type=jnp.float32) + hb_ref[...]
    o_ref[...] = y.astype(o_ref.dtype)


# ----------------------------- kernel wrappers ---------------------------------------

def patch_embed(x2d_bf16, w_bf16, bias_f32):
    """[M, K] bf16 @ [K, D] bf16 + bias, tiled over M with a parallel grid."""
    M, K = x2d_bf16.shape
    D = w_bf16.shape[1]
    tile_m = M if M <= 1024 else 1024
    grid = (pl.cdiv(M, tile_m),)
    return pl.pallas_call(
        _matmul_bias_kernel,
        out_shape=jax.ShapeDtypeStruct((M, D), jnp.float32),
        grid=grid,
        in_specs=[pl.BlockSpec((tile_m, K), lambda i: (i, 0)),
                  pl.BlockSpec((K, D), lambda i: (0, 0)),
                  pl.BlockSpec((1, D), lambda i: (0, 0))],
        out_specs=pl.BlockSpec((tile_m, D), lambda i: (i, 0)),
        compiler_params=pltpu.CompilerParams(
            dimension_semantics=("parallel",),
            vmem_limit_bytes=_VMEM_LIMIT),
    )(x2d_bf16, w_bf16, bias_f32)


_BLOCK_WEIGHT_NAMES = ('ln1_g', 'ln1_b', 'qkv_w', 'qkv_b', 'proj_w', 'proj_b',
                       'ln2_g', 'ln2_b', 'fc1_w', 'fc1_b', 'fc2_w', 'fc2_b')


def transformer_blocks(x, params, *, depth, num_heads):
    """All ViT blocks in one fused pallas_call: grid=(N, depth), residual VMEM-resident."""
    N, T, D = x.shape
    head_dim = D // num_heads
    kernel = functools.partial(_blocks_kernel, num_heads=num_heads, head_dim=head_dim)

    weights = [params[name] for name in _BLOCK_WEIGHT_NAMES]   # each is [depth, a, b]

    def wspec(w):
        blk = (1,) + w.shape[1:]
        return pl.BlockSpec(blk, lambda n, d: (d, 0, 0))       # streamed per depth step

    x_spec = pl.BlockSpec((1, T, D), lambda n, d: (n, 0, 0))   # constant across depth
    in_specs = [x_spec] + [wspec(w) for w in weights]

    return pl.pallas_call(
        kernel,
        out_shape=jax.ShapeDtypeStruct((N, T, D), jnp.float32),
        grid=(N, depth),
        in_specs=in_specs,
        out_specs=pl.BlockSpec((1, T, D), lambda n, d: (n, 0, 0)),  # accumulator across depth
        compiler_params=pltpu.CompilerParams(
            dimension_semantics=("parallel", "arbitrary"),
            vmem_limit_bytes=_VMEM_LIMIT),
    )(x, *weights)


def vit_head(cls_tok, norm_g, norm_b, head_w, head_b):
    N = cls_tok.shape[0]
    num_classes = head_w.shape[1]
    return pl.pallas_call(
        _head_kernel,
        out_shape=jax.ShapeDtypeStruct((N, num_classes), jnp.float32),
        in_specs=[VMEM_SPEC] * 5,
        out_specs=VMEM_SPEC,
    )(cls_tok, norm_g, norm_b, head_w, head_b)


# ----------------------------- parameters --------------------------------------------

def init_params(key, *, img_size, patch_size, in_chans, embed_dim, depth,
                num_heads, mlp_ratio, num_classes):
    # TODO(synk): real TeacherViT loads timm pretrained vit_base_patch16_224 weights;
    # checkpoint/network I/O is not allowed here, so deterministic synthetic weights are used.
    del num_heads
    num_patches = (img_size // patch_size) ** 2
    T = num_patches + 1
    D = embed_dim
    Dm = int(embed_dim * mlp_ratio)
    keys = iter(jax.random.split(key, 16))

    def nk():
        return next(keys)

    params = {}
    params['patch_w'] = (0.02 * jax.random.normal(
        nk(), (in_chans * patch_size * patch_size, D))).astype(jnp.bfloat16)
    params['patch_b'] = jnp.zeros((1, D), jnp.float32)
    params['cls_token'] = (0.02 * jax.random.normal(nk(), (1, 1, D))).astype(jnp.float32)
    params['pos_embed'] = (0.02 * jax.random.normal(nk(), (1, T, D))).astype(jnp.float32)

    # Per-block weights stacked along a leading depth axis (for the depth-fused kernel).
    params['ln1_g'] = jnp.ones((depth, 1, D), jnp.float32)
    params['ln1_b'] = jnp.zeros((depth, 1, D), jnp.float32)
    params['qkv_w'] = (0.02 * jax.random.normal(nk(), (depth, D, 3 * D))).astype(jnp.bfloat16)
    params['qkv_b'] = (0.01 * jax.random.normal(nk(), (depth, 1, 3 * D))).astype(jnp.float32)
    params['proj_w'] = (0.02 * jax.random.normal(nk(), (depth, D, D))).astype(jnp.bfloat16)
    params['proj_b'] = jnp.zeros((depth, 1, D), jnp.float32)
    params['ln2_g'] = jnp.ones((depth, 1, D), jnp.float32)
    params['ln2_b'] = jnp.zeros((depth, 1, D), jnp.float32)
    params['fc1_w'] = (0.02 * jax.random.normal(nk(), (depth, D, Dm))).astype(jnp.bfloat16)
    params['fc1_b'] = (0.01 * jax.random.normal(nk(), (depth, 1, Dm))).astype(jnp.float32)
    params['fc2_w'] = (0.02 * jax.random.normal(nk(), (depth, Dm, D))).astype(jnp.bfloat16)
    params['fc2_b'] = jnp.zeros((depth, 1, D), jnp.float32)

    params['norm_g'] = jnp.ones((1, D), jnp.float32)
    params['norm_b'] = jnp.zeros((1, D), jnp.float32)
    params['head_w'] = (0.02 * jax.random.normal(nk(), (D, num_classes))).astype(jnp.bfloat16)
    params['head_b'] = jnp.zeros((1, num_classes), jnp.float32)
    return params


# ----------------------------- forward ------------------------------------------------

def _extract_patches(x_nchw, patch_size):
    # Conv2d(C, D, P, stride=P) == non-overlapping patch flatten + matmul (layout glue).
    N, C, H, W = x_nchw.shape
    P = patch_size
    nh, nw = H // P, W // P
    xp = x_nchw.reshape(N, C, nh, P, nw, P)
    xp = jnp.transpose(xp, (0, 2, 4, 1, 3, 5))             # [N, nh, nw, C, P, P]
    return xp.reshape(N * nh * nw, C * P * P), nh * nw


def teacher_vit_forward(params, x_nchw, cfg, return_features=False):
    P = cfg['patch_size']
    D = cfg['embed_dim']
    H = cfg['num_heads']
    depth = cfg['depth']
    N = x_nchw.shape[0]

    # bf16 before the reshape/transpose glue -> half the bytes moved for patch extraction.
    x2d, num_patches = _extract_patches(x_nchw.astype(jnp.bfloat16), P)
    patches = patch_embed(x2d, params['patch_w'], params['patch_b'])
    patches = patches.reshape(N, num_patches, D)

    cls = jnp.broadcast_to(params['cls_token'], (N, 1, D))
    x = jnp.concatenate([cls, patches], axis=1) + params['pos_embed']   # [N, T, D]
    # TODO(synk): pos_drop / attn_drop / proj_drop / drop_path are eval-mode identities; omitted.

    feats = transformer_blocks(x, params, depth=depth, num_heads=H)     # output of blocks[-1]

    cls_tok = feats[:, 0, :]                                            # only CLS row to the head
    logits = vit_head(cls_tok, params['norm_g'], params['norm_b'],
                      params['head_w'], params['head_b'])
    if return_features:
        return logits, feats
    return logits


# ----------------------------- pure-JAX reference (for correctness) -------------------

def _reference_forward(params, x_nchw, cfg):
    P, D, H = cfg['patch_size'], cfg['embed_dim'], cfg['num_heads']
    depth = cfg['depth']
    dh = D // H
    N = x_nchw.shape[0]
    x2d, num_patches = _extract_patches(x_nchw.astype(jnp.bfloat16), P)
    patches = (jnp.dot(x2d, params['patch_w'],
                       preferred_element_type=jnp.float32) + params['patch_b'])
    x = jnp.concatenate([jnp.broadcast_to(params['cls_token'], (N, 1, D)),
                         patches.reshape(N, num_patches, D)], axis=1) + params['pos_embed']
    for d in range(depth):
        xn = _layernorm(x, params['ln1_g'][d], params['ln1_b'][d])
        qkv = jnp.einsum('ntd,de->nte', xn.astype(jnp.bfloat16), params['qkv_w'][d],
                         preferred_element_type=jnp.float32) + params['qkv_b'][d]
        q = (qkv[..., :D] * (dh ** -0.5)).reshape(N, -1, H, dh)
        k = qkv[..., D:2 * D].reshape(N, -1, H, dh)
        v = qkv[..., 2 * D:].reshape(N, -1, H, dh)
        s = jnp.einsum('nqhd,nkhd->nhqk', q.astype(jnp.bfloat16), k.astype(jnp.bfloat16),
                       preferred_element_type=jnp.float32)
        s = s - jnp.max(s, axis=-1, keepdims=True)
        p = jnp.exp(s)
        p = p / jnp.sum(p, axis=-1, keepdims=True)
        ctx = jnp.einsum('nhqk,nkhd->nqhd', p.astype(jnp.bfloat16), v.astype(jnp.bfloat16),
                         preferred_element_type=jnp.float32).reshape(N, -1, D)
        x = x + jnp.einsum('ntd,de->nte', ctx.astype(jnp.bfloat16), params['proj_w'][d],
                           preferred_element_type=jnp.float32) + params['proj_b'][d]
        xn2 = _layernorm(x, params['ln2_g'][d], params['ln2_b'][d])
        h1 = jax.nn.gelu(
            jnp.einsum('ntd,de->nte', xn2.astype(jnp.bfloat16), params['fc1_w'][d],
                       preferred_element_type=jnp.float32) + params['fc1_b'][d],
            approximate=True)
        x = x + jnp.einsum('nte,ed->ntd', h1.astype(jnp.bfloat16), params['fc2_w'][d],
                           preferred_element_type=jnp.float32) + params['fc2_b'][d]
    feats = x
    cls_tok = _layernorm(x[:, 0, :], params['norm_g'], params['norm_b'])
    logits = (jnp.dot(cls_tok.astype(jnp.bfloat16), params['head_w'],
                      preferred_element_type=jnp.float32) + params['head_b'])
    return logits, feats


# ----------------------------- main ----------------------------------------------------

if __name__ == "__main__":
    key = jax.random.PRNGKey(0)
    pkey, xkey = jax.random.split(key)

    # Scaled-down ViT config (same kernel structure as vit_base_patch16_224:
    # img 224 / patch 16 / D=768 / depth 12 / heads 12); small shapes for the test.
    cfg = dict(img_size=32, patch_size=8, in_chans=3, embed_dim=256, depth=4,
               num_heads=2, mlp_ratio=4.0, num_classes=4)
    params = init_params(pkey, **cfg)

    x = jax.random.normal(
        xkey, (2, cfg['in_chans'], cfg['img_size'], cfg['img_size']), jnp.float32)

    fwd = jax.jit(lambda inp: teacher_vit_forward(params, inp, cfg, return_features=True))
    logits, feats = fwd(x)
    jax.block_until_ready((logits, feats))

    T = (cfg['img_size'] // cfg['patch_size']) ** 2 + 1
    assert logits.shape == (2, cfg['num_classes']) and logits.dtype == jnp.float32
    assert feats.shape == (2, T, cfg['embed_dim'])

    # logits-only path (return_features=False)
    logits2 = jax.jit(lambda inp: teacher_vit_forward(params, inp, cfg))(x)
    jax.block_until_ready(logits2)
    assert logits2.shape == (2, cfg['num_classes'])

    # correctness vs pure-JAX reference (same bf16 cast points; generous tolerance)
    ref_logits, ref_feats = jax.jit(lambda inp: _reference_forward(params, inp, cfg))(x)
    assert bool(jnp.all(jnp.isfinite(logits)))
    assert bool(jnp.allclose(logits, ref_logits, atol=1e-2, rtol=1e-2))
    assert bool(jnp.allclose(feats, ref_feats, atol=1e-2, rtol=1e-2))

    print("KERNEL_OK")
</pallas_src>

<mosaic_0001>
module attributes {stable_mosaic.version = 11 : i64} {
  func.func @_matmul_bias_kernel(%arg0: i32, %arg1: memref<32x192xbf16, #tpu.memory_space<vmem>>, %arg2: memref<192x256xbf16, #tpu.memory_space<vmem>>, %arg3: memref<1x256xf32, #tpu.memory_space<vmem>>, %arg4: memref<32x256xf32, #tpu.memory_space<vmem>>) attributes {dimension_semantics = [#tpu.dimension_semantics<parallel>], iteration_bounds = array<i64: 1>, scalar_prefetch = 0 : i64, scratch_operands = 0 : i64, tpu.core_type = #tpu.core_type<tc>, window_params = [{transform_indices = @transform_0, window_bounds = array<i64: 32, 192>}, {pipeline_mode = #tpu.pipeline_mode<synchronous>, transform_indices = @transform_1, window_bounds = array<i64: 192, 256>}, {pipeline_mode = #tpu.pipeline_mode<synchronous>, transform_indices = @transform_2, window_bounds = array<i64: 1, 256>}, {transform_indices = @transform_3, window_bounds = array<i64: 32, 256>}]} {
    %c0 = arith.constant 0 : index
    %c0_0 = arith.constant 0 : index
    %0 = vector.load %arg1[%c0, %c0_0] : memref<32x192xbf16, #tpu.memory_space<vmem>>, vector<32x192xbf16>
    %c0_1 = arith.constant 0 : index
    %c0_2 = arith.constant 0 : index
    %1 = vector.load %arg2[%c0_1, %c0_2] : memref<192x256xbf16, #tpu.memory_space<vmem>>, vector<192x256xbf16>
    %cst = arith.constant dense<0.000000e+00> : vector<32x256xf32>
    %2 = tpu.matmul %0, %1, %cst {dimension_numbers = #tpu.dot_dimension_numbers<[1], [0], [0], [1], [0, 0, 1, 1], [], []>} : vector<32x192xbf16>, vector<192x256xbf16>, vector<32x256xf32> -> vector<32x256xf32>
    %c0_3 = arith.constant 0 : index
    %c0_4 = arith.constant 0 : index
    %3 = vector.load %arg3[%c0_3, %c0_4] : memref<1x256xf32, #tpu.memory_space<vmem>>, vector<1x256xf32>
    %4 = vector.broadcast %3 : vector<1x256xf32> to vector<32x256xf32>
    %5 = arith.addf %2, %4 : vector<32x256xf32>
    %c0_5 = arith.constant 0 : index
    %c0_6 = arith.constant 0 : index
    %6 = vector.load %arg4[%c0_5, %c0_6] : memref<32x256xf32, #tpu.memory_space<vmem>>, vector<32x256xf32>
    tpu.vector_store %arg4[%c0_5, %c0_6], %5 {strides = array<i32>} : memref<32x256xf32, #tpu.memory_space<vmem>>, vector<32x256xf32>,
    return
  }
  func.func @transform_0(%arg0: i32) -> (i32, i32) {
    %c0_i32 = arith.constant 0 : i32
    %c0_i32_0 = arith.constant 0 : i32
    return %arg0, %c0_i32 : i32, i32
  }
  func.func @transform_1(%arg0: i32) -> (i32, i32) {
    %c0_i32 = arith.constant 0 : i32
    %c0_i32_0 = arith.constant 0 : i32
    %c0_i32_1 = arith.constant 0 : i32
    return %c0_i32, %c0_i32_0 : i32, i32
  }
  func.func @transform_2(%arg0: i32) -> (i32, i32) {
    %c0_i32 = arith.constant 0 : i32
    %c0_i32_0 = arith.constant 0 : i32
    %c0_i32_1 = arith.constant 0 : i32
    return %c0_i32, %c0_i32_0 : i32, i32
  }
  func.func @transform_3(%arg0: i32) -> (i32, i32) {
    %c0_i32 = arith.constant 0 : i32
    %c0_i32_0 = arith.constant 0 : i32
    return %arg0, %c0_i32 : i32, i32
  }
}

module attributes {stable_mosaic.version = 11 : i64} {
  func.func @_head_kernel(%arg0: memref<2x256xf32, #tpu.memory_space<vmem>>, %arg1: memref<1x256xf32, #tpu.memory_space<vmem>>, %arg2: memref<1x256xf32, #tpu.memory_space<vmem>>, %arg3: memref<256x4xbf16, #tpu.memory_space<vmem>>, %arg4: memref<1x4xf32, #tpu.memory_space<vmem>>, %arg5: memref<2x4xf32, #tpu.memory_space<vmem>>) attributes {dimension_semantics = [], scalar_prefetch = 0 : i64, scratch_operands = 0 : i64, tpu.core_type = #tpu.core_type<tc>} {
    %c0 = arith.constant 0 : index
    %c0_0 = arith.constant 0 : index
    %0 = vector.load %arg0[%c0, %c0_0] : memref<2x256xf32, #tpu.memory_space<vmem>>, vector<2x256xf32>
    %c0_1 = arith.constant 0 : index
    %c0_2 = arith.constant 0 : index
    %1 = vector.load %arg1[%c0_1, %c0_2] : memref<1x256xf32, #tpu.memory_space<vmem>>, vector<1x256xf32>
    %c0_3 = arith.constant 0 : index
    %c0_4 = arith.constant 0 : index
    %2 = vector.load %arg2[%c0_3, %c0_4] : memref<1x256xf32, #tpu.memory_space<vmem>>, vector<1x256xf32>
    %cst = arith.constant dense<0.000000e+00> : vector<2xf32>
    %3 = vector.multi_reduction <add>, %0, %cst [1] : vector<2x256xf32> to vector<2xf32>
    %4 = vector.shape_cast %3 : vector<2xf32> to vector<2x1xf32>
    %cst_5 = arith.constant 2.560000e+02 : f32
    %5 = vector.broadcast %cst_5 : f32 to vector<2x1xf32>
    %6 = arith.divf %4, %5 : vector<2x1xf32>
    %7 = vector.broadcast %6 : vector<2x1xf32> to vector<2x256xf32>
    %8 = arith.subf %0, %7 : vector<2x256xf32>
    %9 = arith.mulf %8, %8 : vector<2x256xf32>
    %cst_6 = arith.constant dense<0.000000e+00> : vector<2xf32>
    %10 = vector.multi_reduction <add>, %9, %cst_6 [1] : vector<2x256xf32> to vector<2xf32>
    %11 = vector.shape_cast %10 : vector<2xf32> to vector<2x1xf32>
    %cst_7 = arith.constant 2.560000e+02 : f32
    %12 = vector.broadcast %cst_7 : f32 to vector<2x1xf32>
    %13 = arith.divf %11, %12 : vector<2x1xf32>
    %cst_8 = arith.constant 9.99999997E-7 : f32
    %14 = vector.broadcast %cst_8 : f32 to vector<2x1xf32>
    %15 = arith.addf %13, %14 : vector<2x1xf32>
    %16 = math.rsqrt %15 : vector<2x1xf32>
    %17 = vector.broadcast %16 : vector<2x1xf32> to vector<2x256xf32>
    %18 = arith.mulf %8, %17 : vector<2x256xf32>
    %19 = vector.broadcast %1 : vector<1x256xf32> to vector<2x256xf32>
    %20 = arith.mulf %18, %19 : vector<2x256xf32>
    %21 = vector.broadcast %2 : vector<1x256xf32> to vector<2x256xf32>
    %22 = arith.addf %20, %21 : vector<2x256xf32>
    %23 = arith.truncf %22 : vector<2x256xf32> to vector<2x256xbf16>
    %c0_9 = arith.constant 0 : index
    %c0_10 = arith.constant 0 : index
    %24 = vector.load %arg3[%c0_9, %c0_10] : memref<256x4xbf16, #tpu.memory_space<vmem>>, vector<256x4xbf16>
    %cst_11 = arith.constant dense<0.000000e+00> : vector<2x4xf32>
    %25 = tpu.matmul %23, %24, %cst_11 {dimension_numbers = #tpu.dot_dimension_numbers<[1], [0], [0], [1], [0, 0, 1, 1], [], []>} : vector<2x256xbf16>, vector<256x4xbf16>, vector<2x4xf32> -> vector<2x4xf32>
    %c0_12 = arith.constant 0 : index
    %c0_13 = arith.constant 0 : index
    %26 = vector.load %arg4[%c0_12, %c0_13] : memref<1x4xf32, #tpu.memory_space<vmem>>, vector<1x4xf32>
    %27 = vector.broadcast %26 : vector<1x4xf32> to vector<2x4xf32>
    %28 = arith.addf %25, %27 : vector<2x4xf32>
    %c0_14 = arith.constant 0 : index
    %c0_15 = arith.constant 0 : index
    %29 = vector.load %arg5[%c0_14, %c0_15] : memref<2x4xf32, #tpu.memory_space<vmem>>, vector<2x4xf32>
    tpu.vector_store %arg5[%c0_14, %c0_15], %28 {strides = array<i32>} : memref<2x4xf32, #tpu.memory_space<vmem>>, vector<2x4xf32>,
    return
  }
}

module attributes {stable_mosaic.version = 11 : i64} {
  func.func @_blocks_kernel(%arg0: i32, %arg1: i32, %arg2: memref<1x17x256xf32, #tpu.memory_space<vmem>>, %arg3: memref<1x1x256xf32, #tpu.memory_space<vmem>>, %arg4: memref<1x1x256xf32, #tpu.memory_space<vmem>>, %arg5: memref<1x256x768xbf16, #tpu.memory_space<vmem>>, %arg6: memref<1x1x768xf32, #tpu.memory_space<vmem>>, %arg7: memref<1x256x256xbf16, #tpu.memory_space<vmem>>, %arg8: memref<1x1x256xf32, #tpu.memory_space<vmem>>, %arg9: memref<1x1x256xf32, #tpu.memory_space<vmem>>, %arg10: memref<1x1x256xf32, #tpu.memory_space<vmem>>, %arg11: memref<1x256x1024xbf16, #tpu.memory_space<vmem>>, %arg12: memref<1x1x1024xf32, #tpu.memory_space<vmem>>, %arg13: memref<1x1024x256xbf16, #tpu.memory_space<vmem>>, %arg14: memref<1x1x256xf32, #tpu.memory_space<vmem>>, %arg15: memref<1x17x256xf32, #tpu.memory_space<vmem>>) attributes {dimension_semantics = [#tpu.dimension_semantics<parallel>, #tpu.dimension_semantics<arbitrary>], iteration_bounds = array<i64: 2, 4>, scalar_prefetch = 0 : i64, scratch_operands = 0 : i64, tpu.core_type = #tpu.core_type<tc>, window_params = [{transform_indices = @transform_0, window_bounds = array<i64: 1, 17, 256>}, {transform_indices = @transform_1, window_bounds = array<i64: 1, 1, 256>}, {transform_indices = @transform_2, window_bounds = array<i64: 1, 1, 256>}, {transform_indices = @transform_3, window_bounds = array<i64: 1, 256, 768>}, {transform_indices = @transform_4, window_bounds = array<i64: 1, 1, 768>}, {transform_indices = @transform_5, window_bounds = array<i64: 1, 256, 256>}, {transform_indices = @transform_6, window_bounds = array<i64: 1, 1, 256>}, {transform_indices = @transform_7, window_bounds = array<i64: 1, 1, 256>}, {transform_indices = @transform_8, window_bounds = array<i64: 1, 1, 256>}, {transform_indices = @transform_9, window_bounds = array<i64: 1, 256, 1024>}, {transform_indices = @transform_10, window_bounds = array<i64: 1, 1, 1024>}, {transform_indices = @transform_11, window_bounds = array<i64: 1, 1024, 256>}, {transform_indices = @transform_12, window_bounds = array<i64: 1, 1, 256>}, {transform_indices = @transform_13, window_bounds = array<i64: 1, 17, 256>}]} {
    %c0_i32 = arith.constant 0 : i32
    %0 = arith.cmpi eq, %arg1, %c0_i32 : i32
    %1 = arith.extui %0 : i1 to i32
    %c0_i32_0 = arith.constant 0 : i32
    %2 = arith.cmpi ne, %1, %c0_i32_0 : i32
    scf.if %2 {
      %c0_71 = arith.constant 0 : index
      %c0_72 = arith.constant 0 : index
      %c0_73 = arith.constant 0 : index
      %152 = vector.load %arg2[%c0_71, %c0_72, %c0_73] : memref<1x17x256xf32, #tpu.memory_space<vmem>>, vector<1x17x256xf32>
      %c0_74 = arith.constant 0 : index
      %c0_75 = arith.constant 0 : index
      %c0_76 = arith.constant 0 : index
      %153 = vector.load %arg15[%c0_74, %c0_75, %c0_76] : memref<1x17x256xf32, #tpu.memory_space<vmem>>, vector<1x17x256xf32>
      tpu.vector_store %arg15[%c0_74, %c0_75, %c0_76], %152 {strides = array<i32>} : memref<1x17x256xf32, #tpu.memory_space<vmem>>, vector<1x17x256xf32>,
    } else {
    }
    %c0 = arith.constant 0 : index
    %c0_1 = arith.constant 0 : index
    %c0_2 = arith.constant 0 : index
    %3 = vector.load %arg15[%c0, %c0_1, %c0_2] : memref<1x17x256xf32, #tpu.memory_space<vmem>>, vector<1x17x256xf32>
    %4 = vector.shape_cast %3 : vector<1x17x256xf32> to vector<17x256xf32>
    %c0_3 = arith.constant 0 : index
    %c0_4 = arith.constant 0 : index
    %c0_5 = arith.constant 0 : index
    %5 = vector.load %arg3[%c0_3, %c0_4, %c0_5] : memref<1x1x256xf32, #tpu.memory_space<vmem>>, vector<1x1x256xf32>
    %6 = vector.shape_cast %5 : vector<1x1x256xf32> to vector<1x256xf32>
    %c0_6 = arith.constant 0 : index
    %c0_7 = arith.constant 0 : index
    %c0_8 = arith.constant 0 : index
    %7 = vector.load %arg4[%c0_6, %c0_7, %c0_8] : memref<1x1x256xf32, #tpu.memory_space<vmem>>, vector<1x1x256xf32>
    %8 = vector.shape_cast %7 : vector<1x1x256xf32> to vector<1x256xf32>
    %cst = arith.constant dense<0.000000e+00> : vector<17xf32>
    %9 = vector.multi_reduction <add>, %4, %cst [1] : vector<17x256xf32> to vector<17xf32>
    %10 = vector.shape_cast %9 : vector<17xf32> to vector<17x1xf32>
    %cst_9 = arith.constant 2.560000e+02 : f32
    %11 = vector.broadcast %cst_9 : f32 to vector<17x1xf32>
    %12 = arith.divf %10, %11 : vector<17x1xf32>
    %13 = vector.broadcast %12 : vector<17x1xf32> to vector<17x256xf32>
    %14 = arith.subf %4, %13 : vector<17x256xf32>
    %15 = arith.mulf %14, %14 : vector<17x256xf32>
    %cst_10 = arith.constant dense<0.000000e+00> : vector<17xf32>
    %16 = vector.multi_reduction <add>, %15, %cst_10 [1] : vector<17x256xf32> to vector<17xf32>
    %17 = vector.shape_cast %16 : vector<17xf32> to vector<17x1xf32>
    %cst_11 = arith.constant 2.560000e+02 : f32
    %18 = vector.broadcast %cst_11 : f32 to vector<17x1xf32>
    %19 = arith.divf %17, %18 : vector<17x1xf32>
    %cst_12 = arith.constant 9.99999997E-7 : f32
    %20 = vector.broadcast %cst_12 : f32 to vector<17x1xf32>
    %21 = arith.addf %19, %20 : vector<17x1xf32>
    %22 = math.rsqrt %21 : vector<17x1xf32>
    %23 = vector.broadcast %22 : vector<17x1xf32> to vector<17x256xf32>
    %24 = arith.mulf %14, %23 : vector<17x256xf32>
    %25 = vector.broadcast %6 : vector<1x256xf32> to vector<17x256xf32>
    %26 = arith.mulf %24, %25 : vector<17x256xf32>
    %27 = vector.broadcast %8 : vector<1x256xf32> to vector<17x256xf32>
    %28 = arith.addf %26, %27 : vector<17x256xf32>
    %29 = arith.truncf %28 : vector<17x256xf32> to vector<17x256xbf16>
    %c0_13 = arith.constant 0 : index
    %c0_14 = arith.constant 0 : index
    %c0_15 = arith.constant 0 : index
    %30 = vector.load %arg5[%c0_13, %c0_14, %c0_15] : memref<1x256x768xbf16, #tpu.memory_space<vmem>>, vector<1x256x768xbf16>
    %31 = vector.shape_cast %30 : vector<1x256x768xbf16> to vector<256x768xbf16>
    %cst_16 = arith.constant dense<0.000000e+00> : vector<17x768xf32>
    %32 = tpu.matmul %29, %31, %cst_16 {dimension_numbers = #tpu.dot_dimension_numbers<[1], [0], [0], [1], [0, 0, 1, 1], [], []>} : vector<17x256xbf16>, vector<256x768xbf16>, vector<17x768xf32> -> vector<17x768xf32>
    %c0_17 = arith.constant 0 : index
    %c0_18 = arith.constant 0 : index
    %c0_19 = arith.constant 0 : index
    %33 = vector.load %arg6[%c0_17, %c0_18, %c0_19] : memref<1x1x768xf32, #tpu.memory_space<vmem>>, vector<1x1x768xf32>
    %34 = vector.shape_cast %33 : vector<1x1x768xf32> to vector<1x768xf32>
    %35 = vector.broadcast %34 : vector<1x768xf32> to vector<17x768xf32>
    %36 = arith.addf %32, %35 : vector<17x768xf32>
    %c0_20 = arith.constant 0 : index
    %c0_21 = arith.constant 0 : index
    %c0_22 = arith.constant 0 : index
    %37 = vector.load %arg7[%c0_20, %c0_21, %c0_22] : memref<1x256x256xbf16, #tpu.memory_space<vmem>>, vector<1x256x256xbf16>
    %38 = vector.shape_cast %37 : vector<1x256x256xbf16> to vector<256x256xbf16>
    %cst_23 = arith.constant 0.000000e+00 : f32
    %39 = vector.broadcast %cst_23 : f32 to vector<17x256xf32>
    %40 = vector.extract_strided_slice %36 {offsets = [0, 0], sizes = [17, 128], strides = [1, 1]} : vector<17x768xf32> to vector<17x128xf32>
    %cst_24 = arith.constant 0.0883883461 : f32
    %41 = vector.broadcast %cst_24 : f32 to vector<17x128xf32>
    %42 = arith.mulf %40, %41 : vector<17x128xf32>
    %43 = vector.extract_strided_slice %36 {offsets = [0, 256], sizes = [17, 128], strides = [1, 1]} : vector<17x768xf32> to vector<17x128xf32>
    %44 = vector.extract_strided_slice %36 {offsets = [0, 512], sizes = [17, 128], strides = [1, 1]} : vector<17x768xf32> to vector<17x128xf32>
    %45 = arith.truncf %42 : vector<17x128xf32> to vector<17x128xbf16>
    %46 = arith.truncf %43 : vector<17x128xf32> to vector<17x128xbf16>
    %cst_25 = arith.constant dense<0.000000e+00> : vector<17x17xf32>
    %47 = tpu.matmul %45, %46, %cst_25 {dimension_numbers = #tpu.dot_dimension_numbers<[1], [1], [0], [0], [0, 0, 1, 0], [], []>} : vector<17x128xbf16>, vector<17x128xbf16>, vector<17x17xf32> -> vector<17x17xf32>
    %cst_26 = arith.constant dense<0xFF800000> : vector<17xf32>
    %48 = vector.multi_reduction <maximumf>, %47, %cst_26 [1] : vector<17x17xf32> to vector<17xf32>
    %49 = vector.shape_cast %48 : vector<17xf32> to vector<17x1xf32>
    %50 = vector.broadcast %49 : vector<17x1xf32> to vector<17x17xf32>
    %51 = arith.subf %47, %50 : vector<17x17xf32>
    %52 = math.exp %51 : vector<17x17xf32>
    %cst_27 = arith.constant dense<0.000000e+00> : vector<17xf32>
    %53 = vector.multi_reduction <add>, %52, %cst_27 [1] : vector<17x17xf32> to vector<17xf32>
    %54 = vector.shape_cast %53 : vector<17xf32> to vector<17x1xf32>
    %55 = tpu.reciprocal %54 {approx = true} : vector<17x1xf32> -> vector<17x1xf32>
    %56 = vector.broadcast %55 : vector<17x1xf32> to vector<17x17xf32>
    %57 = arith.mulf %52, %56 : vector<17x17xf32>
    %58 = arith.truncf %57 : vector<17x17xf32> to vector<17x17xbf16>
    %59 = arith.truncf %44 : vector<17x128xf32> to vector<17x128xbf16>
    %cst_28 = arith.constant dense<0.000000e+00> : vector<17x128xf32>
    %60 = tpu.matmul %58, %59, %cst_28 {dimension_numbers = #tpu.dot_dimension_numbers<[1], [0], [0], [1], [0, 0, 1, 1], [], []>} : vector<17x17xbf16>, vector<17x128xbf16>, vector<17x128xf32> -> vector<17x128xf32>
    %61 = arith.truncf %60 : vector<17x128xf32> to vector<17x128xbf16>
    %62 = vector.extract_strided_slice %38 {offsets = [0, 0], sizes = [128, 256], strides = [1, 1]} : vector<256x256xbf16> to vector<128x256xbf16>
    %cst_29 = arith.constant dense<0.000000e+00> : vector<17x256xf32>
    %63 = tpu.matmul %61, %62, %cst_29 {dimension_numbers = #tpu.dot_dimension_numbers<[1], [0], [0], [1], [0, 0, 1, 1], [], []>} : vector<17x128xbf16>, vector<128x256xbf16>, vector<17x256xf32> -> vector<17x256xf32>
    %64 = arith.addf %39, %63 : vector<17x256xf32>
    %65 = vector.extract_strided_slice %36 {offsets = [0, 128], sizes = [17, 128], strides = [1, 1]} : vector<17x768xf32> to vector<17x128xf32>
    %cst_30 = arith.constant 0.0883883461 : f32
    %66 = vector.broadcast %cst_30 : f32 to vector<17x128xf32>
    %67 = arith.mulf %65, %66 : vector<17x128xf32>
    %68 = vector.extract_strided_slice %36 {offsets = [0, 384], sizes = [17, 128], strides = [1, 1]} : vector<17x768xf32> to vector<17x128xf32>
    %69 = vector.extract_strided_slice %36 {offsets = [0, 640], sizes = [17, 128], strides = [1, 1]} : vector<17x768xf32> to vector<17x128xf32>
    %70 = arith.truncf %67 : vector<17x128xf32> to vector<17x128xbf16>
    %71 = arith.truncf %68 : vector<17x128xf32> to vector<17x128xbf16>
    %cst_31 = arith.constant dense<0.000000e+00> : vector<17x17xf32>
    %72 = tpu.matmul %70, %71, %cst_31 {dimension_numbers = #tpu.dot_dimension_numbers<[1], [1], [0], [0], [0, 0, 1, 0], [], []>} : vector<17x128xbf16>, vector<17x128xbf16>, vector<17x17xf32> -> vector<17x17xf32>
    %cst_32 = arith.constant dense<0xFF800000> : vector<17xf32>
    %73 = vector.multi_reduction <maximumf>, %72, %cst_32 [1] : vector<17x17xf32> to vector<17xf32>
    %74 = vector.shape_cast %73 : vector<17xf32> to vector<17x1xf32>
    %75 = vector.broadcast %74 : vector<17x1xf32> to vector<17x17xf32>
    %76 = arith.subf %72, %75 : vector<17x17xf32>
    %77 = math.exp %76 : vector<17x17xf32>
    %cst_33 = arith.constant dense<0.000000e+00> : vector<17xf32>
    %78 = vector.multi_reduction <add>, %77, %cst_33 [1] : vector<17x17xf32> to vector<17xf32>
    %79 = vector.shape_cast %78 : vector<17xf32> to vector<17x1xf32>
    %80 = tpu.reciprocal %79 {approx = true} : vector<17x1xf32> -> vector<17x1xf32>
    %81 = vector.broadcast %80 : vector<17x1xf32> to vector<17x17xf32>
    %82 = arith.mulf %77, %81 : vector<17x17xf32>
    %83 = arith.truncf %82 : vector<17x17xf32> to vector<17x17xbf16>
    %84 = arith.truncf %69 : vector<17x128xf32> to vector<17x128xbf16>
    %cst_34 = arith.constant dense<0.000000e+00> : vector<17x128xf32>
    %85 = tpu.matmul %83, %84, %cst_34 {dimension_numbers = #tpu.dot_dimension_numbers<[1], [0], [0], [1], [0, 0, 1, 1], [], []>} : vector<17x17xbf16>, vector<17x128xbf16>, vector<17x128xf32> -> vector<17x128xf32>
    %86 = arith.truncf %85 : vector<17x128xf32> to vector<17x128xbf16>
    %87 = vector.extract_strided_slice %38 {offsets = [128, 0], sizes = [128, 256], strides = [1, 1]} : vector<256x256xbf16> to vector<128x256xbf16>
    %cst_35 = arith.constant dense<0.000000e+00> : vector<17x256xf32>
    %88 = tpu.matmul %86, %87, %cst_35 {dimension_numbers = #tpu.dot_dimension_numbers<[1], [0], [0], [1], [0, 0, 1, 1], [], []>} : vector<17x128xbf16>, vector<128x256xbf16>, vector<17x256xf32> -> vector<17x256xf32>
    %89 = arith.addf %64, %88 : vector<17x256xf32>
    %90 = arith.addf %4, %89 : vector<17x256xf32>
    %c0_36 = arith.constant 0 : index
    %c0_37 = arith.constant 0 : index
    %c0_38 = arith.constant 0 : index
    %91 = vector.load %arg8[%c0_36, %c0_37, %c0_38] : memref<1x1x256xf32, #tpu.memory_space<vmem>>, vector<1x1x256xf32>
    %92 = vector.shape_cast %91 : vector<1x1x256xf32> to vector<1x256xf32>
    %93 = vector.broadcast %92 : vector<1x256xf32> to vector<17x256xf32>
    %94 = arith.addf %90, %93 : vector<17x256xf32>
    %c0_39 = arith.constant 0 : index
    %c0_40 = arith.constant 0 : index
    %c0_41 = arith.constant 0 : index
    %95 = vector.load %arg9[%c0_39, %c0_40, %c0_41] : memref<1x1x256xf32, #tpu.memory_space<vmem>>, vector<1x1x256xf32>
    %96 = vector.shape_cast %95 : vector<1x1x256xf32> to vector<1x256xf32>
    %c0_42 = arith.constant 0 : index
    %c0_43 = arith.constant 0 : index
    %c0_44 = arith.constant 0 : index
    %97 = vector.load %arg10[%c0_42, %c0_43, %c0_44] : memref<1x1x256xf32, #tpu.memory_space<vmem>>, vector<1x1x256xf32>
    %98 = vector.shape_cast %97 : vector<1x1x256xf32> to vector<1x256xf32>
    %cst_45 = arith.constant dense<0.000000e+00> : vector<17xf32>
    %99 = vector.multi_reduction <add>, %94, %cst_45 [1] : vector<17x256xf32> to vector<17xf32>
    %100 = vector.shape_cast %99 : vector<17xf32> to vector<17x1xf32>
    %cst_46 = arith.constant 2.560000e+02 : f32
    %101 = vector.broadcast %cst_46 : f32 to vector<17x1xf32>
    %102 = arith.divf %100, %101 : vector<17x1xf32>
    %103 = vector.broadcast %102 : vector<17x1xf32> to vector<17x256xf32>
    %104 = arith.subf %94, %103 : vector<17x256xf32>
    %105 = arith.mulf %104, %104 : vector<17x256xf32>
    %cst_47 = arith.constant dense<0.000000e+00> : vector<17xf32>
    %106 = vector.multi_reduction <add>, %105, %cst_47 [1] : vector<17x256xf32> to vector<17xf32>
    %107 = vector.shape_cast %106 : vector<17xf32> to vector<17x1xf32>
    %cst_48 = arith.constant 2.560000e+02 : f32
    %108 = vector.broadcast %cst_48 : f32 to vector<17x1xf32>
    %109 = arith.divf %107, %108 : vector<17x1xf32>
    %cst_49 = arith.constant 9.99999997E-7 : f32
    %110 = vector.broadcast %cst_49 : f32 to vector<17x1xf32>
    %111 = arith.addf %109, %110 : vector<17x1xf32>
    %112 = math.rsqrt %111 : vector<17x1xf32>
    %113 = vector.broadcast %112 : vector<17x1xf32> to vector<17x256xf32>
    %114 = arith.mulf %104, %113 : vector<17x256xf32>
    %115 = vector.broadcast %96 : vector<1x256xf32> to vector<17x256xf32>
    %116 = arith.mulf %114, %115 : vector<17x256xf32>
    %117 = vector.broadcast %98 : vector<1x256xf32> to vector<17x256xf32>
    %118 = arith.addf %116, %117 : vector<17x256xf32>
    %119 = arith.truncf %118 : vector<17x256xf32> to vector<17x256xbf16>
    %c0_50 = arith.constant 0 : index
    %c0_51 = arith.constant 0 : index
    %c0_52 = arith.constant 0 : index
    %120 = vector.load %arg11[%c0_50, %c0_51, %c0_52] : memref<1x256x1024xbf16, #tpu.memory_space<vmem>>, vector<1x256x1024xbf16>
    %121 = vector.shape_cast %120 : vector<1x256x1024xbf16> to vector<256x1024xbf16>
    %cst_53 = arith.constant dense<0.000000e+00> : vector<17x1024xf32>
    %122 = tpu.matmul %119, %121, %cst_53 {dimension_numbers = #tpu.dot_dimension_numbers<[1], [0], [0], [1], [0, 0, 1, 1], [], []>} : vector<17x256xbf16>, vector<256x1024xbf16>, vector<17x1024xf32> -> vector<17x1024xf32>
    %c0_54 = arith.constant 0 : index
    %c0_55 = arith.constant 0 : index
    %c0_56 = arith.constant 0 : index
    %123 = vector.load %arg12[%c0_54, %c0_55, %c0_56] : memref<1x1x1024xf32, #tpu.memory_space<vmem>>, vector<1x1x1024xf32>
    %124 = vector.shape_cast %123 : vector<1x1x1024xf32> to vector<1x1024xf32>
    %125 = vector.broadcast %124 : vector<1x1024xf32> to vector<17x1024xf32>
    %126 = arith.addf %122, %125 : vector<17x1024xf32>
    %127 = arith.mulf %126, %126 : vector<17x1024xf32>
    %128 = arith.mulf %126, %127 : vector<17x1024xf32>
    %cst_57 = arith.constant 4.471500e-02 : f32
    %129 = vector.broadcast %cst_57 : f32 to vector<17x1024xf32>
    %130 = arith.mulf %129, %128 : vector<17x1024xf32>
    %131 = arith.addf %126, %130 : vector<17x1024xf32>
    %cst_58 = arith.constant 0.797884583 : f32
    %132 = vector.broadcast %cst_58 : f32 to vector<17x1024xf32>
    %133 = arith.mulf %132, %131 : vector<17x1024xf32>
    %134 = math.tanh %133 : vector<17x1024xf32>
    %cst_59 = arith.constant 1.000000e+00 : f32
    %135 = vector.broadcast %cst_59 : f32 to vector<17x1024xf32>
    %136 = arith.addf %135, %134 : vector<17x1024xf32>
    %cst_60 = arith.constant 5.000000e-01 : f32
    %137 = vector.broadcast %cst_60 : f32 to vector<17x1024xf32>
    %138 = arith.mulf %137, %136 : vector<17x1024xf32>
    %139 = arith.mulf %126, %138 : vector<17x1024xf32>
    %140 = arith.truncf %139 : vector<17x1024xf32> to vector<17x1024xbf16>
    %c0_61 = arith.constant 0 : index
    %c0_62 = arith.constant 0 : index
    %c0_63 = arith.constant 0 : index
    %141 = vector.load %arg13[%c0_61, %c0_62, %c0_63] : memref<1x1024x256xbf16, #tpu.memory_space<vmem>>, vector<1x1024x256xbf16>
    %142 = vector.shape_cast %141 : vector<1x1024x256xbf16> to vector<1024x256xbf16>
    %cst_64 = arith.constant dense<0.000000e+00> : vector<17x256xf32>
    %143 = tpu.matmul %140, %142, %cst_64 {dimension_numbers = #tpu.dot_dimension_numbers<[1], [0], [0], [1], [0, 0, 1, 1], [], []>} : vector<17x1024xbf16>, vector<1024x256xbf16>, vector<17x256xf32> -> vector<17x256xf32>
    %c0_65 = arith.constant 0 : index
    %c0_66 = arith.constant 0 : index
    %c0_67 = arith.constant 0 : index
    %144 = vector.load %arg14[%c0_65, %c0_66, %c0_67] : memref<1x1x256xf32, #tpu.memory_space<vmem>>, vector<1x1x256xf32>
    %145 = vector.shape_cast %144 : vector<1x1x256xf32> to vector<1x256xf32>
    %146 = vector.broadcast %145 : vector<1x256xf32> to vector<17x256xf32>
    %147 = arith.addf %143, %146 : vector<17x256xf32>
    %148 = arith.addf %94, %147 : vector<17x256xf32>
    %c0_68 = arith.constant 0 : index
    %c0_69 = arith.constant 0 : index
    %c0_70 = arith.constant 0 : index
    %149 = vector.load %arg15[%c0_68, %c0_69, %c0_70] : memref<1x17x256xf32, #tpu.memory_space<vmem>>, vector<1x17x256xf32>
    %150 = vector.shape_cast %149 : vector<1x17x256xf32> to vector<17x256xf32>
    %151 = vector.shape_cast %148 : vector<17x256xf32> to vector<1x17x256xf32>
    tpu.vector_store %arg15[%c0_68, %c0_69, %c0_70], %151 {strides = array<i32>} : memref<1x17x256xf32, #tpu.memory_space<vmem>>, vector<1x17x256xf32>,
    return
  }
  func.func @transform_0(%arg0: i32, %arg1: i32) -> (i32, i32, i32) {
    %c0_i32 = arith.constant 0 : i32
    %c0_i32_0 = arith.constant 0 : i32
    %c0_i32_1 = arith.constant 0 : i32
    return %arg0, %c0_i32, %c0_i32_0 : i32, i32, i32
  }
  func.func @transform_1(%arg0: i32, %arg1: i32) -> (i32, i32, i32) {
    %c0_i32 = arith.constant 0 : i32
    %c0_i32_0 = arith.constant 0 : i32
    %c0_i32_1 = arith.constant 0 : i32
    return %arg1, %c0_i32, %c0_i32_0 : i32, i32, i32
  }
  func.func @transform_2(%arg0: i32, %arg1: i32) -> (i32, i32, i32) {
    %c0_i32 = arith.constant 0 : i32
    %c0_i32_0 = arith.constant 0 : i32
    %c0_i32_1 = arith.constant 0 : i32
    return %arg1, %c0_i32, %c0_i32_0 : i32, i32, i32
  }
  func.func @transform_3(%arg0: i32, %arg1: i32) -> (i32, i32, i32) {
    %c0_i32 = arith.constant 0 : i32
    %c0_i32_0 = arith.constant 0 : i32
    %c0_i32_1 = arith.constant 0 : i32
    return %arg1, %c0_i32, %c0_i32_0 : i32, i32, i32
  }
  func.func @transform_4(%arg0: i32, %arg1: i32) -> (i32, i32, i32) {
    %c0_i32 = arith.constant 0 : i32
    %c0_i32_0 = arith.constant 0 : i32
    %c0_i32_1 = arith.constant 0 : i32
    return %arg1, %c0_i32, %c0_i32_0 : i32, i32, i32
  }
  func.func @transform_5(%arg0: i32, %arg1: i32) -> (i32, i32, i32) {
    %c0_i32 = arith.constant 0 : i32
    %c0_i32_0 = arith.constant 0 : i32
    %c0_i32_1 = arith.constant 0 : i32
    return %arg1, %c0_i32, %c0_i32_0 : i32, i32, i32
  }
  func.func @transform_6(%arg0: i32, %arg1: i32) -> (i32, i32, i32) {
    %c0_i32 = arith.constant 0 : i32
    %c0_i32_0 = arith.constant 0 : i32
    %c0_i32_1 = arith.constant 0 : i32
    return %arg1, %c0_i32, %c0_i32_0 : i32, i32, i32
  }
  func.func @transform_7(%arg0: i32, %arg1: i32) -> (i32, i32, i32) {
    %c0_i32 = arith.constant 0 : i32
    %c0_i32_0 = arith.constant 0 : i32
    %c0_i32_1 = arith.constant 0 : i32
    return %arg1, %c0_i32, %c0_i32_0 : i32, i32, i32
  }
  func.func @transform_8(%arg0: i32, %arg1: i32) -> (i32, i32, i32) {
    %c0_i32 = arith.constant 0 : i32
    %c0_i32_0 = arith.constant 0 : i32
    %c0_i32_1 = arith.constant 0 : i32
    return %arg1, %c0_i32, %c0_i32_0 : i32, i32, i32
  }
  func.func @transform_9(%arg0: i32, %arg1: i32) -> (i32, i32, i32) {
    %c0_i32 = arith.constant 0 : i32
    %c0_i32_0 = arith.constant 0 : i32
    %c0_i32_1 = arith.constant 0 : i32
    return %arg1, %c0_i32, %c0_i32_0 : i32, i32, i32
  }
  func.func @transform_10(%arg0: i32, %arg1: i32) -> (i32, i32, i32) {
    %c0_i32 = arith.constant 0 : i32
    %c0_i32_0 = arith.constant 0 : i32
    %c0_i32_1 = arith.constant 0 : i32
    return %arg1, %c0_i32, %c0_i32_0 : i32, i32, i32
  }
  func.func @transform_11(%arg0: i32, %arg1: i32) -> (i32, i32, i32) {
    %c0_i32 = arith.constant 0 : i32
    %c0_i32_0 = arith.constant 0 : i32
    %c0_i32_1 = arith.constant 0 : i32
    return %arg1, %c0_i32, %c0_i32_0 : i32, i32, i32
  }
  func.func @transform_12(%arg0: i32, %arg1: i32) -> (i32, i32, i32) {
    %c0_i32 = arith.constant 0 : i32
    %c0_i32_0 = arith.constant 0 : i32
    %c0_i32_1 = arith.constant 0 : i32
    return %arg1, %c0_i32, %c0_i32_0 : i32, i32, i32
  }
  func.func @transform_13(%arg0: i32, %arg1: i32) -> (i32, i32, i32) {
    %c0_i32 = arith.constant 0 : i32
    %c0_i32_0 = arith.constant 0 : i32
    %c0_i32_1 = arith.constant 0 : i32
    return %arg0, %c0_i32, %c0_i32_0 : i32, i32, i32
  }
}

</mosaic_0001>

<bundles_post_ra>
// kernel: _lambda_.3
= control target key start
LH: loop header
LB: loop body
LE: loop exit
PB: predicated region body
PF: predicated region fallthrough
CT: control target
= control target key end

     0   :  { %8 = vsyncpa [#allocation3], 0  ;;  %s401_s12 = smov [#allocation2]   ;;  %s466_s0 = inlined_call_operand.vmem [shape: bf16[32,192], index: 0, kind: input, shape index: {}]   ;;  %s467_s1 = inlined_call_operand.hbm [shape: bf16[192,256], index: 1, kind: input, shape index: {}]   ;;  %s468_s2 = inlined_call_operand.vmem [shape: f32[1,256], index: 2, kind: input, shape index: {}]   ;;  %s469_s3 = inlined_call_operand.vmem [shape: f32[32,256], index: 3, kind: output, shape index: {}]  }
   0x1   :  { %s16_s13 = sshll.u32 %s401_s12, 4  ;;  %s17_s13 = int_to_ptr.vmem [resolvable:$true] %s16_s13 }
   0x2   :  { %s387_s14 = scalar_lea.vmem %s17_s13, 3072  ;;  %p392_p1 = scmp.lt.s32.totalorder %s17_s13, %s17_s13 }
   0x3   :  { %p388_p0 = scmp.ne.s32.totalorder %s17_s13, %s387_s14  ;;  %p393_p2 = scmp.lt.s32.totalorder %s387_s14, %s387_s14 }
   0x5   :  { %p394_p3 = por %p393_p2, %p392_p1 }
   0x7   :  { %p395_p4 = pnand %p394_p3, %p388_p0 }
   0x9   :  { %398 = shalt.err (!%p395_p4)
}
   0xa   :  { %s402_s15 = smov 128   ;;  %s403_s16 = smov 8  }
   0xb   :  { %22 = dma.hbm_to_vmem [thread:$0]  %s467_s1, 3072, %s17_s13, [#allocation3], %s402_s15, %s402_s15, %s403_s16  }
   0xc   :  { %399 = dma.done.wait [#allocation3], 3072  }
   0xd   :  { %400 = vsyncadd [#allocation3], 4294964224  ;;  %v337_v0 = vld [vmem:[#allocation2 + $0x74] ss:$8 sps:$4 sm:$0xff]   ;;  %v339_v1 = vld [vmem:[#allocation2 + $0x70] ss:$8 sps:$4 sm:$0xff]   ;;  %v59_v28 = vlaneseq }
   0xe   :  { %214 = vmatprep.subr.bf16.mxu0 %v337_v0  ;;  %310 = vmatprep.subr.bf16.mxu1 %v337_v0  ;;  %v340_v2 = vld [vmem:[#allocation2 + $0x64] ss:$8 sps:$4 sm:$0xff]   ;;  %v342_v3 = vld [vmem:[#allocation2 + $0x60] ss:$8 sps:$4 sm:$0xff]   ;;  %v343_v4 = vld [vmem:[#allocation2 + $0x54] ss:$8 sps:$4 sm:$0xff]  }
   0xf   :  { %215 = vmatpush1.bf16.msra.mxu0 %v339_v1  ;;  %322 = vmatpush1.bf16.msra.mxu1 %v339_v1  ;;  %v345_v5 = vld [vmem:[#allocation2 + $0x50] ss:$8 sps:$4 sm:$0xff]   ;;  %v346_v6 = vld [vmem:[#allocation2 + $0x44] ss:$8 sps:$4 sm:$0xff]   ;;  %v348_v7 = vld [vmem:[#allocation2 + $0x40] ss:$8 sps:$4 sm:$0xff]  }
  0x10   :  { %216 = vmatprep.subr.bf16.mxu0 %v340_v2  ;;  %311 = vmatprep.subr.bf16.mxu1 %v340_v2  ;;  %v349_v8 = vld [vmem:[#allocation2 + $0x34] ss:$8 sps:$4 sm:$0xff]   ;;  %v351_v9 = vld [vmem:[#allocation2 + $0x30] ss:$8 sps:$4 sm:$0xff]   ;;  %v352_v10 = vld [vmem:[#allocation2 + $0x24] ss:$8 sps:$4 sm:$0xff]  }
  0x11   :  { %v375_v11 = vld [vmem:[%s466_s0 + $0x4] ss:$8 sps:$4 sm:$0xff]   ;;  %vm207_vm0 = vcmask 523264   ;;  %v378_v12 = vld [vmem:[%s466_s0 + $0x14] ss:$8 sps:$4 sm:$0xff]   ;;  %v60_v29 = vshrl.u32 %v59_v28, 7 }
  0x12   :  { %v354_v13 = vld [vmem:[#allocation2 + $0x20] ss:$8 sps:$4 sm:$0xff]   ;;  %v355_v14 = vld [vmem:[#allocation2 + $0x14] ss:$8 sps:$4 sm:$0xff]   ;;  %308 = vmatprep.mubr.msk.bf16.mxu0 %vm207_vm0, %v375_v11  ;;  %309 = vmatprep.mubr.msk.bf16.mxu1 %vm207_vm0, %v378_v12  ;;  %v357_v15 = vld [vmem:[#allocation2 + $0x10] ss:$8 sps:$4 sm:$0xff]  }
  0x13   :  { %217 = vmatpush1.bf16.msra.mxu0 %v342_v3  ;;  %323 = vmatpush1.bf16.msra.mxu1 %v342_v3  ;;  %v358_v16 = vld [vmem:[#allocation2 + $0x4] ss:$8 sps:$4 sm:$0xff]   ;;  %v360_v17 = vld [vmem:[#allocation2] ss:$8 sps:$4 sm:$0xff]   ;;  %v361_v18 = vld [vmem:[#allocation2 + $0xb4] ss:$8 sps:$4 sm:$0xff]  }
  0x14   :  { %218 = vmatprep.subr.bf16.mxu0 %v343_v4  ;;  %312 = vmatprep.subr.bf16.mxu1 %v343_v4  ;;  %v363_v19 = vld [vmem:[#allocation2 + $0xb0] ss:$8 sps:$4 sm:$0xff]   ;;  %v364_v20 = vld [vmem:[#allocation2 + $0xa4] ss:$8 sps:$4 sm:$0xff]   ;;  %v366_v21 = vld [vmem:[#allocation2 + $0xa0] ss:$8 sps:$4 sm:$0xff]  }
  0x15   :  { %v367_v22 = vld [vmem:[#allocation2 + $0x94] ss:$8 sps:$4 sm:$0xff]   ;;  %v369_v23 = vld [vmem:[#allocation2 + $0x90] ss:$8 sps:$4 sm:$0xff]   ;;  %v370_v24 = vld [vmem:[#allocation2 + $0x84] ss:$8 sps:$4 sm:$0xff]  }
  0x16   :  { %v372_v25 = vld [vmem:[#allocation2 + $0x80] ss:$8 sps:$4 sm:$0xff]   ;;  %v376_v27 = vld [vmem:[%s466_s0 + $0x10] ss:$8 sps:$4 sm:$0xff]   ;;  %v61_v30 = vsub.s32 0, %v60_v29  ;;  %v65_v32 = vsub.s32 1, %v60_v29 }
  0x17   :  { %219 = vmatpush1.bf16.msra.mxu0 %v345_v5  ;;  %324 = vmatpush1.bf16.msra.mxu1 %v345_v5  ;;  %v373_v26 = vld [vmem:[%s466_s0] ss:$8 sps:$4 sm:$0xff]  }
  0x18   :  { %220 = vmatprep.subr.bf16.mxu0 %v346_v6  ;;  %313 = vmatprep.subr.bf16.mxu1 %v346_v6  ;;  %v57_v31 = vld [vmem:[%s468_s2] sm:$0x3] }
  0x19   :  { %v62_v33 = vrot.slane %v57_v31, %v61_v30  ;;  %v66_v34 = vrot.slane %v57_v31, %v65_v32 }
  0x1b   :  { %221 = vmatpush1.bf16.msra.mxu0 %v348_v7  ;;  %325 = vmatpush1.bf16.msra.mxu1 %v348_v7 }
  0x1c   :  { %222 = vmatprep.subr.bf16.mxu0 %v349_v8  ;;  %314 = vmatprep.subr.bf16.mxu1 %v349_v8 }
  0x1f   :  { %223 = vmatpush1.bf16.msra.mxu0 %v351_v9  ;;  %326 = vmatpush1.bf16.msra.mxu1 %v351_v9 }
  0x20   :  { %224 = vmatprep.subr.bf16.mxu0 %v352_v10  ;;  %315 = vmatprep.subr.bf16.mxu1 %v352_v10 }
  0x23   :  { %225 = vmatpush1.bf16.msra.mxu0 %v354_v13  ;;  %327 = vmatpush1.bf16.msra.mxu1 %v354_v13 }
  0x24   :  { %226 = vmatprep.subr.bf16.mxu0 %v355_v14  ;;  %316 = vmatprep.subr.bf16.mxu1 %v355_v14 }
  0x27   :  { %227 = vmatpush1.bf16.msra.mxu0 %v357_v15  ;;  %328 = vmatpush1.bf16.msra.mxu1 %v357_v15 }
  0x28   :  { %228 = vmatprep.subr.bf16.mxu0 %v358_v16  ;;  %317 = vmatprep.subr.bf16.mxu1 %v358_v16 }
  0x2b   :  { %229 = vmatpush1.bf16.msra.mxu0 %v360_v17  ;;  %329 = vmatpush1.bf16.msra.mxu1 %v360_v17 }
  0x2c   :  { %238 = vmatprep.subr.bf16.mxu0 %v361_v18  ;;  %318 = vmatprep.subr.bf16.mxu1 %v361_v18 }
  0x2f   :  { %239 = vmatpush2.bf16.msra.mxu0 %v363_v19  ;;  %330 = vmatpush2.bf16.msra.mxu1 %v363_v19 }
  0x30   :  { %240 = vmatprep.subr.bf16.mxu0 %v364_v20  ;;  %319 = vmatprep.subr.bf16.mxu1 %v364_v20 }
  0x33   :  { %241 = vmatpush2.bf16.msra.mxu0 %v366_v21  ;;  %331 = vmatpush2.bf16.msra.mxu1 %v366_v21 }
  0x34   :  { %242 = vmatprep.subr.bf16.mxu0 %v367_v22  ;;  %320 = vmatprep.subr.bf16.mxu1 %v367_v22 }
  0x37   :  { %243 = vmatpush2.bf16.msra.mxu0 %v369_v23  ;;  %332 = vmatpush2.bf16.msra.mxu1 %v369_v23 }
  0x38   :  { %244 = vmatprep.subr.bf16.mxu0 %v370_v24  ;;  %321 = vmatprep.subr.bf16.mxu1 %v370_v24 }
  0x3b   :  { %245 = vmatpush2.bf16.msra.mxu0 %v372_v25  ;;  %333 = vmatpush2.bf16.msra.mxu1 %v372_v25 }
  0x3e   :  { %247 = vmatmul.mubr.bf16.vlgmr.msra.gmra.mxu0 %v373_v26  ;;  %257 = vmatmul.mubr.bf16.vlgmr.msra.gmra.mxu1 %v376_v27 }
  0xfe   :  { %v248_v35 = vpop.f32.mrf.mxu0  ;;  %v258_v36 = vpop.f32.mrf.mxu1 }
  0xff   :  { %v249_v37 = vadd.f32 %v248_v35, %v62_v33  ;;  %v259_v38 = vadd.f32 %v258_v36, %v62_v33 }
 0x100   :  { %v250_v39 = vpop.f32.mrf.mxu0  ;;  %v260_v40 = vpop.f32.mrf.mxu1 }
 0x101   :  { %267 = vst [vmem:[%s469_s3] sm:$0xff] %v249_v37  ;;  %271 = vst [vmem:[%s469_s3 + $0x20] sm:$0xff] %v259_v38  ;;  %v251_v41 = vadd.f32 %v250_v39, %v66_v34  ;;  %v261_v42 = vadd.f32 %v260_v40, %v66_v34 }
 0x102   :  { %v252_v43 = vpop.f32.mrf.mxu0  ;;  %v262_v44 = vpop.f32.mrf.mxu1 }
 0x103   :  { %268 = vst [vmem:[%s469_s3 + $0x8] sm:$0xff] %v251_v41  ;;  %272 = vst [vmem:[%s469_s3 + $0x28] sm:$0xff] %v261_v42  ;;  %v253_v45 = vadd.f32 %v252_v43, %v62_v33  ;;  %v263_v46 = vadd.f32 %v262_v44, %v62_v33 }
 0x104   :  { %v254_v47 = vpop.f32.mrf.mxu0  ;;  %v264_v48 = vpop.f32.mrf.mxu1 }
 0x105   :  { %269 = vst [vmem:[%s469_s3 + $0x10] sm:$0xff] %v253_v45  ;;  %273 = vst [vmem:[%s469_s3 + $0x30] sm:$0xff] %v263_v46  ;;  %v255_v49 = vadd.f32 %v254_v47, %v66_v34  ;;  %v265_v50 = vadd.f32 %v264_v48, %v66_v34 }
 0x107   :  { %270 = vst [vmem:[%s469_s3 + $0x18] sm:$0xff] %v255_v49  ;;  %274 = vst [vmem:[%s469_s3 + $0x38] sm:$0xff] %v265_v50 }
 0x108   :  { %279 = vsyncpa [#allocation3], 1 }

// kernel: _lambda_.5
= control target key start
LH: loop header
LB: loop body
LE: loop exit
PB: predicated region body
PF: predicated region fallthrough
CT: control target
= control target key end

     0   :  { %v29_v0 = vlaneseq  ;;  %v408_v1 = vmov 1983009808   ;;  %vm36_vm0 = vcmask 1041408   ;;  %s521_s0 = inlined_call_operand.vmem [shape: f32[2,256], index: 0, kind: input, shape index: {}]   ;;  %s522_s1 = inlined_call_operand.vmem [shape: f32[1,256], index: 1, kind: input, shape index: {}]   ;;  %s523_s2 = inlined_call_operand.vmem [shape: f32[1,256], index: 2, kind: input, shape index: {}]   ;;  %s524_s3 = inlined_call_operand.vmem [shape: bf16[256,4], index: 3, kind: input, shape index: {}]   ;;  %s525_s4 = inlined_call_operand.vmem [shape: f32[1,4], index: 4, kind: input, shape index: {}]   ;;  %s526_s5 = inlined_call_operand.hbm [shape: f32[2,4], index: 5, kind: output, shape index: {}]  }
   0x1   :  { %v27_v2 = vunpack.c.l.s4 %v408_v1  ;;  %v22_v3 = vld [vmem:[%s521_s0] sm:$0xf] }
   0x2   :  { %v444_v4 = vshrl.u32 %v29_v0, 7 }
   0x3   :  { %v28_v5 = vunpack.c.0.s8 %v27_v2 }
   0x5   :  { %v447_v6 = vsub.s32 %v28_v5, %v444_v4 }
   0x7   :  { %v32_v7 = vrot.slane %v22_v3, %v447_v6 }
   0x9   :  { %v33_v8 = vcombine.high %v32_v7, %v32_v7  ;;  %v37_v9 = vsel %vm36_vm0, %v32_v7, 0.0 }
   0xb   :  { %v38_v10 = vsel %vm36_vm0, %v33_v8, 0.0 }
   0xc   :  { %v39_v11 = vadd.f32 %v38_v10, %v37_v9 }
   0xd   :  { %10 = vsyncpa [#allocation3], 0  ;;  %v409_v12 = vmov 269488144   ;;  %v368_v26 = vld [vmem:[%s524_s3 + $0x78] sm:$0xff]   ;;  %v370_v28 = vld [vmem:[%s524_s3 + $0x70] sm:$0xff]  }
   0xe   :  { %40 = vadd.xlane.f32.xlu0 %v39_v11  ;;  %v46_v13 = vunpack.c.l.s4 %v409_v12  ;;  %v369_v27 = vld [vmem:[%s524_s3 + $0x38] sm:$0xff]   ;;  %343 = vmatprep.subr.bf16.mxu0 %v368_v26  ;;  %v371_v29 = vld [vmem:[%s524_s3 + $0x30] sm:$0xff]   ;;  %v372_v30 = vld [vmem:[%s524_s3 + $0x68] sm:$0xff]   ;;  %v87_v45 = vsub.s32 0, %v444_v4  ;;  %v91_v46 = vsub.s32 1, %v444_v4  ;;  %vm310_vm1 = vcmask 25600  }
   0xf   :  { %344 = vmatpush3.bf16.msra.mxu0 %v369_v27  ;;  %v373_v31 = vld [vmem:[%s524_s3 + $0x28] sm:$0xff]   ;;  %v374_v32 = vld [vmem:[%s524_s3 + $0x60] sm:$0xff]   ;;  %v376_v34 = vld [vmem:[%s524_s3 + $0x58] sm:$0xff]  }
  0x10   :  { %v47_v14 = vunpack.c.0.s8 %v46_v13  ;;  %345 = vmatprep.subr.bf16.mxu0 %v370_v28  ;;  %v375_v33 = vld [vmem:[%s524_s3 + $0x20] sm:$0xff]   ;;  %v377_v35 = vld [vmem:[%s524_s3 + $0x18] sm:$0xff]   ;;  %v378_v36 = vld [vmem:[%s524_s3 + $0x50] sm:$0xff]  }
  0x11   :  { %v379_v37 = vld [vmem:[%s524_s3 + $0x10] sm:$0xff]   ;;  %v380_v38 = vld [vmem:[%s524_s3 + $0x48] sm:$0xff]   ;;  %v382_v40 = vld [vmem:[%s524_s3 + $0x40] sm:$0xff]  }
  0x12   :  { %v50_v15 = vsub.s32 %v47_v14, %v444_v4  ;;  %v381_v39 = vld [vmem:[%s524_s3 + $0x8] sm:$0xff]   ;;  %v383_v41 = vld [vmem:[%s524_s3] sm:$0xff]   ;;  %s410_s3 = smov [#allocation2]  }
  0x13   :  { %346 = vmatpush3.bf16.msra.mxu0 %v371_v29  ;;  %v23_v47 = vld [vmem:[%s522_s1] sm:$0x3]  ;;  %s318_s29 = sshll.u32 %s410_s3, 4  ;;  %s319_s29 = int_to_ptr.vmem [resolvable:$true] %s318_s29 }
  0x14   :  { %347 = vmatprep.subr.bf16.mxu0 %v372_v30  ;;  %v24_v48 = vld [vmem:[%s523_s2] sm:$0x3]  ;;  %v88_v49 = vrot.slane %v23_v47, %v87_v45  ;;  %v92_v50 = vrot.slane %v23_v47, %v91_v46  ;;  %s386_s30 = scalar_lea.vmem %s319_s29, 32  ;;  %p391_p1 = scmp.lt.s32.totalorder %s319_s29, %s319_s29 }
  0x15   :  { %v107_v51 = vrot.slane %v24_v48, %v87_v45  ;;  %v111_v52 = vrot.slane %v24_v48, %v91_v46  ;;  %p387_p0 = scmp.ne.s32.totalorder %s319_s29, %s386_s30  ;;  %p392_p2 = scmp.lt.s32.totalorder %s386_s30, %s386_s30 }
  0x16   :  { %v93_v53 = vcombine.low %v88_v49, %v92_v50 }
  0x17   :  { %348 = vmatpush3.bf16.msra.mxu0 %v373_v31  ;;  %v112_v54 = vcombine.low %v107_v51, %v111_v52  ;;  %p393_p3 = por %p392_p2, %p391_p1 }
  0x18   :  { %349 = vmatprep.subr.bf16.mxu0 %v374_v32  ;;  %v100_v57 = vrot.slane %v93_v53, %v447_v6 }
  0x19   :  { %v119_v59 = vrot.slane %v112_v54, %v447_v6  ;;  %p394_p4 = pnand %p393_p3, %p387_p0 }
  0x1b   :  { %350 = vmatpush3.bf16.msra.mxu0 %v375_v33 }
  0x1c   :  { %351 = vmatprep.subr.bf16.mxu0 %v376_v34 }
  0x1f   :  { %352 = vmatpush3.bf16.msra.mxu0 %v377_v35 }
  0x20   :  { %353 = vmatprep.subr.bf16.mxu0 %v378_v36 }
  0x23   :  { %354 = vmatpush3.bf16.msra.mxu0 %v379_v37 }
  0x24   :  { %355 = vmatprep.subr.bf16.mxu0 %v380_v38 }
  0x27   :  { %356 = vmatpush3.bf16.msra.mxu0 %v381_v39 }
  0x28   :  { %357 = vmatprep.subr.bf16.mxu0 %v382_v40 }
  0x2b   :  { %358 = vmatpush3.bf16.msra.mxu0 %v383_v41 }
  0x97   :  { %v41_v16 = vpop.xlane.xlu0 %40 }
  0x98   :  { %v43_v17 = vmul.f32 0.00390625, %v41_v16 }
  0x9a   :  { %v51_v18 = vrot.slane %v43_v17, %v50_v15 }
  0x9c   :  { %v53_v19 = vsub.f32 %v22_v3, %v51_v18  ;;  %v326_v3 = vld [vmem:[%s525_s4] ss:$0 sm:$0xff] }
  0x9e   :  { %v54_v20 = vmul.f32 %v53_v19, %v53_v19 }
  0xa0   :  { %v62_v21 = vrot.slane %v54_v20, %v447_v6 }
  0xa2   :  { %v63_v22 = vcombine.high %v62_v21, %v62_v21  ;;  %v66_v23 = vsel %vm36_vm0, %v62_v21, 0.0 }
  0xa4   :  { %v67_v24 = vsel %vm36_vm0, %v63_v22, 0.0 }
  0xa5   :  { %v68_v25 = vadd.f32 %v67_v24, %v66_v23 }
  0xa7   :  { %69 = vadd.xlane.f32.xlu0 %v68_v25 }
 0x130   :  { %v70_v42 = vpop.xlane.xlu0 %69 }
 0x131   :  { %v71_v43 = vmul.f32 0.00390625, %v70_v42 }
 0x133   :  { %v72_v44 = vadd.f32 1e-06, %v71_v43 }
 0x135   :  { %384 = vrsqrt.f32 %v72_v44 }
 0x142   :  { %v385_v55 = vpop.eup %384 }
 0x143   :  { %v81_v56 = vrot.slane %v385_v55, %v50_v15 }
 0x145   :  { %v83_v58 = vmul.f32 %v81_v56, %v53_v19 }
 0x147   :  { %v102_v60 = vmul.f32 %v100_v57, %v83_v58 }
 0x149   :  { %v121_v61 = vadd.f32 %v119_v59, %v102_v60 }
 0x14b   :  { %v129_v62 = vrot.slane %v121_v61, %v447_v6 }
 0x14d   :  { %v130_v63 = vcombine.high %v129_v62, %v129_v62  ;;  %v133_v1 = vpack.c.bf16 %v129_v62, %v129_v62 }
 0x14f   :  { %v134_v0 = vpack.c.bf16 %v130_v63, %v130_v63 }
 0x151   :  { %302 = vmatprep.mubr.bf16.mxu0 %v134_v0 }
 0x152   :  { %303 = vmatmul.mubr.bf16.vlgmr.msra.gmra.mxu0 %v133_v1 }
 0x212   :  { %v359_v2 = vpop.f32.mrf.mxu0 }
 0x214   :  { %v360_v4 = vpop.f32.mrf.mxu0 }
 0x215   :  { %v361_v5 = vadd.f32 %v360_v4, %v359_v2 }
 0x216   :  { %v362_v7 = vpop.f32.mrf.mxu0 }
 0x217   :  { %v305_v8 = vadd.f32 %v361_v5, %v326_v3 }
 0x218   :  { %v363_v9 = vpop.f32.mrf.mxu0 }
 0x219   :  { %311 = vst.msk [vmem:[#allocation2] sm:$0x3] %vm310_vm1, %v305_v8 }
 0x21a   :  { %397 = shalt.err (!%p394_p4)
}
 0x21b   :  { %321 = dma.vmem_to_hbm [thread:$0]  %s319_s29, 32, %s526_s5, [#allocation3]  }
 0x21c   :  { %406 = dma.done.wait [#allocation3], 32  }
 0x21d   :  { %407 = vsyncadd [#allocation3], 4294967264 }
 0x21e   :  { %325 = vsyncpa [#allocation3], 1 }

// kernel: _lambda_.4
= control target key start
LH: loop header
LB: loop body
LE: loop exit
PB: predicated region body
PF: predicated region fallthrough
CT: control target
= control target key end

     0   :  { %s7483_s0 = inlined_call_operand.vmem [shape: f32[2,17,256], index: 0, kind: input, shape index: {}]   ;;  %s7484_s1 = inlined_call_operand.vmem [shape: f32[4,1,256], index: 1, kind: input, shape index: {}, may-alias: {1,7}]   ;;  %s7485_s2 = inlined_call_operand.vmem [shape: f32[4,1,256], index: 2, kind: input, shape index: {}, may-alias: {2,6,8,12}]   ;;  %s7486_s3 = inlined_call_operand.hbm [shape: bf16[4,256,768], index: 3, kind: input, shape index: {}]   ;;  %s7487_s4 = inlined_call_operand.hbm [shape: f32[4,1,768], index: 4, kind: input, shape index: {}]   ;;  %s7488_s5 = inlined_call_operand.hbm [shape: bf16[4,256,256], index: 5, kind: input, shape index: {}]   ;;  %s7489_s6 = inlined_call_operand.vmem [shape: f32[4,1,256], index: 6, kind: input, shape index: {}, may-alias: {2,6,8,12}]   ;;  %s7490_s7 = inlined_call_operand.vmem [shape: f32[4,1,256], index: 7, kind: input, shape index: {}, may-alias: {1,7}]   ;;  %s7491_s8 = inlined_call_operand.vmem [shape: f32[4,1,256], index: 8, kind: input, shape index: {}, may-alias: {2,6,8,12}]   ;;  %s7492_s9 = inlined_call_operand.hbm [shape: bf16[4,256,1024], index: 9, kind: input, shape index: {}]   ;;  %s7493_s10 = inlined_call_operand.hbm [shape: f32[4,1,1024], index: 10, kind: input, shape index: {}]   ;;  %s7494_s11 = inlined_call_operand.hbm [shape: bf16[4,1024,256], index: 11, kind: input, shape index: {}]   ;;  %s7495_s12 = inlined_call_operand.vmem [shape: f32[4,1,256], index: 12, kind: input, shape index: {}, may-alias: {2,6,8,12}]   ;;  %s7496_s13 = inlined_call_operand.vmem [shape: f32[2,17,256], index: 13, kind: output, shape index: {}]  }
   0x1   :  { %7508 = sst [smem:[#allocation26_spill]] %s7483_s0 }
   0x2   :  { %7509 = sst [smem:[#allocation27_spill]] %s7484_s1 }
   0x3   :  { %7510 = sst [smem:[#allocation28_spill]] %s7485_s2 }
   0x4   :  { %7511 = sst [smem:[#allocation29_spill]] %s7486_s3 }
   0x5   :  { %7512 = sst [smem:[#allocation30_spill]] %s7487_s4 }
   0x6   :  { %7513 = sst [smem:[#allocation31_spill]] %s7488_s5 }
   0x7   :  { %7514 = sst [smem:[#allocation32_spill]] %s7489_s6 }
   0x8   :  { %7515 = sst [smem:[#allocation33_spill]] %s7490_s7 }
   0x9   :  { %7516 = sst [smem:[#allocation34_spill]] %s7491_s8 }
   0xa   :  { %7517 = sst [smem:[#allocation35_spill]] %s7492_s9 }
   0xb   :  { %7518 = sst [smem:[#allocation36_spill]] %s7493_s10 }
   0xc   :  { %7519 = sst [smem:[#allocation37_spill]] %s7494_s11 }
   0xd   :  { %7520 = sst [smem:[#allocation38_spill]] %s7495_s12 }
   0xe   :  { %7521 = sst [smem:[#allocation39_spill]] %s7496_s13 }
   0xf   :  { %18 = vsyncpa [#allocation3], 0 }
  0x10   :  { %20 = vsyncpa [#allocation3 + $0x1], 0 }
  0x11   :  { %21 = vsyncpa [#allocation5], 0 }
  0x12   :  { %23 = vsyncpa [#allocation5 + $0x1], 0 }
  0x13   :  { %24 = vsyncpa [#allocation8], 0 }
  0x14   :  { %26 = vsyncpa [#allocation8 + $0x1], 0 }
  0x15   :  { %27 = vsyncpa [#allocation11], 0 }
  0x16   :  { %29 = vsyncpa [#allocation11 + $0x1], 0  ;;  %s6281_s25 = smov 0   ;;  %s6283_s26 = smov 0  }
  0x17   :  { %s6285_s27 = smov 0   ;;  %s6287_s28 = smov 0  }
  0x18   :  { %s6289_s29 = smov 0   ;;  %s6291_s30 = smov 0  }
  0x19   :  { %s6293_s14 = smov 0   ;;  %s6295_s15 = smov 0  }
  0x1a LB: > { %7522 = sst [smem:[#allocation16_spill]] %s6172_s26  ;;  %s7498_s16 = sadd.s32 4294967295, %s6196_s15   ;;  %s6196_s15 = sphi %s6295_s15, %s35_s15   ;;  %s6192_s14 = sphi %s6293_s14, %s7570_s14   ;;  %s6188_s30 = sphi %s6291_s30, %s7569_s30   ;;  %s6184_s29 = sphi %s6289_s29, %s7568_s29   ;;  %s6180_s28 = sphi %s6287_s28, %s7567_s28   ;;  %s6176_s27 = sphi %s6285_s27, %s7566_s27   ;;  %s6172_s26 = sphi %s6283_s26, %s7565_s26   ;;  %s6168_s25 = sphi %s6281_s25, %s7564_s25  }
  0x1b   : > { %7523 = sst [smem:[#allocation17_spill]] %s6176_s27  ;;  %s44_s17 = sadd.s32 1, %s6188_s30 }
  0x1c   : > { %7524 = sst [smem:[#allocation18_spill]] %s6180_s28  ;;  %p45_p0 = scmp.ge.s32.totalorder %s44_s17, 4 }
  0x1d   : > { %7525 = sst [smem:[#allocation19_spill]] %s6188_s30  ;;  %s47_s18 = sadd.s32 1, %s6192_s14 }
  0x1e   : > { %7526 = sst [smem:[#allocation20_spill]] %s6192_s14  ;;  %s132_s19 = sadd.s32 1, %s6176_s27 }
  0x1f   : > { %7527 = sst [smem:[#allocation21_spill]] %s6196_s15  ;;  %p139_p1 = scmp.ne.s32.totalorder %s6176_s27, %s6172_s26 }
  0x20   : > { %s7572_s17 = smov (%p45_p0, %s44_s17), 0  ;;  %s7574_s18 = smov (!%p45_p0, %s47_s18), %s6192_s14 }
  0x21   : > { %7528 = sst [smem:[#allocation22_spill]] %s7572_s17  ;;  %s129_s20 = ssub.s32 %s6188_s30, %s7572_s17 }
  0x22   : > { %p140_p2 = scmp.eq.s32.totalorder %s6196_s15, 0  ;;  %p49_p3 = scmp.ge.s32.totalorder %s7574_s18, 2 }
  0x23   : > { %p130_p4 = scmp.eq.s32.totalorder %s129_s20, 0  ;;  %p145_p6 = scmp.ne.s32.totalorder %s6172_s26, %s6168_s25 }
  0x24   : > { %p141_p5 = por %p140_p2, %p139_p1  ;;  %s7576_s18 = smov (%p49_p3, %s7574_s18), 0 }
  0x25   : > { %7529 = sst [smem:[#allocation23_spill]] %s7576_s18  ;;  %p146_p7 = scmp.eq.s32.totalorder %s7498_s16, 0 }
  0x26   : > { %s6335_s21 = scalar_select %p130_p4, %s6176_s27, %s132_s19  }
  0x27   : > { %p5404_p8 = scmp.lt.s32.totalorder %s6196_s15, 8  ;;  %s6341_s22 = sand.u32 1, %s6176_s27  }
  0x28   : > { %7530 = sst [smem:[#allocation24_spill]] %s6335_s21  ;;  %p6343_p9 = por %p146_p7, %p145_p6 }
  0x29   : > { %s7501_s24 = sand.u32 1, %s6196_s15   ;;  %p6348_p10 = pnand %p5404_p8, %p141_p5 }
  0x2a   : > { %s5368_s25 = smul.u32 6, %s6341_s22  ;;  %p4910_p11 = scmp.ge.s32.totalorder %s6196_s15, 1 }
  0x2b   : > { %s5369_s18 = smul.u32 96, %s6188_s30  ;;  %s7533_s4 = sld [smem:[#allocation30_spill]] }
  0x2c   : > { %s476_s14 = scalar_lea.vmem [#allocation4], %s5368_s25  ;;  %p599_p12 = scmp.lt.s32.totalorder %s6196_s15, 9 }
  0x2d   : > { %s484_s21 = sshll.u32 %s476_s14, 4  ;;  %s6361_s27 = scalar_lea.sflag [#allocation5], %s7501_s24  ;;  %s485_s21 = int_to_ptr.vmem [resolvable:$true] %s484_s21 }
  0x2e   : > { %p6365_p13 = pneg %p6348_p10  ;;  %s5963_s12 = scalar_lea.vmem %s485_s21, 96 }
  0x2f   : > { %p5964_p0 = scmp.ne.s32.totalorder %s485_s21, %s5963_s12  ;;  %s6198_s17 = smov [#allocation4]  }
  0x31   : > { %s482_s16 = scalar_lea.hbm %s7533_s4, %s5369_s18  ;;  %p5966_p1 = pnand %p5964_p0, %p6365_p13 }
  0x32   : > { %s5968_s18 = sshll.u32 %s6198_s17, 4  ;;  %s5969_s18 = int_to_ptr.vmem [resolvable:$false] %s5968_s18 }
  0x33   : > { %p5967_p2 = pneg %p5966_p1  ;;  %s5970_s14 = scalar_lea.vmem %s5969_s18, 192 }
  0x34   : > { %p5971_p3 = scmp.lt.s32.totalorder %s485_s21, %s5969_s18  ;;  %p5972_p4 = scmp.lt.s32.totalorder %s5970_s14, %s5963_s12 }
  0x36   : > { %p5973_p5 = por %p5972_p4, %p5971_p3 }
  0x38   : > { %p5974_p6 = pnand %p5973_p5, %p5967_p2 }
  0x3a   : > { %5977 = shalt.err (!%p5974_p6)
}
  0x3b   : > { %5391 = dma.hbm_to_vmem [thread:$0]  (!%p6348_p10), %s482_s16, 96, %s485_s21, %s6361_s27  }
  0x3c   : > { %p6378_p7 = pnand %p4910_p11, %p599_p12  ;;  %s7502_s12 = sshll.u32 %s6341_s22, 10 }
  0x3d   : > { %s7503_s19 = sshll.u32 %s6188_s30, 14  ;;  %s7536_s9 = sld [smem:[#allocation35_spill]] }
  0x3e   : > { %s537_s24 = scalar_lea.vmem [#allocation7], %s7502_s12  ;;  %s7537_s8 = sand.u32 1, %s6196_s15  }
  0x3f   : > { %s544_s4 = sshll.u32 %s537_s24, 4  ;;  %s6393_s7 = scalar_lea.sflag [#allocation8], %s7537_s8  ;;  %s545_s4 = int_to_ptr.vmem [resolvable:$true] %s544_s4 }
  0x40   : > { %s5991_s16 = scalar_lea.vmem %s545_s4, 16384  ;;  %s6199_s21 = smov [#allocation7]  }
  0x41   : > { %p5992_p8 = scmp.ne.s32.totalorder %s545_s4, %s5991_s16  ;;  %s5996_s6 = sshll.u32 %s6199_s21, 4  ;;  %s5997_s6 = int_to_ptr.vmem [resolvable:$false] %s5996_s6 }
  0x42   : > { %s5998_s2 = scalar_lea.vmem %s5997_s6, 32768  ;;  %p5999_p0 = scmp.lt.s32.totalorder %s545_s4, %s5997_s6 }
  0x43   : > { %s543_s14 = scalar_lea.hbm %s7536_s9, %s7503_s19  ;;  %p5994_p11 = pnand %p5992_p8, %p6365_p13 }
  0x44   : > { %p6000_p1 = scmp.lt.s32.totalorder %s5998_s2, %s5991_s16 }
  0x45   : > { %p5995_p12 = pneg %p5994_p11 }
  0x46   : > { %p6001_p2 = por %p6000_p1, %p5999_p0 }
  0x48   : > { %p6002_p3 = pnand %p6001_p2, %p5995_p12 }
  0x4a   : > { %6005 = shalt.err (!%p6002_p3)
}
  0x4b   : > { %s6200_s17 = smov 512   ;;  %s6201_s8 = smov 32  }
  0x4c   : > { %5397 = dma.hbm_to_vmem [thread:$0]  (!%p6348_p10), %s543_s14, 16384, %s545_s4, %s6393_s7, %s6200_s17, %s6200_s17, %s6201_s8  }
  0x4d   : > { %s5366_s24 = smul.u32 768, %s6341_s22  ;;  %s4898_s21 = sshll.u32 %s6341_s22, 8 }
  0x4e   : > { %s5367_s18 = smul.u32 12288, %s6188_s30  ;;  %s7538_s3 = sld [smem:[#allocation29_spill]] }
  0x4f   : > { %s455_s16 = scalar_lea.vmem [#allocation2], %s5366_s24  ;;  %s452_s9 = scalar_lea.sflag [#allocation3], %s6341_s22 }
  0x50   : > { %s462_s19 = sshll.u32 %s455_s16, 4  ;;  %s6202_s0 = smov [#allocation2]   ;;  %s463_s19 = int_to_ptr.vmem [resolvable:$true] %s462_s19 }
  0x51   : > { %s6019_s1 = scalar_lea.vmem %s463_s19, 12288  ;;  %s6024_s28 = sshll.u32 %s6202_s0, 4  ;;  %s6025_s28 = int_to_ptr.vmem [resolvable:$false] %s6024_s28 }
  0x52   : > { %p6020_p4 = scmp.ne.s32.totalorder %s463_s19, %s6019_s1  ;;  %s6026_s4 = scalar_lea.vmem %s6025_s28, 24576 }
  0x53   : > { %p6027_p8 = scmp.lt.s32.totalorder %s463_s19, %s6025_s28  ;;  %p6028_p11 = scmp.lt.s32.totalorder %s6026_s4, %s6019_s1 }
  0x54   : > { %s461_s2 = scalar_lea.hbm %s7538_s3, %s5367_s18  ;;  %p6022_p5 = pnand %p6020_p4, %p6365_p13 }
  0x55   : > { %p6029_p12 = por %p6028_p11, %p6027_p8 }
  0x56   : > { %p6023_p6 = pneg %p6022_p5 }
  0x58   : > { %p6030_p0 = pnand %p6029_p12, %p6023_p6 }
  0x5a   : > { %6033 = shalt.err (!%p6030_p0)
}
  0x5b   : > { %s6203_s12 = smov 384   ;;  %s6204_s14 = smov 24  }
  0x5c   : > { %5388 = dma.hbm_to_vmem [thread:$0]  (!%p6348_p10), %s461_s2, 12288, %s463_s19, %s452_s9, %s6203_s12, %s6203_s12, %s6204_s14  }
  0x5d   : > { %s5314_s17 = sshll.u32 %s6188_s30, 12  ;;  %s495_s8 = scalar_lea.vmem [#allocation6], %s4898_s21 }
  0x5e   : > { %s502_s24 = sshll.u32 %s495_s8, 4  ;;  %s7539_s5 = sld [smem:[#allocation31_spill]]  ;;  %s503_s24 = int_to_ptr.vmem [resolvable:$true] %s502_s24 }
  0x5f   : > { %s6047_s28 = scalar_lea.vmem %s503_s24, 4096  ;;  %s6205_s1 = smov [#allocation6]  }
  0x60   : > { %p6048_p1 = scmp.ne.s32.totalorder %s503_s24, %s6047_s28  ;;  %s6052_s16 = sshll.u32 %s6205_s1, 4  ;;  %s6053_s16 = int_to_ptr.vmem [resolvable:$false] %s6052_s16 }
  0x61   : > { %s6054_s4 = scalar_lea.vmem %s6053_s16, 8192  ;;  %p6055_p4 = scmp.lt.s32.totalorder %s503_s24, %s6053_s16 }
  0x62   : > { %p6050_p2 = pnand %p6048_p1, %p6365_p13  ;;  %p6056_p5 = scmp.lt.s32.totalorder %s6054_s4, %s6047_s28 }
  0x64   : > { %s501_s0 = scalar_lea.hbm %s7539_s5, %s5314_s17  ;;  %p6051_p3 = pneg %p6050_p2 }
  0x65   : > { %p6057_p6 = por %p6056_p5, %p6055_p4 }
  0x67   : > { %p6058_p8 = pnand %p6057_p6, %p6051_p3 }
  0x69   : > { %6061 = shalt.err (!%p6058_p8)
}
  0x6a   : > { %s6206_s9 = smov 128   ;;  %s6207_s19 = smov 8  }
  0x6b   : > { %5394 = dma.hbm_to_vmem [thread:$0]  (!%p6348_p10), %s501_s0, 4096, %s503_s24, %s6361_s27, %s6206_s9, %s6206_s9, %s6207_s19  }
  0x6c   : > { %s4904_s21 = sshll.u32 %s6341_s22, 3  ;;  %s5316_s2 = sshll.u32 %s6188_s30, 7 }
  0x6d   : > { %s7540_s10 = sld [smem:[#allocation36_spill]]  ;;  %s558_s8 = scalar_lea.vmem [#allocation9], %s4904_s21 }
  0x6e   : > { %s566_s18 = sshll.u32 %s558_s8, 4  ;;  %s6208_s28 = smov [#allocation9]   ;;  %s567_s18 = int_to_ptr.vmem [resolvable:$true] %s566_s18 }
  0x6f   : > { %s6075_s6 = scalar_lea.vmem %s567_s18, 128  ;;  %s6080_s1 = sshll.u32 %s6208_s28, 4  ;;  %s6081_s1 = int_to_ptr.vmem [resolvable:$false] %s6080_s1 }
  0x70   : > { %p6076_p11 = scmp.ne.s32.totalorder %s567_s18, %s6075_s6  ;;  %s6082_s16 = scalar_lea.vmem %s6081_s1, 256 }
  0x71   : > { %p6083_p1 = scmp.lt.s32.totalorder %s567_s18, %s6081_s1  ;;  %p6084_p2 = scmp.lt.s32.totalorder %s6082_s16, %s6075_s6 }
  0x72   : > { %p6078_p12 = pnand %p6076_p11, %p6365_p13 }
  0x73   : > { %s564_s17 = scalar_lea.hbm %s7540_s10, %s5316_s2  ;;  %p6085_p3 = por %p6084_p2, %p6083_p1 }
  0x74   : > { %p6079_p0 = pneg %p6078_p12 }
  0x76   : > { %p6086_p4 = pnand %p6085_p3, %p6079_p0 }
  0x78   : > { %6089 = shalt.err (!%p6086_p4)
}
  0x79   : > { %5400 = dma.hbm_to_vmem [thread:$0]  (!%p6348_p10), %s564_s17, 128, %s567_s18, %s6393_s7  }
  0x7a   : > { %s7541_s27 = sshll.u32 %s6188_s30, 14  ;;  %s7542_s11 = sld [smem:[#allocation37_spill]] }
  0x7b   : > { %s7543_s21 = sshll.u32 %s6341_s22, 10  ;;  %s574_s14 = scalar_lea.sflag [#allocation11], %s6341_s22 }
  0x7c   : > { %s577_s2 = scalar_lea.vmem [#allocation10], %s7543_s21  ;;  %s6209_s6 = smov [#allocation10]  }
  0x7d   : > { %s584_s12 = sshll.u32 %s577_s2, 4  ;;  %s6108_s28 = sshll.u32 %s6209_s6, 4  ;;  %s585_s12 = int_to_ptr.vmem [resolvable:$true] %s584_s12  ;;  %s6109_s28 = int_to_ptr.vmem [resolvable:$false] %s6108_s28 }
  0x7e   : > { %s6103_s8 = scalar_lea.vmem %s585_s12, 16384  ;;  %s6110_s1 = scalar_lea.vmem %s6109_s28, 32768 }
  0x7f   : > { %p6104_p5 = scmp.ne.s32.totalorder %s585_s12, %s6103_s8  ;;  %p6111_p11 = scmp.lt.s32.totalorder %s585_s12, %s6109_s28 }
  0x80   : > { %s583_s4 = scalar_lea.hbm %s7542_s11, %s7541_s27  ;;  %p6112_p12 = scmp.lt.s32.totalorder %s6110_s1, %s6103_s8 }
  0x81   : > { %p6106_p6 = pnand %p6104_p5, %p6365_p13 }
  0x82   : > { %p6113_p0 = por %p6112_p12, %p6111_p11 }
  0x83   : > { %p6107_p8 = pneg %p6106_p6 }
  0x85   : > { %p6114_p1 = pnand %p6113_p0, %p6107_p8 }
  0x87   : > { %6117 = shalt.err (!%p6114_p1)
}
  0x88   : > { %5403 = dma.hbm_to_vmem [thread:$0]  (!%p6348_p10), %s583_s4, 16384, %s585_s12, %s574_s14, %s6206_s9, %s6206_s9, %s6207_s19  }
  0x89   : > { %603 = sbr.rel (%p6378_p7) target bundleno = 3000 (0xbb8), region = 72 }
  0x8e   : > { %s605_s7 = sand.u32 1, %s6172_s26  }
  0x8f   : > { %s5370_s13 = smul.u32 768, %s605_s7  ;;  %s606_s22 = scalar_lea.sflag [#allocation3], %s605_s7 }
  0x91   : > { %s6451_s17 = scalar_lea.vmem [#allocation2], %s5370_s13 }
  0x92   : > { %6151 = dma.done.wait (%p6343_p9), %s606_s22, 12288  }
  0x93   : > { %6153 = vsyncadd (%p6343_p9), %s606_s22, 4294955008  ;;  %s7544_s20 = sadd.s32 4294967295, %s6196_s15   ;;  %s5371_s9 = smul.u32 6, %s605_s7 }
  0x94   : > { %s614_s18 = sand.u32 1, %s7544_s20  }
  0x95   : > { %s615_s19 = scalar_lea.sflag [#allocation5], %s614_s18  ;;  %s6459_s25 = scalar_lea.vmem [#allocation4], %s5371_s9 }
  0x96   : > { %6155 = dma.done.wait (%p6343_p9), %s615_s19, 4192  }
  0x97   : > { %6157 = vsyncadd (%p6343_p9), %s615_s19, 4294963104  ;;  %s4911_s16 = sshll.u32 %s605_s7, 8  ;;  %s4912_s27 = sshll.u32 %s605_s7, 10 }
  0x98   : > { %s6465_s24 = scalar_lea.vmem [#allocation6], %s4911_s16  ;;  %s633_s0 = scalar_lea.sflag [#allocation8], %s614_s18 }
  0x99   : > { %s6467_s4 = scalar_lea.vmem [#allocation7], %s4912_s27 }
  0x9a   : > { %6159 = dma.done.wait (%p6343_p9), %s633_s0, 16512  }
  0x9b   : > { %6161 = vsyncadd (%p6343_p9), %s633_s0, 4294950784  ;;  %s4913_s21 = sshll.u32 %s605_s7, 3  ;;  %s651_s12 = scalar_lea.sflag [#allocation11], %s605_s7 }
  0x9c   : > { %s6473_s2 = scalar_lea.vmem [#allocation9], %s4913_s21  ;;  %s6475_s14 = scalar_lea.vmem [#allocation10], %s4912_s27 }
  0x9d   : > { %7545 = sst [smem:[#allocation25_spill]] %s6473_s2 }
  0x9e   : > { %6163 = dma.done.wait (%p6343_p9), %s651_s12, 16384  }
  0x9f   : > { %6165 = vsyncadd (%p6343_p9), %s651_s12, 4294950912  ;;  %s7546_s8 = sld [smem:[#allocation18_spill]]  ;;  %p751_p10 = scmp.lt.s32.totalorder %s6184_s29, 1 }
  0xa0   : > { %s7547_s22 = sld [smem:[#allocation26_spill]] }
  0xa1   : > { %s7578_s29 = smov (!%p751_p10, %s6184_s29), 1  ;;  %s7549_s0 = sld [smem:[#allocation28_spill]] }
  0xa2   : > { %s5372_s28 = smul.u32 48, %s7578_s29  ;;  %s7551_s5 = sld [smem:[#allocation33_spill]] }
  0xa3   : > { %s7552_s26 = sld [smem:[#allocation34_spill]] }
  0xa4   : > { %s7553_s20 = sld [smem:[#allocation38_spill]] }
  0xa5   : > { %p756_p13 = scmp.lt.s32.totalorder %s7546_s8, 3  ;;  %s7554_s16 = sld [smem:[#allocation39_spill]] }
  0xa6   : > { %s755_s23 = scalar_lea.vmem %s7547_s22, %s5372_s28  ;;  %p4923_p9 = scmp.ne.s32.totalorder %s7546_s8, 0 }
  0xa7   : > { %s757_s6 = scalar_select %p756_p13, %s7546_s8, 3 }
  0xa9   : > { %s6485_s1 = sshll.u32 %s757_s6, 1  ;;  %s7550_s6 = sld [smem:[#allocation32_spill]] }
  0xaa   : > { %s763_s29 = scalar_lea.vmem %s7549_s0, %s6485_s1  ;;  %s771_s10 = scalar_lea.vmem %s7551_s5, %s6485_s1 }
  0xab   : > { %s775_s22 = scalar_lea.vmem %s7552_s26, %s6485_s1  ;;  %s779_s18 = scalar_lea.vmem %s7553_s20, %s6485_s1 }
  0xac   : > { %s6517_s27 = scalar_lea.vmem %s7554_s16, %s5372_s28  ;;  %789 = sbr.rel (%p4923_p9) target bundleno = 181 (0xb5), region = 100 }
  0xaf   : > { %s767_s3 = scalar_lea.vmem %s7550_s6, %s6485_s1 }
  0xb1   : > { %v790_v0 = vld [vmem:[%s755_s23] sm:$0xff]  ;;  %v791_v1 = vld [vmem:[%s755_s23 + $0x8] sm:$0xff]  ;;  %v792_v2 = vld [vmem:[%s755_s23 + $0x10] sm:$0xff] }
  0xb2   : > { %796 = vst [vmem:[%s6517_s27] sm:$0xff] %v790_v0  ;;  %797 = vst [vmem:[%s6517_s27 + $0x8] sm:$0xff] %v791_v1  ;;  %v793_v3 = vld [vmem:[%s755_s23 + $0x18] sm:$0xff]  ;;  %v794_v4 = vld [vmem:[%s755_s23 + $0x20] sm:$0x1] }
  0xb3   : > { %798 = vst [vmem:[%s6517_s27 + $0x10] sm:$0xff] %v792_v2  ;;  %v795_v5 = vld [vmem:[%s755_s23 + $0x28] sm:$0x1]  ;;  %799 = vst [vmem:[%s6517_s27 + $0x18] sm:$0xff] %v793_v3 }
  0xb4   : > { %800 = vst [vmem:[%s6517_s27 + $0x20] sm:$0x1] %v794_v4  ;;  %801 = vst [vmem:[%s6517_s27 + $0x28] sm:$0x1] %v795_v5 }
  0xb5 PF: > { %vm816_vm0 = vcmask 1040384   ;;  %v5476_v17 = vld [vmem:[%s6451_s17 + $0x154] ss:$24 sps:$4 sm:$0xff]   ;;  %v5478_v18 = vld [vmem:[%s6451_s17 + $0x150] ss:$24 sps:$4 sm:$0xff]   ;;  %s7555_s26 = sld [smem:[#allocation27_spill]] }
  0xb6   : > { %v5479_v19 = vld [vmem:[%s6451_s17 + $0x15c] ss:$24 sps:$4 sm:$0xff]   ;;  %v5481_v20 = vld [vmem:[%s6451_s17 + $0x158] ss:$24 sps:$4 sm:$0xff]   ;;  %1510 = vmatprep.subr.bf16.mxu0 %v5476_v17  ;;  %v5485_v22 = vld [vmem:[%s6451_s17 + $0x12c] ss:$24 sps:$4 sm:$0xff]  }
  0xb7   : > { %v5482_v21 = vld [vmem:[%s6451_s17 + $0x124] ss:$24 sps:$4 sm:$0xff]   ;;  %1561 = vmatprep.subr.bf16.mxu1 %v5479_v19  ;;  %1511 = vmatpush1.bf16.msra.mxu0 %v5478_v18  ;;  %v5484_v23 = vld [vmem:[%s6451_s17 + $0x120] ss:$24 sps:$4 sm:$0xff]   ;;  %v5488_v25 = vld [vmem:[%s6451_s17 + $0xf4] ss:$24 sps:$4 sm:$0xff]  }
  0xb8   : > { %1562 = vmatpush1.bf16.msra.mxu1 %v5481_v20  ;;  %v5487_v24 = vld [vmem:[%s6451_s17 + $0x128] ss:$24 sps:$4 sm:$0xff]   ;;  %1512 = vmatprep.subr.bf16.mxu0 %v5482_v21  ;;  %v5491_v26 = vld [vmem:[%s6451_s17 + $0xfc] ss:$24 sps:$4 sm:$0xff]   ;;  %v5493_v28 = vld [vmem:[%s6451_s17 + $0xf8] ss:$24 sps:$4 sm:$0xff]  }
  0xb9   : > { %v6527_v6 = vld [vmem:[%s6517_s27] sm:$0xff]  ;;  %v6530_v7 = vld [vmem:[%s6517_s27 + $0x8] sm:$0xff]  ;;  %1563 = vmatprep.subr.bf16.mxu1 %v5485_v22  ;;  %v5503_v34 = vld [vmem:[%s6451_s17 + $0x9c] ss:$24 sps:$4 sm:$0xff]   ;;  %vm1750_vm1 = vcmask 138240   ;;  %vm1757_vm2 = vcmask 131072  }
  0xba   : > { %v810_v9 = vadd.f32 %v6530_v7, %v6527_v6  ;;  %v6543_v12 = vld [vmem:[%s6517_s27 + $0x10] sm:$0xff]  ;;  %v6546_v13 = vld [vmem:[%s6517_s27 + $0x18] sm:$0xff]  ;;  %v5497_v30 = vld [vmem:[%s6451_s17 + $0xcc] ss:$24 sps:$4 sm:$0xff]  }
  0xbb   : > { %v6533_v8 = vld [vmem:[%s6517_s27 + $0x20] sm:$0x1]  ;;  %v6538_v10 = vld [vmem:[%s6517_s27 + $0x28] sm:$0x1]  ;;  %v813_v16 = vadd.f32 %v6546_v13, %v6543_v12  ;;  %1513 = vmatpush1.bf16.msra.mxu0 %v5484_v23  ;;  %v5494_v29 = vld [vmem:[%s6451_s17 + $0xc4] ss:$24 sps:$4 sm:$0xff]   ;;  %s7556_s30 = scalar_lea.vmem %s7555_s26, %s6485_s1 }
  0xbc   : > { %v817_v11 = vsel %vm816_vm0, %v6533_v8, 0.0  ;;  %v818_v14 = vsel %vm816_vm0, %v6538_v10, 0.0  ;;  %811 = vadd.xlane.f32.xlu0 %v810_v9  ;;  %1564 = vmatpush1.bf16.msra.mxu1 %v5487_v24  ;;  %v5490_v27 = vld [vmem:[%s6451_s17 + $0xf0] ss:$24 sps:$4 sm:$0xff]   ;;  %v5496_v31 = vld [vmem:[%s6451_s17 + $0xc0] ss:$24 sps:$4 sm:$0xff]  }
  0xbd   : > { %v819_v15 = vadd.f32 %v818_v14, %v817_v11  ;;  %1514 = vmatprep.subr.bf16.mxu0 %v5488_v25  ;;  %1565 = vmatprep.subr.bf16.mxu1 %v5491_v26  ;;  %v5499_v32 = vld [vmem:[%s6451_s17 + $0xc8] ss:$24 sps:$4 sm:$0xff]   ;;  %v5500_v33 = vld [vmem:[%s6451_s17 + $0x94] ss:$24 sps:$4 sm:$0xff]   ;;  %v5505_v36 = vld [vmem:[%s6451_s17 + $0x98] ss:$24 sps:$4 sm:$0xff]  }
  0xbe   : > { %v5502_v35 = vld [vmem:[%s6451_s17 + $0x90] ss:$24 sps:$4 sm:$0xff]   ;;  %v5506_v37 = vld [vmem:[%s6451_s17 + $0x64] ss:$24 sps:$4 sm:$0xff]   ;;  %v5508_v39 = vld [vmem:[%s6451_s17 + $0x60] ss:$24 sps:$4 sm:$0xff]  }
  0xbf   : > { %820 = vadd.xlane.f32.xlu1 %v819_v15  ;;  %1515 = vmatpush1.bf16.msra.mxu0 %v5490_v27  ;;  %v5509_v38 = vld [vmem:[%s6451_s17 + $0x6c] ss:$24 sps:$4 sm:$0xff]   ;;  %v5511_v40 = vld [vmem:[%s6451_s17 + $0x68] ss:$24 sps:$4 sm:$0xff]   ;;  %v5515_v42 = vld [vmem:[%s6451_s17 + $0x3c] ss:$24 sps:$4 sm:$0xff]  }
  0xc0   : > { %814 = vadd.xlane.f32.xlu0 %v813_v16  ;;  %1566 = vmatpush1.bf16.msra.mxu1 %v5493_v28  ;;  %v5512_v41 = vld [vmem:[%s6451_s17 + $0x34] ss:$24 sps:$4 sm:$0xff]   ;;  %v5514_v43 = vld [vmem:[%s6451_s17 + $0x30] ss:$24 sps:$4 sm:$0xff]   ;;  %v5518_v45 = vld [vmem:[%s6451_s17 + $0x4] ss:$24 sps:$4 sm:$0xff]  }
  0xc1   : > { %1516 = vmatprep.subr.bf16.mxu0 %v5494_v29  ;;  %1567 = vmatprep.subr.bf16.mxu1 %v5497_v30  ;;  %v5517_v44 = vld [vmem:[%s6451_s17 + $0x38] ss:$24 sps:$4 sm:$0xff]   ;;  %v5521_v46 = vld [vmem:[%s6451_s17 + $0xc] ss:$24 sps:$4 sm:$0xff]   ;;  %v5523_v48 = vld [vmem:[%s6451_s17 + $0x8] ss:$24 sps:$4 sm:$0xff]  }
  0xc2   : > { %v5520_v47 = vld [vmem:[%s6451_s17] ss:$24 sps:$4 sm:$0xff]   ;;  %v5524_v49 = vld [vmem:[%s6451_s17 + $0x2d4] ss:$24 sps:$4 sm:$0xff]   ;;  %v5526_v51 = vld [vmem:[%s6451_s17 + $0x2d0] ss:$24 sps:$4 sm:$0xff]  }
  0xc3   : > { %1517 = vmatpush1.bf16.msra.mxu0 %v5496_v31  ;;  %v5527_v50 = vld [vmem:[%s6451_s17 + $0x2dc] ss:$24 sps:$4 sm:$0xff]   ;;  %v5529_v11 = vld [vmem:[%s6451_s17 + $0x2d8] ss:$24 sps:$4 sm:$0xff]   ;;  %v5533_v14 = vld [vmem:[%s6451_s17 + $0x2ac] ss:$24 sps:$4 sm:$0xff]  }
  0xc4   : > { %1568 = vmatpush1.bf16.msra.mxu1 %v5499_v32  ;;  %1518 = vmatprep.subr.bf16.mxu0 %v5500_v33  ;;  %v5535_v15 = vld [vmem:[%s6451_s17 + $0x2a8] ss:$24 sps:$4 sm:$0xff]   ;;  %v5536_v16 = vld [vmem:[%s6451_s17 + $0x274] ss:$24 sps:$4 sm:$0xff]   ;;  %v5541_v19 = vld [vmem:[%s6451_s17 + $0x278] ss:$24 sps:$4 sm:$0xff]  }
  0xc5   : > { %1569 = vmatprep.subr.bf16.mxu1 %v5503_v34  ;;  %v5538_v17 = vld [vmem:[%s6451_s17 + $0x270] ss:$24 sps:$4 sm:$0xff]   ;;  %v5539_v18 = vld [vmem:[%s6451_s17 + $0x27c] ss:$24 sps:$4 sm:$0xff]   ;;  %v5544_v21 = vld [vmem:[%s6451_s17 + $0x240] ss:$24 sps:$4 sm:$0xff]  }
  0xc6   : > { %v5542_v20 = vld [vmem:[%s6451_s17 + $0x244] ss:$24 sps:$4 sm:$0xff]   ;;  %v5547_v23 = vld [vmem:[%s6451_s17 + $0x248] ss:$24 sps:$4 sm:$0xff]   ;;  %v5548_v24 = vld [vmem:[%s6451_s17 + $0x214] ss:$24 sps:$4 sm:$0xff]  }
  0xc7   : > { %1519 = vmatpush1.bf16.msra.mxu0 %v5502_v35  ;;  %v5545_v22 = vld [vmem:[%s6451_s17 + $0x24c] ss:$24 sps:$4 sm:$0xff]   ;;  %v5551_v25 = vld [vmem:[%s6451_s17 + $0x21c] ss:$24 sps:$4 sm:$0xff]   ;;  %v5550_v26 = vld [vmem:[%s6451_s17 + $0x210] ss:$24 sps:$4 sm:$0xff]  }
  0xc8   : > { %1570 = vmatpush1.bf16.msra.mxu1 %v5505_v36  ;;  %1520 = vmatprep.subr.bf16.mxu0 %v5506_v37  ;;  %v5553_v27 = vld [vmem:[%s6451_s17 + $0x218] ss:$24 sps:$4 sm:$0xff]   ;;  %v5554_v28 = vld [vmem:[%s6451_s17 + $0x1e4] ss:$24 sps:$4 sm:$0xff]   ;;  %v5559_v31 = vld [vmem:[%s6451_s17 + $0x1e8] ss:$24 sps:$4 sm:$0xff]  }
  0xc9   : > { %1571 = vmatprep.subr.bf16.mxu1 %v5509_v38  ;;  %v5557_v29 = vld [vmem:[%s6451_s17 + $0x1ec] ss:$24 sps:$4 sm:$0xff]   ;;  %v5556_v30 = vld [vmem:[%s6451_s17 + $0x1e0] ss:$24 sps:$4 sm:$0xff]   ;;  %v5563_v33 = vld [vmem:[%s6451_s17 + $0x1bc] ss:$24 sps:$4 sm:$0xff]  }
  0xca   : > { %v5560_v32 = vld [vmem:[%s6451_s17 + $0x1b4] ss:$24 sps:$4 sm:$0xff]   ;;  %v5562_v34 = vld [vmem:[%s6451_s17 + $0x1b0] ss:$24 sps:$4 sm:$0xff]   ;;  %v5566_v36 = vld [vmem:[%s6451_s17 + $0x184] ss:$24 sps:$4 sm:$0xff]  }
  0xcb   : > { %1521 = vmatpush1.bf16.msra.mxu0 %v5508_v39  ;;  %v5565_v35 = vld [vmem:[%s6451_s17 + $0x1b8] ss:$24 sps:$4 sm:$0xff]   ;;  %v5569_v37 = vld [vmem:[%s6451_s17 + $0x18c] ss:$24 sps:$4 sm:$0xff]   ;;  %v5571_v39 = vld [vmem:[%s6451_s17 + $0x188] ss:$24 sps:$4 sm:$0xff]  }
  0xcc   : > { %1572 = vmatpush1.bf16.msra.mxu1 %v5511_v40  ;;  %1522 = vmatprep.subr.bf16.mxu0 %v5512_v41  ;;  %v5568_v38 = vld [vmem:[%s6451_s17 + $0x180] ss:$24 sps:$4 sm:$0xff]   ;;  %v5574_v40 = vld [vmem:[%s6451_s17 + $0x164] ss:$24 sps:$4 sm:$0xff]  }
  0xcd   : > { %1573 = vmatprep.subr.bf16.mxu1 %v5515_v42 }
  0xcf   : > { %1523 = vmatpush1.bf16.msra.mxu0 %v5514_v43 }
  0xd0   : > { %1574 = vmatpush1.bf16.msra.mxu1 %v5517_v44  ;;  %1524 = vmatprep.subr.bf16.mxu0 %v5518_v45 }
  0xd1   : > { %1575 = vmatprep.subr.bf16.mxu1 %v5521_v46 }
  0xd3   : > { %1525 = vmatpush1.bf16.msra.mxu0 %v5520_v47 }
  0xd4   : > { %1576 = vmatpush1.bf16.msra.mxu1 %v5523_v48  ;;  %1526 = vmatprep.subr.bf16.mxu0 %v5524_v49  ;;  %v865_v49 = vlaneseq }
  0xd5   : > { %1577 = vmatprep.subr.bf16.mxu1 %v5527_v50 }
  0xd7   : > { %1527 = vmatpush2.bf16.msra.mxu0 %v5526_v51  ;;  %v6649_v51 = vshrl.u32 %v865_v49, 7  ;;  %v5614_v49 = vld [vmem:[%s6451_s17 + $0x1c0] ss:$24 sps:$4 sm:$0xff]  }
  0xd8   : > { %1578 = vmatpush2.bf16.msra.mxu1 %v5529_v11 }
  0xd9   : > { %1579 = vmatprep.subr.bf16.mxu1 %v5533_v14 }
  0xdc   : > { %1580 = vmatpush2.bf16.msra.mxu1 %v5535_v15 }
  0xdd   : > { %1581 = vmatprep.subr.bf16.mxu1 %v5539_v18 }
  0xe0   : > { %1582 = vmatpush2.bf16.msra.mxu1 %v5541_v19  ;;  %v5572_v19 = vld [vmem:[%s6451_s17 + $0x160] ss:$24 sps:$4 sm:$0xff]  }
  0xe1   : > { %1583 = vmatprep.subr.bf16.mxu1 %v5545_v22  ;;  %v5580_v22 = vld [vmem:[%s6451_s17 + $0x104] ss:$24 sps:$4 sm:$0xff]  }
  0xe4   : > { %1584 = vmatpush2.bf16.msra.mxu1 %v5547_v23 }
  0xe5   : > { %1585 = vmatprep.subr.bf16.mxu1 %v5551_v25 }
  0xe8   : > { %1586 = vmatpush2.bf16.msra.mxu1 %v5553_v27  ;;  %v5581_v27 = vld [vmem:[%s6451_s17 + $0xd0] ss:$24 sps:$4 sm:$0xff]  }
  0xe9   : > { %1587 = vmatprep.subr.bf16.mxu1 %v5557_v29  ;;  %v5584_v29 = vld [vmem:[%s6451_s17 + $0xa0] ss:$24 sps:$4 sm:$0xff]  }
  0xec   : > { %1588 = vmatpush2.bf16.msra.mxu1 %v5559_v31  ;;  %v5587_v31 = vld [vmem:[%s6451_s17 + $0x70] ss:$24 sps:$4 sm:$0xff]  }
  0xed   : > { %1589 = vmatprep.subr.bf16.mxu1 %v5563_v33  ;;  %v5590_v33 = vld [vmem:[%s6451_s17 + $0x40] ss:$24 sps:$4 sm:$0xff]  }
  0xf0   : > { %1590 = vmatpush2.bf16.msra.mxu1 %v5565_v35  ;;  %v5593_v35 = vld [vmem:[%s6451_s17 + $0x10] ss:$24 sps:$4 sm:$0xff]  }
  0xf1   : > { %1591 = vmatprep.subr.bf16.mxu1 %v5569_v37  ;;  %v5596_v37 = vld [vmem:[%s6451_s17 + $0x2e0] ss:$24 sps:$4 sm:$0xff]  }
  0xf4   : > { %1592 = vmatpush2.bf16.msra.mxu1 %v5571_v39  ;;  %v5599_v39 = vld [vmem:[%s6451_s17 + $0x2b0] ss:$24 sps:$4 sm:$0xff]  }
 0x145   : > { %v812_v52 = vpop.xlane.xlu0 %811 }
 0x146   : > { %v823_v53 = vmul.f32 0.00390625, %v812_v52  ;;  %v6652_v52 = vsub.s32 1, %v6649_v51 }
 0x148   : > { %v821_v54 = vpop.xlane.xlu1 %820  ;;  %v6588_v55 = vsub.f32 %v6527_v6, %v823_v53  ;;  %v6591_v56 = vsub.f32 %v6530_v7, %v823_v53  ;;  %v6655_v53 = vsub.s32 0, %v6649_v51 }
 0x149   : > { %v825_v57 = vmul.f32 0.00390625, %v821_v54  ;;  %v815_v58 = vpop.xlane.xlu0 %814  ;;  %v808_v54 = vld [vmem:[%s7556_s30] sm:$0x3] }
 0x14a   : > { %v824_v61 = vmul.f32 0.00390625, %v815_v58  ;;  %v832_v62 = vmul.f32 %v6588_v55, %v6588_v55  ;;  %v833_v63 = vmul.f32 %v6591_v56, %v6591_v56  ;;  %v809_v58 = vld [vmem:[%s763_s29] sm:$0x3] }
 0x14b   : > { %v6594_v59 = vsub.f32 %v6533_v8, %v825_v57  ;;  %v6597_v60 = vsub.f32 %v6538_v10, %v825_v57 }
 0x14c   : > { %v6604_v0 = vsub.f32 %v6543_v12, %v824_v61  ;;  %v6607_v1 = vsub.f32 %v6546_v13, %v824_v61  ;;  %v838_v4 = vadd.f32 %v833_v63, %v832_v62  ;;  %v5530_v12 = vld [vmem:[%s6451_s17 + $0x2a4] ss:$24 sps:$4 sm:$0xff]   ;;  %v5532_v13 = vld [vmem:[%s6451_s17 + $0x2a0] ss:$24 sps:$4 sm:$0xff]   ;;  %v872_v61 = vrot.slane %v808_v54, %v6652_v52 }
 0x14d   : > { %v836_v2 = vmul.f32 %v6594_v59, %v6594_v59  ;;  %v837_v3 = vmul.f32 %v6597_v60, %v6597_v60  ;;  %1528 = vmatprep.subr.bf16.mxu0 %v5530_v12  ;;  %v868_v62 = vrot.slane %v808_v54, %v6655_v53  ;;  %v5617_v54 = vld [vmem:[%s6451_s17 + $0x190] ss:$24 sps:$4 sm:$0xff]  }
 0x14e   : > { %v834_v7 = vmul.f32 %v6604_v0, %v6604_v0  ;;  %v835_v8 = vmul.f32 %v6607_v1, %v6607_v1  ;;  %839 = vadd.xlane.f32.xlu1 %v838_v4  ;;  %1529 = vmatpush2.bf16.msra.mxu0 %v5532_v13  ;;  %v889_v4 = vrot.slane %v809_v58, %v6652_v52 }
 0x14f   : > { %v844_v5 = vsel %vm816_vm0, %v836_v2, 0.0  ;;  %v845_v6 = vsel %vm816_vm0, %v837_v3, 0.0  ;;  %1530 = vmatprep.subr.bf16.mxu0 %v5536_v16 }
 0x150   : > { %v846_v9 = vadd.f32 %v845_v6, %v844_v5  ;;  %v841_v10 = vadd.f32 %v835_v8, %v834_v7  ;;  %v885_v5 = vrot.slane %v809_v58, %v6655_v53  ;;  %v1014_v58 = vsub.s32 3, %v6649_v51 }
 0x152   : > { %842 = vadd.xlane.f32.xlu0 %v841_v10  ;;  %847 = vadd.xlane.f32.xlu1 %v846_v9 }
 0x153   : > { %1531 = vmatpush2.bf16.msra.mxu0 %v5538_v17 }
 0x154   : > { %1532 = vmatprep.subr.bf16.mxu0 %v5542_v20 }
 0x157   : > { %1533 = vmatpush2.bf16.msra.mxu0 %v5544_v21 }
 0x158   : > { %1534 = vmatprep.subr.bf16.mxu0 %v5548_v24  ;;  %v5578_v24 = vld [vmem:[%s6451_s17 + $0x100] ss:$24 sps:$4 sm:$0xff]  }
 0x15b   : > { %1535 = vmatpush2.bf16.msra.mxu0 %v5550_v26  ;;  %v5583_v26 = vld [vmem:[%s6451_s17 + $0xd4] ss:$24 sps:$4 sm:$0xff]  }
 0x15c   : > { %1536 = vmatprep.subr.bf16.mxu0 %v5554_v28  ;;  %v5586_v28 = vld [vmem:[%s6451_s17 + $0xa4] ss:$24 sps:$4 sm:$0xff]  }
 0x15f   : > { %1537 = vmatpush2.bf16.msra.mxu0 %v5556_v30  ;;  %v5589_v30 = vld [vmem:[%s6451_s17 + $0x74] ss:$24 sps:$4 sm:$0xff]  }
 0x160   : > { %1538 = vmatprep.subr.bf16.mxu0 %v5560_v32  ;;  %v5592_v32 = vld [vmem:[%s6451_s17 + $0x44] ss:$24 sps:$4 sm:$0xff]  }
 0x163   : > { %1539 = vmatpush2.bf16.msra.mxu0 %v5562_v34  ;;  %v5595_v34 = vld [vmem:[%s6451_s17 + $0x14] ss:$24 sps:$4 sm:$0xff]  }
 0x164   : > { %1540 = vmatprep.subr.bf16.mxu0 %v5566_v36  ;;  %v5598_v36 = vld [vmem:[%s6451_s17 + $0x2e4] ss:$24 sps:$4 sm:$0xff]  }
 0x167   : > { %1541 = vmatpush2.bf16.msra.mxu0 %v5568_v38  ;;  %v5601_v38 = vld [vmem:[%s6451_s17 + $0x2b4] ss:$24 sps:$4 sm:$0xff]  }
 0x168   : > { %1612 = vmatprep.subr.bf16.mxu0 %v5574_v40  ;;  %v5604_v40 = vld [vmem:[%s6451_s17 + $0x284] ss:$24 sps:$4 sm:$0xff]  }
 0x1d7   : > { %v840_v41 = vpop.xlane.xlu1 %839 }
 0x1d8   : > { %v849_v42 = vmul.f32 0.00390625, %v840_v41  ;;  %v5602_v41 = vld [vmem:[%s6451_s17 + $0x280] ss:$24 sps:$4 sm:$0xff]  }
 0x1da   : > { %v852_v43 = vadd.f32 1e-06, %v849_v42  ;;  %v5607_v42 = vld [vmem:[%s6451_s17 + $0x254] ss:$24 sps:$4 sm:$0xff]  }
 0x1db   : > { %v843_v44 = vpop.xlane.xlu0 %842  ;;  %v848_v45 = vpop.xlane.xlu1 %847 }
 0x1dc   : > { %v850_v46 = vmul.f32 0.00390625, %v843_v44  ;;  %5860 = vrsqrt.f32 %v852_v43  ;;  %v851_v47 = vmul.f32 0.00390625, %v848_v45  ;;  %v5605_v43 = vld [vmem:[%s6451_s17 + $0x250] ss:$24 sps:$4 sm:$0xff]   ;;  %v5610_v44 = vld [vmem:[%s6451_s17 + $0x224] ss:$24 sps:$4 sm:$0xff]  }
 0x1dd   : > { %v5608_v45 = vld [vmem:[%s6451_s17 + $0x220] ss:$24 sps:$4 sm:$0xff]  }
 0x1de   : > { %v853_v48 = vadd.f32 1e-06, %v850_v46  ;;  %v854_v50 = vadd.f32 1e-06, %v851_v47  ;;  %v5613_v46 = vld [vmem:[%s6451_s17 + $0x1f4] ss:$24 sps:$4 sm:$0xff]  }
 0x1df   : > { %v5611_v47 = vld [vmem:[%s6451_s17 + $0x1f0] ss:$24 sps:$4 sm:$0xff]  }
 0x1e0   : > { %5862 = vrsqrt.f32 %v853_v48  ;;  %v5616_v48 = vld [vmem:[%s6451_s17 + $0x1c4] ss:$24 sps:$4 sm:$0xff]  }
 0x1e1   : > { %5864 = vrsqrt.f32 %v854_v50  ;;  %v5619_v50 = vld [vmem:[%s6451_s17 + $0x194] ss:$24 sps:$4 sm:$0xff]  }
 0x1e9   : > { %v5861_v57 = vpop.eup %5860 }
 0x1ea   : > { %v859_v63 = vmul.f32 %v5861_v57, %v6591_v56  ;;  %v858_v2 = vmul.f32 %v5861_v57, %v6588_v55  ;;  %v6210_v57 = vmov 0  }
 0x1ec   : > { %v876_v8 = vmul.f32 %v872_v61, %v859_v63  ;;  %v875_v10 = vmul.f32 %v868_v62, %v858_v2 }
 0x1ed   : > { %v5863_v3 = vpop.eup %5862 }
 0x1ee   : > { %v5865_v6 = vpop.eup %5864  ;;  %v861_v7 = vmul.f32 %v5863_v3, %v6607_v1  ;;  %v860_v9 = vmul.f32 %v5863_v3, %v6604_v0  ;;  %v893_v14 = vadd.f32 %v889_v4, %v876_v8  ;;  %v892_v16 = vadd.f32 %v885_v5, %v875_v10  ;;  %v5577_v0 = vld [vmem:[%s6451_s17 + $0x134] ss:$24 sps:$4 sm:$0xff]  }
 0x1ef   : > { %v863_v11 = vmul.f32 %v5865_v6, %v6597_v60  ;;  %v862_v55 = vmul.f32 %v5865_v6, %v6594_v59  ;;  %v5575_v59 = vld [vmem:[%s6451_s17 + $0x130] ss:$24 sps:$4 sm:$0xff]  }
 0x1f0   : > { %v878_v12 = vmul.f32 %v872_v61, %v861_v7  ;;  %v877_v56 = vmul.f32 %v868_v62, %v860_v9  ;;  %v1010_v9 = vsub.s32 2, %v6649_v51 }
 0x1f1   : > { %v880_v13 = vmul.f32 %v872_v61, %v863_v11  ;;  %v879_v21 = vmul.f32 %v868_v62, %v862_v55  ;;  %v998_v61 = vld [vmem:[%s6459_s25] sm:$0x3f] }
 0x1f2   : > { %v895_v15 = vadd.f32 %v889_v4, %v878_v12  ;;  %v894_v17 = vadd.f32 %v885_v5, %v877_v56  ;;  %v1003_v62 = vrot.slane %v998_v61, %v6655_v53  ;;  %v6724_v63 = vrot.slane %v998_v61, %v1014_v58 }
 0x1f3   : > { %v897_v18 = vadd.f32 %v889_v4, %v880_v13  ;;  %v896_v23 = vadd.f32 %v885_v5, %v879_v21  ;;  %v6727_v4 = vrot.slane %v998_v61, %v6652_v52 }
 0x1f4   : > { %v899_v1 = vpack.c.bf16 %v895_v15, %v893_v14  ;;  %v6678_v20 = vpack.c.bf16 %v894_v17, %v892_v16 }
 0x1f5   : > { %v6681_v60 = vpack.c.bf16 %v897_v18, %v897_v18  ;;  %v900_v25 = vpack.c.bf16 %v896_v23, %v896_v23  ;;  %v1011_v18 = vrot.slane %v998_v61, %v1010_v9 }
 0x1f6   : > { %1542 = vmatprep.mubr.bf16.mxu0 %v899_v1  ;;  %1593 = vmatprep.mubr.bf16.mxu1 %v899_v1 }
 0x1f7   : > { %1543 = vmatmul.mubr.bf16.vlgmr.msra.gmra.mxu0 %v6678_v20  ;;  %1594 = vmatmul.mubr.bf16.vlgmr.msra.gmra.mxu1 %v6678_v20 }
 0x1f8   : > { %1613 = vmatpush1.bf16.msra.mxu0 %v5572_v19  ;;  %1552 = vmatprep.mubr.bf16.mxu0 %v6681_v60 }
 0x1f9   : > { %1603 = vmatprep.mubr.bf16.mxu1 %v6681_v60  ;;  %1614 = vmatprep.subr.bf16.mxu0 %v5577_v0 }
 0x1fc   : > { %1615 = vmatpush1.bf16.msra.mxu0 %v5575_v59 }
 0x1fd   : > { %1616 = vmatprep.subr.bf16.mxu0 %v5580_v22 }
 0x1ff   : > { %1553 = vmatmul.mubr.bf16.gmra.mxu0 %v900_v25  ;;  %1604 = vmatmul.mubr.bf16.gmra.mxu1 %v900_v25 }
 0x200   : > { %1617 = vmatpush1.bf16.msra.mxu0 %v5578_v24  ;;  %1644 = vmatprep.mubr.bf16.mxu0 %v899_v1 }
 0x201   : > { %1618 = vmatprep.subr.bf16.mxu0 %v5583_v26 }
 0x204   : > { %1619 = vmatpush1.bf16.msra.mxu0 %v5581_v27 }
 0x205   : > { %1620 = vmatprep.subr.bf16.mxu0 %v5586_v28 }
 0x208   : > { %1621 = vmatpush1.bf16.msra.mxu0 %v5584_v29 }
 0x209   : > { %1622 = vmatprep.subr.bf16.mxu0 %v5589_v30 }
 0x20c   : > { %1623 = vmatpush1.bf16.msra.mxu0 %v5587_v31 }
 0x20d   : > { %1624 = vmatprep.subr.bf16.mxu0 %v5592_v32 }
 0x210   : > { %1625 = vmatpush1.bf16.msra.mxu0 %v5590_v33 }
 0x211   : > { %1626 = vmatprep.subr.bf16.mxu0 %v5595_v34 }
 0x214   : > { %1627 = vmatpush1.bf16.msra.mxu0 %v5593_v35 }
 0x215   : > { %1628 = vmatprep.subr.bf16.mxu0 %v5598_v36  ;;  %v1022_v36 = vsub.s32 5, %v6649_v51 }
 0x218   : > { %1629 = vmatpush2.bf16.msra.mxu0 %v5596_v37 }
 0x219   : > { %1630 = vmatprep.subr.bf16.mxu0 %v5601_v38 }
 0x21c   : > { %1631 = vmatpush2.bf16.msra.mxu0 %v5599_v39  ;;  %v1018_v39 = vsub.s32 4, %v6649_v51 }
 0x21d   : > { %1632 = vmatprep.subr.bf16.mxu0 %v5604_v40  ;;  %v1023_v40 = vrot.slane %v998_v61, %v1022_v36 }
 0x220   : > { %1633 = vmatpush2.bf16.msra.mxu0 %v5602_v41 }
 0x221   : > { %1634 = vmatprep.subr.bf16.mxu0 %v5607_v42 }
 0x224   : > { %1635 = vmatpush2.bf16.msra.mxu0 %v5605_v43  ;;  %v1019_v43 = vrot.slane %v998_v61, %v1018_v39 }
 0x225   : > { %1636 = vmatprep.subr.bf16.mxu0 %v5610_v44 }
 0x228   : > { %1637 = vmatpush2.bf16.msra.mxu0 %v5608_v45 }
 0x229   : > { %1638 = vmatprep.subr.bf16.mxu0 %v5613_v46 }
 0x22c   : > { %1639 = vmatpush2.bf16.msra.mxu0 %v5611_v47 }
 0x22d   : > { %1640 = vmatprep.subr.bf16.mxu0 %v5616_v48 }
 0x230   : > { %1641 = vmatpush2.bf16.msra.mxu0 %v5614_v49  ;;  %v1796_v49 = vsel %vm816_vm0, 65535, %v6210_v57 }
 0x231   : > { %1642 = vmatprep.subr.bf16.mxu0 %v5619_v50 }
 0x234   : > { %1643 = vmatpush2.bf16.msra.mxu0 %v5617_v54 }
 0x237   : > { %1645 = vmatmul.mubr.bf16.vlgmr.msra.gmra.mxu0 %v6678_v20 }
 0x238   : > { %1654 = vmatprep.mubr.bf16.mxu0 %v6681_v60 }
 0x23f   : > { %1655 = vmatmul.mubr.bf16.gmra.mxu0 %v900_v25 }
 0x240   : > { %2244 = vmatprep.mubr.bf16.mxu0 %v6210_v57 }
 0x2b7   : > { %v1544_v2 = vpop.f32.mrf.mxu0  ;;  %v1595_v3 = vpop.f32.mrf.mxu1 }
 0x2b8   : > { %v1545_v7 = vadd.f32 %v1544_v2, %v1003_v62  ;;  %v1596_v26 = vadd.f32 %v1595_v3, %v1011_v18 }
 0x2b9   : > { %v1546_v5 = vpop.f32.mrf.mxu0  ;;  %v1597_v6 = vpop.f32.mrf.mxu1 }
 0x2ba   : > { %v1598_v8 = vadd.f32 %v1597_v6, %v6724_v63  ;;  %v1547_v12 = vadd.f32 %v1546_v5, %v6727_v4  ;;  %v1695_v14 = vmul.f32 0.088388346, %v1545_v7 }
 0x2bb   : > { %v1548_v10 = vpop.f32.mrf.mxu0  ;;  %v1599_v11 = vpop.f32.mrf.mxu1 }
 0x2bc   : > { %v1549_v56 = vadd.f32 %v1548_v10, %v1003_v62  ;;  %v6736_v20 = vmul.f32 0.088388346, %v1547_v12  ;;  %v1600_v59 = vadd.f32 %v1599_v11, %v1011_v18 }
 0x2bd   : > { %v1550_v13 = vpop.f32.mrf.mxu0  ;;  %v1601_v55 = vpop.f32.mrf.mxu1 }
 0x2be   : > { %v1696_v15 = vmul.f32 0.088388346, %v1549_v56  ;;  %v1551_v16 = vadd.f32 %v1550_v13, %v6727_v4  ;;  %v1602_v17 = vadd.f32 %v1601_v55, %v6724_v63  ;;  %v1700_v30 = vpack.c.bf16 %v1600_v59, %v1596_v26 }
 0x2bf   : > { %v1554_v1 = vpop.f32.mrf.mxu0  ;;  %v1605_v19 = vpop.f32.mrf.mxu1 }
 0x2c0   : > { %v1698_v0 = vpack.c.bf16 %v1696_v15, %v1695_v14  ;;  %v6738_v21 = vmul.f32 0.088388346, %v1551_v16  ;;  %v6740_v60 = vpack.c.bf16 %v1602_v17, %v1598_v8  ;;  %v1606_v22 = vadd.f32 %v1605_v19, %v1011_v18 }
 0x2c1   : > { %v6742_v23 = vpop.f32.mrf.mxu0  ;;  %v1607_v24 = vpop.f32.mrf.mxu1  ;;  %v1555_v33 = vadd.f32 %v1554_v1, %v1003_v62 }
 0x2c2   : > { %v1853_v25 = vpack.c.bf16 %v6738_v21, %v6736_v20  ;;  %5338 = vmatprep.mubr.bf16.mxu1 %v1698_v0  ;;  %v1701_v27 = vpack.c.bf16 %v1606_v22, %v1606_v22  ;;  %v1608_v61 = vadd.f32 %v1607_v24, %v6724_v63  ;;  %v5640_v20 = vld [vmem:[%s6465_s24 + $0x14] ss:$8 sps:$4 sm:$0xff]   ;;  %v5638_v21 = vld [vmem:[%s6465_s24 + $0x10] ss:$8 sps:$4 sm:$0xff]  }
 0x2c3   : > { %v1558_v28 = vpop.f32.mrf.mxu0  ;;  %v1609_v29 = vpop.f32.mrf.mxu1  ;;  %v1697_v34 = vmul.f32 0.088388346, %v1555_v33  ;;  %v5620_v33 = vld [vmem:[%s6465_s24 + $0x70] ss:$8 sps:$4 sm:$0xff]  }
 0x2c4   : > { %5334 = vmatprep.subr.bf16.mxu1 %v1701_v27  ;;  %v6759_v12 = vpack.c.bf16 %v1608_v61, %v1608_v61  ;;  %v1557_v61 = vadd.f32 %v6742_v23, %v6727_v4 }
 0x2c5   : > { %v1559_v31 = vpop.f32.mrf.mxu0  ;;  %v1610_v32 = vpop.f32.mrf.mxu1  ;;  %5335 = vmatpush3.bf16.xpose.msra.mxu1 %v1701_v27  ;;  %v1699_v35 = vpack.c.bf16 %v1697_v34, %v1697_v34  ;;  %v5622_v34 = vld [vmem:[%s6465_s24 + $0x74] ss:$8 sps:$4 sm:$0xff]  }
 0x2c6   : > { %5336 = vmatprep.subr.bf16.mxu1 %v1700_v30  ;;  %2212 = vmatprep.subr.bf16.mxu0 %v5622_v34 }
 0x2c7   : > { %2213 = vmatpush1.bf16.msra.mxu0 %v5620_v33 }
 0x2cd   : > { %5337 = vmatpush3.bf16.xpose.msra.mxu1 %v1700_v30 }
 0x2d4   : > { %5339 = vmatmul.mubr.bf16.vlgmr.msra.gmra.mxu1 %v1699_v35  ;;  %v5625_v35 = vld [vmem:[%s6465_s24 + $0x64] ss:$8 sps:$4 sm:$0xff]  }
 0x2d5   : > { %2214 = vmatprep.subr.bf16.mxu0 %v5625_v35 }
 0x2f7   : > { %v1646_v37 = vpop.f32.mrf.mxu0 }
 0x2f8   : > { %v1647_v5 = vadd.f32 %v1646_v37, %v1019_v43  ;;  %v5623_v37 = vld [vmem:[%s6465_s24 + $0x60] ss:$8 sps:$4 sm:$0xff]  }
 0x2f9   : > { %v1648_v38 = vpop.f32.mrf.mxu0  ;;  %2215 = vmatpush1.bf16.msra.mxu0 %v5623_v37 }
 0x2fa   : > { %v1649_v44 = vadd.f32 %v1648_v38, %v1023_v40  ;;  %v5628_v38 = vld [vmem:[%s6465_s24 + $0x54] ss:$8 sps:$4 sm:$0xff]  }
 0x2fb   : > { %v1650_v41 = vpop.f32.mrf.mxu0  ;;  %2216 = vmatprep.subr.bf16.mxu0 %v5628_v38 }
 0x2fc   : > { %v1651_v54 = vadd.f32 %v1650_v41, %v1019_v43  ;;  %v5631_v41 = vld [vmem:[%s6465_s24 + $0x44] ss:$8 sps:$4 sm:$0xff]  }
 0x2fd   : > { %v1652_v42 = vpop.f32.mrf.mxu0 }
 0x2fe   : > { %v1653_v45 = vadd.f32 %v1652_v42, %v1023_v40  ;;  %v1787_v10 = vpack.c.bf16 %v1651_v54, %v1647_v5  ;;  %v5629_v42 = vld [vmem:[%s6465_s24 + $0x40] ss:$8 sps:$4 sm:$0xff]  }
 0x2ff   : > { %v1656_v46 = vpop.f32.mrf.mxu0 }
 0x300   : > { %v6752_v47 = vpack.c.bf16 %v1653_v45, %v1649_v44  ;;  %v1657_v48 = vadd.f32 %v1656_v46, %v1019_v43  ;;  %v5634_v43 = vld [vmem:[%s6465_s24 + $0x34] ss:$8 sps:$4 sm:$0xff]   ;;  %v5632_v44 = vld [vmem:[%s6465_s24 + $0x30] ss:$8 sps:$4 sm:$0xff]   ;;  %v5637_v45 = vld [vmem:[%s6465_s24 + $0x24] ss:$8 sps:$4 sm:$0xff]  }
 0x301   : > { %v1658_v50 = vpop.f32.mrf.mxu0  ;;  %v5635_v46 = vld [vmem:[%s6465_s24 + $0x20] ss:$8 sps:$4 sm:$0xff]  }
 0x302   : > { %v1788_v62 = vpack.c.bf16 %v1657_v48, %v1657_v48  ;;  %v1659_v2 = vadd.f32 %v1658_v50, %v1023_v40  ;;  %v5626_v40 = vld [vmem:[%s6465_s24 + $0x50] ss:$8 sps:$4 sm:$0xff]  }
 0x303   : > { %v1660_v3 = vpop.f32.mrf.mxu0  ;;  %2217 = vmatpush1.bf16.msra.mxu0 %v5626_v40 }
 0x304   : > { %v1798_v6 = vand.u32 %v1796_v49, %v1788_v62  ;;  %v1941_v7 = vpack.c.bf16 %v1659_v2, %v1659_v2  ;;  %2218 = vmatprep.subr.bf16.mxu0 %v5631_v41 }
 0x305   : > { %v1661_v8 = vpop.f32.mrf.mxu0 }
 0x306   : > { %v6757_v11 = vand.u32 %v1941_v7, %v1796_v49  ;;  %5342 = vmatprep.subr.bf16.mxu1 %v1798_v6 }
 0x307   : > { %5343 = vmatpush3.bf16.msra.mxu1 %v1798_v6  ;;  %2219 = vmatpush1.bf16.msra.mxu0 %v5629_v42 }
 0x308   : > { %5344 = vmatprep.subr.bf16.mxu1 %v1787_v10  ;;  %2220 = vmatprep.subr.bf16.mxu0 %v5634_v43  ;;  %v5646_v43 = vld [vmem:[%s6465_s24 + $0xf4] ss:$8 sps:$4 sm:$0xff]  }
 0x30b   : > { %5345 = vmatpush3.bf16.msra.mxu1 %v1787_v10  ;;  %2221 = vmatpush1.bf16.msra.mxu0 %v5632_v44  ;;  %v1852_v10 = vmul.f32 0.088388346, %v1557_v61  ;;  %v5649_v61 = vld [vmem:[%s6465_s24 + $0xe4] ss:$8 sps:$4 sm:$0xff]  }
 0x30c   : > { %5350 = vmatprep.subr.bf16.mxu1 %v6759_v12  ;;  %2222 = vmatprep.subr.bf16.mxu0 %v5637_v45 }
 0x30f   : > { %2223 = vmatpush1.bf16.msra.mxu0 %v5635_v46 }
 0x310   : > { %2224 = vmatprep.subr.bf16.mxu0 %v5640_v20  ;;  %v5650_v20 = vld [vmem:[%s6465_s24 + $0xd0] ss:$8 sps:$4 sm:$0xff]  }
 0x313   : > { %2225 = vmatpush1.bf16.msra.mxu0 %v5638_v21  ;;  %v5655_v21 = vld [vmem:[%s6465_s24 + $0xc4] ss:$8 sps:$4 sm:$0xff]  }
 0x394   : > { %v5340_v56 = vpop.f32.mrf.mxu1 }
 0x395   : > { %v1758_v15 = vsel %vm1757_vm2, %v5340_v56, -inf }
 0x396   : > { %v1736_v13 = vpop.f32.mrf.mxu1 }
 0x397   : > { %v1751_v55 = vsel %vm1750_vm1, %v1736_v13, -inf }
 0x398   : > { %1752 = vmax.xlane.f32.xlu0 %v1751_v55  ;;  %v5341_v14 = vpop.f32.mrf.mxu1 }
 0x39a   : > { %v1739_v63 = vpop.f32.mrf.mxu1 }
 0x39b   : > { %v1754_v16 = vsel %vm1750_vm1, %v1739_v63, -inf }
 0x39c   : > { %1759 = vmax.xlane.f32.xlu0 %v1758_v15  ;;  %1755 = vmax.xlane.f32.xlu1 %v1754_v16 }
 0x421   : > { %v1753_v17 = vpop.xlane.xlu0 %1752 }
 0x422   : > { %v1761_v18 = vsub.f32 %v1736_v13, %v1753_v17 }
 0x424   : > { %v1764_v1 = vmul.f32 1.442695, %v1761_v18 }
 0x425   : > { %v1760_v19 = vpop.xlane.xlu0 %1759  ;;  %v1756_v0 = vpop.xlane.xlu1 %1755 }
 0x426   : > { %5866 = vpow2.f32 %v1764_v1  ;;  %v1763_v59 = vsub.f32 %v5340_v56, %v1760_v19  ;;  %v1762_v22 = vsub.f32 %v1739_v63, %v1756_v0  ;;  %v1854_v56 = vpack.c.bf16 %v1852_v10, %v1852_v10  ;;  %v5647_v10 = vld [vmem:[%s6465_s24 + $0xe0] ss:$8 sps:$4 sm:$0xff]  }
 0x428   : > { %v1768_v24 = vmul.f32 1.442695, %v1763_v59  ;;  %v1766_v26 = vmul.f32 1.442695, %v1762_v22 }
 0x42a   : > { %5868 = vpow2.f32 %v1768_v24 }
 0x42b   : > { %5870 = vpow2.f32 %v1766_v26 }
 0x433   : > { %v5867_v27 = vpop.eup %5866 }
 0x434   : > { %v1770_v28 = vsel %vm1750_vm1, %v5867_v27, 0.0 }
 0x435   : > { %1771 = vadd.xlane.f32.xlu1 %v1770_v28 }
 0x437   : > { %v5869_v29 = vpop.eup %5868 }
 0x438   : > { %v5871_v30 = vpop.eup %5870  ;;  %v1776_v31 = vsel %vm1757_vm2, %v5869_v29, 0.0 }
 0x439   : > { %1777 = vadd.xlane.f32.xlu1 %v1776_v31  ;;  %v1773_v32 = vsel %vm1750_vm1, %v5871_v30, 0.0 }
 0x43a   : > { %1774 = vadd.xlane.f32.xlu0 %v1773_v32 }
 0x4be   : > { %v1772_v48 = vpop.xlane.xlu1 %1771 }
 0x4bf   : > { %5872 = vrcp.f32 %v1772_v48 }
 0x4c2   : > { %v1778_v49 = vpop.xlane.xlu1 %1777 }
 0x4c3   : > { %v1775_v50 = vpop.xlane.xlu0 %1774  ;;  %5874 = vrcp.f32 %v1778_v49 }
 0x4c4   : > { %5876 = vrcp.f32 %v1775_v50 }
 0x4cc   : > { %v5873_v54 = vpop.eup %5872 }
 0x4cd   : > { %v1782_v5 = vmul.f32 %v5873_v54, %v5867_v27 }
 0x4d0   : > { %v5875_v62 = vpop.eup %5874 }
 0x4d1   : > { %v5877_v2 = vpop.eup %5876  ;;  %v1784_v3 = vmul.f32 %v5875_v62, %v5869_v29 }
 0x4d2   : > { %v1783_v6 = vmul.f32 %v5877_v2, %v5871_v30 }
 0x4d3   : > { %v1786_v7 = vpack.c.bf16 %v1784_v3, %v1784_v3 }
 0x4d4   : > { %v1785_v8 = vpack.c.bf16 %v1783_v6, %v1782_v5 }
 0x4d6   : > { %5346 = vmatprep.mubr.msk.bf16.mxu1 %vm1750_vm1, %v1785_v8  ;;  %v5644_v8 = vld [vmem:[%s6465_s24 + $0xf0] ss:$8 sps:$4 sm:$0xff]  }
 0x4d7   : > { %5347 = vmatmul.mubr.msk.bf16.vlgmr.msra.gmra.mxu1 %vm1750_vm1, %v1786_v7 }
 0x4d8   : > { %5351 = vmatpush3.bf16.xpose.msra.mxu1 %v6759_v12  ;;  %5354 = vmatprep.mubr.bf16.mxu1 %v1853_v25  ;;  %v5641_v25 = vld [vmem:[%s6465_s24] ss:$8 sps:$4 sm:$0xff]   ;;  %v5643_v12 = vld [vmem:[%s6465_s24 + $0x4] ss:$8 sps:$4 sm:$0xff]  }
 0x4d9   : > { %5352 = vmatprep.subr.bf16.mxu1 %v6740_v60  ;;  %2226 = vmatprep.subr.bf16.mxu0 %v5643_v12  ;;  %v5658_v12 = vld [vmem:[%s6465_s24 + $0xb4] ss:$8 sps:$4 sm:$0xff]  }
 0x4da   : > { %2227 = vmatpush1.bf16.msra.mxu0 %v5641_v25  ;;  %v5653_v25 = vld [vmem:[%s6465_s24 + $0xc0] ss:$8 sps:$4 sm:$0xff]  }
 0x4e0   : > { %5353 = vmatpush3.bf16.xpose.msra.mxu1 %v6740_v60 }
 0x4e1   : > { %5358 = vmatprep.subr.bf16.mxu1 %v6757_v11 }
 0x4e7   : > { %5355 = vmatmul.mubr.bf16.vlgmr.msra.gmra.mxu1 %v1854_v56  ;;  %v5652_v56 = vld [vmem:[%s6465_s24 + $0xd4] ss:$8 sps:$4 sm:$0xff]  }
 0x4e8   : > { %5359 = vmatpush3.bf16.msra.mxu1 %v6757_v11 }
 0x4e9   : > { %5360 = vmatprep.subr.bf16.mxu1 %v6752_v47 }
 0x4ec   : > { %5361 = vmatpush3.bf16.msra.mxu1 %v6752_v47 }
 0x4ed   : > { %2081 = vmatprep.subr.bf16.mxu1 %v5646_v43 }
 0x597   : > { %v5348_v4 = vpop.f32.mrf.mxu1 }
 0x598   : > { %v1849_v11 = vpack.c.bf16 %v5348_v4, %v5348_v4  ;;  %v5656_v4 = vld [vmem:[%s6465_s24 + $0xb0] ss:$8 sps:$4 sm:$0xff]  }
 0x599   : > { %v1834_v60 = vpop.f32.mrf.mxu1 }
 0x59b   : > { %v5349_v23 = vpop.f32.mrf.mxu1 }
 0x59c   : > { %v5659_v23 = vld [vmem:[%s6465_s24 + $0xa0] ss:$8 sps:$4 sm:$0xff]  }
 0x59d   : > { %v1837_v13 = vpop.f32.mrf.mxu1 }
 0x59e   : > { %v1848_v55 = vpack.c.bf16 %v1837_v13, %v1834_v60  ;;  %v5661_v60 = vld [vmem:[%s6465_s24 + $0xa4] ss:$8 sps:$4 sm:$0xff]   ;;  %v5664_v13 = vld [vmem:[%s6465_s24 + $0x94] ss:$8 sps:$4 sm:$0xff]  }
 0x5a0   : > { %2245 = vmatmul.mubr.bf16.vlgmr.msra.gmra.mxu0 %v1848_v55  ;;  %v5662_v55 = vld [vmem:[%s6465_s24 + $0x90] ss:$8 sps:$4 sm:$0xff]  }
 0x5a1   : > { %2254 = vmatprep.mubr.bf16.mxu0 %v6210_v57 }
 0x5a7   : > { %v5356_v14 = vpop.f32.mrf.mxu1 }
 0x5a8   : > { %2255 = vmatmul.mubr.bf16.gmra.mxu0 %v1849_v11  ;;  %v1911_v17 = vsel %vm1757_vm2, %v5356_v14, -inf  ;;  %v5667_v11 = vld [vmem:[%s6465_s24 + $0x84] ss:$8 sps:$4 sm:$0xff]  }
 0x5a9   : > { %v1891_v47 = vpop.f32.mrf.mxu1 }
 0x5aa   : > { %v1905_v63 = vsel %vm1750_vm1, %v1891_v47, -inf }
 0x5ab   : > { %1906 = vmax.xlane.f32.xlu0 %v1905_v63  ;;  %v5357_v15 = vpop.f32.mrf.mxu1 }
 0x5ad   : > { %v1894_v16 = vpop.f32.mrf.mxu1 }
 0x5ae   : > { %v1908_v18 = vsel %vm1750_vm1, %v1894_v16, -inf }
 0x5af   : > { %1912 = vmax.xlane.f32.xlu0 %v1911_v17  ;;  %1909 = vmax.xlane.f32.xlu1 %v1908_v18 }
 0x634   : > { %v1907_v1 = vpop.xlane.xlu0 %1906 }
 0x635   : > { %v1914_v19 = vsub.f32 %v1891_v47, %v1907_v1 }
 0x637   : > { %v1917_v0 = vmul.f32 1.442695, %v1914_v19  ;;  %v2269_v19 = vld [vmem:[%s767_s3] sm:$0x3] }
 0x638   : > { %v1913_v59 = vpop.xlane.xlu0 %1912  ;;  %v1910_v22 = vpop.xlane.xlu1 %1909 }
 0x639   : > { %5878 = vpow2.f32 %v1917_v0  ;;  %v1916_v24 = vsub.f32 %v5356_v14, %v1913_v59  ;;  %v1915_v26 = vsub.f32 %v1894_v16, %v1910_v22  ;;  %v5665_v14 = vld [vmem:[%s6465_s24 + $0x80] ss:$8 sps:$4 sm:$0xff]   ;;  %v5944_v22 = vld [vmem:[%s6517_s27] sm:$0xff] }
 0x63b   : > { %v1921_v27 = vmul.f32 1.442695, %v1916_v24  ;;  %v1919_v28 = vmul.f32 1.442695, %v1915_v26  ;;  %v2274_v26 = vrot.slane %v2269_v19, %v6655_v53 }
 0x63d   : > { %5880 = vpow2.f32 %v1921_v27 }
 0x63e   : > { %5882 = vpow2.f32 %v1919_v28 }
 0x646   : > { %v5879_v29 = vpop.eup %5878 }
 0x647   : > { %v1923_v30 = vsel %vm1750_vm1, %v5879_v29, 0.0 }
 0x648   : > { %1924 = vadd.xlane.f32.xlu1 %v1923_v30 }
 0x64a   : > { %v5881_v31 = vpop.eup %5880 }
 0x64b   : > { %v5883_v32 = vpop.eup %5882  ;;  %v1929_v33 = vsel %vm1757_vm2, %v5881_v31, 0.0 }
 0x64c   : > { %1930 = vadd.xlane.f32.xlu1 %v1929_v33  ;;  %v1926_v34 = vsel %vm1750_vm1, %v5883_v32, 0.0 }
 0x64d   : > { %1927 = vadd.xlane.f32.xlu0 %v1926_v34 }
 0x660   : > { %v6805_v35 = vpop.f32.mrf.mxu0 }
 0x662   : > { %v6807_v37 = vpop.f32.mrf.mxu0 }
 0x664   : > { %v6809_v38 = vpop.f32.mrf.mxu0 }
 0x666   : > { %v6811_v40 = vpop.f32.mrf.mxu0 }
 0x668   : > { %v6813_v41 = vpop.f32.mrf.mxu0 }
 0x66a   : > { %v6815_v42 = vpop.f32.mrf.mxu0 }
 0x66c   : > { %v2260_v44 = vpop.f32.mrf.mxu0 }
 0x66e   : > { %v2261_v45 = vpop.f32.mrf.mxu0 }
 0x6d1   : > { %v1925_v46 = vpop.xlane.xlu1 %1924 }
 0x6d2   : > { %5884 = vrcp.f32 %v1925_v46 }
 0x6d5   : > { %v1931_v48 = vpop.xlane.xlu1 %1930 }
 0x6d6   : > { %v1928_v49 = vpop.xlane.xlu0 %1927  ;;  %5886 = vrcp.f32 %v1931_v48 }
 0x6d7   : > { %5888 = vrcp.f32 %v1928_v49 }
 0x6df   : > { %v5885_v50 = vpop.eup %5884 }
 0x6e0   : > { %v1935_v3 = vmul.f32 %v5885_v50, %v5879_v29  ;;  %v5945_v29 = vld [vmem:[%s6517_s27 + $0x8] sm:$0xff] }
 0x6e3   : > { %v5887_v54 = vpop.eup %5886 }
 0x6e4   : > { %v5889_v62 = vpop.eup %5888  ;;  %v1937_v2 = vmul.f32 %v5887_v54, %v5881_v31 }
 0x6e5   : > { %v1936_v5 = vmul.f32 %v5889_v62, %v5883_v32  ;;  %v5948_v62 = vld [vmem:[%s6517_s27 + $0x20] sm:$0x1] }
 0x6e6   : > { %v1939_v6 = vpack.c.bf16 %v1937_v2, %v1937_v2 }
 0x6e7   : > { %v1938_v7 = vpack.c.bf16 %v1936_v5, %v1935_v3 }
 0x6e9   : > { %5362 = vmatprep.mubr.msk.bf16.mxu1 %vm1750_vm1, %v1938_v7 }
 0x6ea   : > { %5363 = vmatmul.mubr.msk.bf16.vlgmr.msra.gmra.mxu1 %vm1750_vm1, %v1939_v6 }
 0x6eb   : > { %2082 = vmatpush1.bf16.msra.mxu1 %v5644_v8  ;;  %2113 = vmatprep.mubr.bf16.mxu1 %v6210_v57 }
 0x6ec   : > { %2083 = vmatprep.subr.bf16.mxu1 %v5649_v61 }
 0x6ef   : > { %2084 = vmatpush1.bf16.msra.mxu1 %v5647_v10 }
 0x6f0   : > { %2085 = vmatprep.subr.bf16.mxu1 %v5652_v56 }
 0x6f3   : > { %2086 = vmatpush1.bf16.msra.mxu1 %v5650_v20  ;;  %v2435_v20 = vld [vmem:[%s6467_s4 + $0x1c0] sm:$0xff] }
 0x6f4   : > { %2087 = vmatprep.subr.bf16.mxu1 %v5655_v21  ;;  %v2439_v21 = vld [vmem:[%s6467_s4 + $0x1e0] sm:$0xff] }
 0x6f7   : > { %2088 = vmatpush1.bf16.msra.mxu1 %v5653_v25  ;;  %v2436_v25 = vld [vmem:[%s6467_s4 + $0x1c8] sm:$0xff] }
 0x6f8   : > { %2089 = vmatprep.subr.bf16.mxu1 %v5658_v12  ;;  %v5112_v12 = vcombine.low %v2435_v20, %v2439_v21 }
 0x6fb   : > { %2090 = vmatpush1.bf16.msra.mxu1 %v5656_v4  ;;  %v5113_v4 = vcombine.high %v2435_v20, %v2439_v21 }
 0x6fc   : > { %2091 = vmatprep.subr.bf16.mxu1 %v5661_v60  ;;  %v2440_v60 = vld [vmem:[%s6467_s4 + $0x1e8] sm:$0xff] }
 0x6ff   : > { %2092 = vmatpush1.bf16.msra.mxu1 %v5659_v23  ;;  %v2427_v23 = vld [vmem:[%s6467_s4 + $0x180] sm:$0xff] }
 0x700   : > { %2093 = vmatprep.subr.bf16.mxu1 %v5664_v13  ;;  %v2431_v13 = vld [vmem:[%s6467_s4 + $0x1a0] sm:$0xff] }
 0x703   : > { %2094 = vmatpush1.bf16.msra.mxu1 %v5662_v55  ;;  %v5114_v55 = vcombine.low %v2436_v25, %v2440_v60 }
 0x704   : > { %2095 = vmatprep.subr.bf16.mxu1 %v5667_v11  ;;  %v5115_v11 = vcombine.high %v2436_v25, %v2440_v60  ;;  %v2380_v60 = vld [vmem:[%s6467_s4 + $0x8] sm:$0xff] }
 0x706   : > { %3240 = vmatprep.subr.bf16.mxu0 %v5115_v11 }
 0x707   : > { %2096 = vmatpush1.bf16.msra.mxu1 %v5665_v14  ;;  %v5105_v14 = vcombine.high %v2427_v23, %v2431_v13  ;;  %3241 = vmatpush1.bf16.msra.mxu0 %v5114_v55 }
 0x708   : > { %3189 = vmatprep.subr.bf16.mxu1 %v5113_v4  ;;  %v2383_v4 = vld [vmem:[%s6467_s4 + $0x20] sm:$0xff] }
 0x7aa   : > { %v5364_v47 = vpop.f32.mrf.mxu1 }
 0x7ab   : > { %v2000_v18 = vpack.c.bf16 %v5364_v47, %v5364_v47  ;;  %v2428_v47 = vld [vmem:[%s6467_s4 + $0x188] sm:$0xff] }
 0x7ac   : > { %v1985_v63 = vpop.f32.mrf.mxu1 }
 0x7ae   : > { %v5365_v15 = vpop.f32.mrf.mxu1 }
 0x7af   : > { %v2419_v15 = vld [vmem:[%s6467_s4 + $0x140] sm:$0xff] }
 0x7b0   : > { %v1988_v16 = vpop.f32.mrf.mxu1 }
 0x7b1   : > { %v1999_v17 = vpack.c.bf16 %v1988_v16, %v1985_v63  ;;  %v2432_v63 = vld [vmem:[%s6467_s4 + $0x1a8] sm:$0xff] }
 0x7b2   : > { %v5107_v16 = vcombine.high %v2428_v47, %v2432_v63 }
 0x7b3   : > { %2114 = vmatmul.mubr.bf16.vlgmr.msra.gmra.mxu1 %v1999_v17  ;;  %v2423_v17 = vld [vmem:[%s6467_s4 + $0x160] sm:$0xff] }
 0x7b4   : > { %2123 = vmatprep.mubr.bf16.mxu1 %v6210_v57  ;;  %v2278_v57 = vrot.slane %v2269_v19, %v6652_v52  ;;  %3190 = vmatpush1.bf16.msra.mxu1 %v5112_v12  ;;  %v5104_v19 = vcombine.low %v2427_v23, %v2431_v13  ;;  %v2379_v12 = vld [vmem:[%s6467_s4] sm:$0xff]  ;;  %v2384_v23 = vld [vmem:[%s6467_s4 + $0x28] sm:$0xff] }
 0x7b5   : > { %3191 = vmatprep.subr.bf16.mxu1 %v5105_v14  ;;  %3242 = vmatprep.subr.bf16.mxu0 %v5107_v16  ;;  %v5057_v11 = vcombine.high %v2379_v12, %v2383_v4  ;;  %v5059_v14 = vcombine.high %v2380_v60, %v2384_v23  ;;  %v2504_v16 = vld [vmem:[%s6467_s4 + $0x3e8] sm:$0xff] }
 0x7b8   : > { %3192 = vmatpush1.bf16.msra.mxu1 %v5104_v19 }
 0x7bb   : > { %2124 = vmatmul.mubr.bf16.gmra.mxu1 %v2000_v18  ;;  %v2420_v18 = vld [vmem:[%s6467_s4 + $0x148] sm:$0xff] }
 0x873   : > { %v2115_v1 = vpop.f32.mrf.mxu1 }
 0x874   : > { %v2247_v0 = vadd.f32 %v6805_v35, %v2115_v1  ;;  %v5946_v35 = vld [vmem:[%s6517_s27 + $0x10] sm:$0xff] }
 0x875   : > { %v2117_v59 = vpop.f32.mrf.mxu1  ;;  %v2424_v1 = vld [vmem:[%s6467_s4 + $0x168] sm:$0xff] }
 0x876   : > { %v2263_v24 = vadd.f32 %v5944_v22, %v2247_v0  ;;  %v2249_v27 = vadd.f32 %v6807_v37, %v2117_v59  ;;  %v5947_v37 = vld [vmem:[%s6517_s27 + $0x18] sm:$0xff]  ;;  %v5106_v0 = vcombine.low %v2428_v47, %v2432_v63  ;;  %v5097_v59 = vcombine.high %v2419_v15, %v2423_v17  ;;  %v2499_v47 = vld [vmem:[%s6467_s4 + $0x3c0] sm:$0xff] }
 0x877   : > { %v2119_v28 = vpop.f32.mrf.mxu1  ;;  %v5099_v22 = vcombine.high %v2420_v18, %v2424_v1  ;;  %v2503_v63 = vld [vmem:[%s6467_s4 + $0x3e0] sm:$0xff] }
 0x878   : > { %v2264_v30 = vadd.f32 %v5945_v29, %v2249_v27  ;;  %v2251_v31 = vadd.f32 %v6809_v38, %v2119_v28  ;;  %v6849_v33 = vadd.f32 %v2274_v26, %v2263_v24  ;;  %v2411_v24 = vld [vmem:[%s6467_s4 + $0x100] sm:$0xff]  ;;  %v2412_v27 = vld [vmem:[%s6467_s4 + $0x108] sm:$0xff]  ;;  %v5096_v28 = vcombine.low %v2419_v15, %v2423_v17  ;;  %3243 = vmatpush1.bf16.msra.mxu0 %v5106_v0 }
 0x879   : > { %v2121_v32 = vpop.f32.mrf.mxu1  ;;  %3193 = vmatprep.subr.bf16.mxu1 %v5097_v59  ;;  %v5098_v29 = vcombine.low %v2420_v18, %v2424_v1  ;;  %3244 = vmatprep.subr.bf16.mxu0 %v5099_v22  ;;  %v2500_v15 = vld [vmem:[%s6467_s4 + $0x3c8] sm:$0xff]  ;;  %v5056_v17 = vcombine.low %v2379_v12, %v2383_v4  ;;  %v5058_v18 = vcombine.low %v2380_v60, %v2384_v23 }
 0x87a   : > { %v6851_v34 = vadd.f32 %v2278_v57, %v2264_v30  ;;  %v2265_v43 = vadd.f32 %v5946_v35, %v2251_v31  ;;  %v2253_v44 = vadd.f32 %v6811_v40, %v2121_v32  ;;  %v2403_v32 = vld [vmem:[%s6467_s4 + $0xc0] sm:$0xff]  ;;  %3194 = vmatpush1.bf16.msra.mxu1 %v5096_v28  ;;  %v5177_v1 = vcombine.high %v2499_v47, %v2503_v63  ;;  %v2484_v12 = vld [vmem:[%s6467_s4 + $0x348] sm:$0xff] }
 0x87b   : > { %v2125_v45 = vpop.f32.mrf.mxu1  ;;  %v2407_v35 = vld [vmem:[%s6467_s4 + $0xe0] sm:$0xff]  ;;  %v5179_v19 = vcombine.high %v2500_v15, %v2504_v16  ;;  %v5176_v0 = vcombine.low %v2499_v47, %v2503_v63  ;;  %v5178_v59 = vcombine.low %v2500_v15, %v2504_v16  ;;  %v2488_v60 = vld [vmem:[%s6467_s4 + $0x368] sm:$0xff] }
 0x87c   : > { %v2266_v46 = vadd.f32 %v5947_v37, %v2253_v44  ;;  %v2257_v48 = vadd.f32 %v6813_v41, %v2125_v45  ;;  %v2289_v49 = vadd.f32 %v6851_v34, %v6849_v33  ;;  %v6859_v38 = vadd.f32 %v2274_v26, %v2265_v43  ;;  %v5949_v41 = vld [vmem:[%s6517_s27 + $0x28] sm:$0x1]  ;;  %v2404_v43 = vld [vmem:[%s6467_s4 + $0xc8] sm:$0xff]  ;;  %3245 = vmatpush1.bf16.msra.mxu0 %v5098_v29 }
 0x87d   : > { %v2127_v50 = vpop.f32.mrf.mxu1  ;;  %v2408_v44 = vld [vmem:[%s6467_s4 + $0xe8] sm:$0xff] }
 0x87e   : > { %v6861_v54 = vadd.f32 %v2278_v57, %v2266_v46  ;;  %v2267_v2 = vadd.f32 %v5948_v62, %v2257_v48  ;;  %v2259_v3 = vadd.f32 %v6815_v42, %v2127_v50  ;;  %2290 = vadd.xlane.f32.xlu0 %v2289_v49  ;;  %v5081_v46 = vcombine.high %v2403_v32, %v2407_v35  ;;  %v2395_v49 = vld [vmem:[%s6467_s4 + $0x80] sm:$0xff]  ;;  %v2396_v62 = vld [vmem:[%s6467_s4 + $0x88] sm:$0xff] }
 0x87f   : > { %v2129_v40 = vpop.f32.mrf.mxu1  ;;  %v5083_v48 = vcombine.high %v2404_v43, %v2408_v44  ;;  %v2399_v50 = vld [vmem:[%s6467_s4 + $0xa0] sm:$0xff]  ;;  %v2476_v47 = vld [vmem:[%s6467_s4 + $0x308] sm:$0xff] }
 0x880   : > { %v6865_v5 = vadd.f32 %v2274_v26, %v2267_v2  ;;  %v2268_v6 = vadd.f32 %v5949_v41, %v2259_v3  ;;  %v2292_v7 = vadd.f32 %v6861_v54, %v6859_v38  ;;  %v2415_v26 = vld [vmem:[%s6467_s4 + $0x120] sm:$0xff]  ;;  %v2400_v2 = vld [vmem:[%s6467_s4 + $0xa8] sm:$0xff]  ;;  %v5080_v3 = vcombine.low %v2403_v32, %v2407_v35 }
 0x881   : > { %v2130_v8 = vpop.f32.mrf.mxu1  ;;  %v5089_v30 = vcombine.high %v2411_v24, %v2415_v26  ;;  %v5088_v45 = vcombine.low %v2411_v24, %v2415_v26  ;;  %v5082_v40 = vcombine.low %v2404_v43, %v2408_v44  ;;  %v5073_v41 = vcombine.high %v2395_v49, %v2399_v50  ;;  %v2480_v15 = vld [vmem:[%s6467_s4 + $0x328] sm:$0xff] }
 0x882   : > { %v6870_v61 = vadd.f32 %v2278_v57, %v2268_v6  ;;  %2293 = vadd.xlane.f32.xlu1 %v2292_v7  ;;  %v2295_v42 = vsel %vm816_vm0, %v6865_v5, 0.0  ;;  %v2416_v57 = vld [vmem:[%s6467_s4 + $0x128] sm:$0xff]  ;;  %v5075_v6 = vcombine.high %v2396_v62, %v2400_v2  ;;  %v2387_v7 = vld [vmem:[%s6467_s4 + $0x40] sm:$0xff]  ;;  %v5074_v20 = vcombine.low %v2396_v62, %v2400_v2 }
 0x883   : > { %v5091_v31 = vcombine.high %v2412_v27, %v2416_v57  ;;  %3195 = vmatprep.subr.bf16.mxu1 %v5089_v30  ;;  %v5090_v37 = vcombine.low %v2412_v27, %v2416_v57  ;;  %v2391_v8 = vld [vmem:[%s6467_s4 + $0x60] sm:$0xff] }
 0x884   : > { %v2296_v10 = vsel %vm816_vm0, %v6870_v61, 0.0  ;;  %3196 = vmatpush1.bf16.msra.mxu1 %v5088_v45  ;;  %v5065_v21 = vcombine.high %v2387_v7, %v2391_v8  ;;  %v5064_v13 = vcombine.low %v2387_v7, %v2391_v8  ;;  %v2492_v7 = vld [vmem:[%s6467_s4 + $0x388] sm:$0xff] }
 0x885   : > { %v2297_v56 = vadd.f32 %v2296_v10, %v2295_v42  ;;  %3246 = vmatprep.subr.bf16.mxu0 %v5091_v31  ;;  %3197 = vmatprep.subr.bf16.mxu1 %v5081_v46  ;;  %v2388_v42 = vld [vmem:[%s6467_s4 + $0x48] sm:$0xff] }
 0x886   : > { %3247 = vmatpush1.bf16.msra.mxu0 %v5090_v37  ;;  %v2392_v10 = vld [vmem:[%s6467_s4 + $0x68] sm:$0xff] }
 0x887   : > { %2298 = vadd.xlane.f32.xlu0 %v2297_v56  ;;  %3248 = vmatprep.subr.bf16.mxu0 %v5083_v48  ;;  %v5072_v56 = vcombine.low %v2395_v49, %v2399_v50  ;;  %v5067_v25 = vcombine.high %v2388_v42, %v2392_v10  ;;  %v5066_v55 = vcombine.low %v2388_v42, %v2392_v10  ;;  %v2496_v42 = vld [vmem:[%s6467_s4 + $0x3a8] sm:$0xff] }
 0x888   : > { %3198 = vmatpush1.bf16.msra.mxu1 %v5080_v3 }
 0x889   : > { %3199 = vmatprep.subr.bf16.mxu1 %v5073_v41  ;;  %v2491_v41 = vld [vmem:[%s6467_s4 + $0x380] sm:$0xff] }
 0x88a   : > { %3249 = vmatpush1.bf16.msra.mxu0 %v5082_v40 }
 0x88b   : > { %3250 = vmatprep.subr.bf16.mxu0 %v5075_v6  ;;  %v2495_v6 = vld [vmem:[%s6467_s4 + $0x3a0] sm:$0xff] }
 0x88c   : > { %3200 = vmatpush1.bf16.msra.mxu1 %v5072_v56  ;;  %v5169_v8 = vcombine.high %v2491_v41, %v2495_v6  ;;  %v5168_v10 = vcombine.low %v2491_v41, %v2495_v6  ;;  %v5170_v56 = vcombine.low %v2492_v7, %v2496_v42 }
 0x88d   : > { %3201 = vmatprep.subr.bf16.mxu1 %v5065_v21  ;;  %v2483_v21 = vld [vmem:[%s6467_s4 + $0x340] sm:$0xff] }
 0x88e   : > { %3251 = vmatpush1.bf16.msra.mxu0 %v5074_v20  ;;  %v5171_v20 = vcombine.high %v2492_v7, %v2496_v42  ;;  %v2447_v42 = vld [vmem:[%s6467_s4 + $0x220] sm:$0xff] }
 0x88f   : > { %3252 = vmatprep.subr.bf16.mxu0 %v5067_v25  ;;  %v2487_v25 = vld [vmem:[%s6467_s4 + $0x360] sm:$0xff] }
 0x890   : > { %3202 = vmatpush1.bf16.msra.mxu1 %v5064_v13  ;;  %v5161_v4 = vcombine.high %v2483_v21, %v2487_v25  ;;  %v5160_v23 = vcombine.low %v2483_v21, %v2487_v25  ;;  %v5162_v13 = vcombine.low %v2484_v12, %v2488_v60  ;;  %v2448_v21 = vld [vmem:[%s6467_s4 + $0x228] sm:$0xff] }
 0x891   : > { %3203 = vmatprep.subr.bf16.mxu1 %v5057_v11  ;;  %v2475_v11 = vld [vmem:[%s6467_s4 + $0x300] sm:$0xff] }
 0x892   : > { %3253 = vmatpush1.bf16.msra.mxu0 %v5066_v55  ;;  %v5163_v55 = vcombine.high %v2484_v12, %v2488_v60  ;;  %v6976_v60 = vld [vmem:[%s6467_s4 + $0x1f0] sm:$0xff] }
 0x893   : > { %3254 = vmatprep.subr.bf16.mxu0 %v5059_v14  ;;  %v2479_v14 = vld [vmem:[%s6467_s4 + $0x320] sm:$0xff] }
 0x894   : > { %3204 = vmatpush1.bf16.msra.mxu1 %v5056_v17  ;;  %v5153_v63 = vcombine.high %v2475_v11, %v2479_v14  ;;  %v5152_v16 = vcombine.low %v2475_v11, %v2479_v14  ;;  %v5154_v17 = vcombine.low %v2476_v47, %v2480_v15 }
 0x895   : > { %3205 = vmatprep.subr.bf16.mxu1 %v5177_v1  ;;  %v2467_v1 = vld [vmem:[%s6467_s4 + $0x2c0] sm:$0xff] }
 0x896   : > { %3255 = vmatpush1.bf16.msra.mxu0 %v5058_v18  ;;  %v5155_v18 = vcombine.high %v2476_v47, %v2480_v15 }
 0x897   : > { %3256 = vmatprep.subr.bf16.mxu0 %v5179_v19  ;;  %v2471_v19 = vld [vmem:[%s6467_s4 + $0x2e0] sm:$0xff] }
 0x898   : > { %3206 = vmatpush2.bf16.msra.mxu1 %v5176_v0  ;;  %v2468_v0 = vld [vmem:[%s6467_s4 + $0x2c8] sm:$0xff] }
 0x899   : > { %3207 = vmatprep.subr.bf16.mxu1 %v5169_v8  ;;  %v2443_v8 = vld [vmem:[%s6467_s4 + $0x200] sm:$0xff] }
 0x89a   : > { %3257 = vmatpush2.bf16.msra.mxu0 %v5178_v59  ;;  %v5145_v59 = vcombine.high %v2467_v1, %v2471_v19 }
 0x89b   : > { %3258 = vmatprep.subr.bf16.mxu0 %v5171_v20  ;;  %v5121_v20 = vcombine.high %v2443_v8, %v2447_v42 }
 0x89c   : > { %3208 = vmatpush2.bf16.msra.mxu1 %v5168_v10  ;;  %v2444_v10 = vld [vmem:[%s6467_s4 + $0x208] sm:$0xff] }
 0x89d   : > { %3209 = vmatprep.subr.bf16.mxu1 %v5161_v4  ;;  %v5122_v25 = vcombine.low %v2444_v10, %v2448_v21  ;;  %v5123_v12 = vcombine.high %v2444_v10, %v2448_v21  ;;  %v6973_v4 = vld [vmem:[%s6467_s4 + $0x1d0] sm:$0xff] }
 0x89e   : > { %3259 = vmatpush2.bf16.msra.mxu0 %v5170_v56  ;;  %v5120_v56 = vcombine.low %v2443_v8, %v2447_v42  ;;  %v5116_v11 = vcombine.low %v6973_v4, %v6976_v60  ;;  %v2430_v8 = vld [vmem:[%s6467_s4 + $0x198] sm:$0xff] }
 0x89f   : > { %3260 = vmatprep.subr.bf16.mxu0 %v5163_v55  ;;  %v2442_v55 = vld [vmem:[%s6467_s4 + $0x1f8] sm:$0xff] }
 0x8a0   : > { %3210 = vmatpush2.bf16.msra.mxu1 %v5160_v23  ;;  %v6979_v23 = vld [vmem:[%s6467_s4 + $0x1d8] sm:$0xff] }
 0x8a1   : > { %3211 = vmatprep.subr.bf16.mxu1 %v5153_v63  ;;  %v5118_v14 = vcombine.low %v6979_v23, %v2442_v55  ;;  %v5119_v47 = vcombine.high %v6979_v23, %v2442_v55  ;;  %v2434_v42 = vld [vmem:[%s6467_s4 + $0x1b8] sm:$0xff]  ;;  %v2425_v23 = vld [vmem:[%s6467_s4 + $0x170] sm:$0xff] }
 0x8a2   : > { %3261 = vmatpush2.bf16.msra.mxu0 %v5162_v13  ;;  %v5117_v13 = vcombine.high %v6973_v4, %v6976_v60  ;;  %v2421_v4 = vld [vmem:[%s6467_s4 + $0x150] sm:$0xff]  ;;  %v5110_v55 = vcombine.low %v2430_v8, %v2434_v42 }
 0x8a3   : > { %3262 = vmatprep.subr.bf16.mxu0 %v5155_v18 }
 0x8a4   : > { %3212 = vmatpush2.bf16.msra.mxu1 %v5152_v16 }
 0x8a5   : > { %3213 = vmatprep.subr.bf16.mxu1 %v5145_v59 }
 0x8a6   : > { %3263 = vmatpush2.bf16.msra.mxu0 %v5154_v17 }
 0x907   : > { %v2291_v22 = vpop.xlane.xlu0 %2290 }
 0x908   : > { %v2300_v24 = vmul.f32 0.00390625, %v2291_v22  ;;  %v2472_v22 = vld [vmem:[%s6467_s4 + $0x2e8] sm:$0xff] }
 0x90a   : > { %v6913_v26 = vsub.f32 %v6849_v33, %v2300_v24  ;;  %v6916_v27 = vsub.f32 %v6851_v34, %v2300_v24  ;;  %v5144_v24 = vcombine.low %v2467_v1, %v2471_v19 }
 0x90b   : > { %v2294_v57 = vpop.xlane.xlu1 %2293 }
 0x90c   : > { %v2301_v28 = vmul.f32 0.00390625, %v2294_v57  ;;  %v2309_v29 = vmul.f32 %v6913_v26, %v6913_v26  ;;  %v2310_v30 = vmul.f32 %v6916_v27, %v6916_v27  ;;  %v5146_v57 = vcombine.low %v2468_v0, %v2472_v22  ;;  %3214 = vmatpush2.bf16.msra.mxu1 %v5144_v24 }
 0x90e   : > { %v6923_v31 = vsub.f32 %v6859_v38, %v2301_v28  ;;  %v6926_v32 = vsub.f32 %v6861_v54, %v2301_v28  ;;  %v2315_v35 = vadd.f32 %v2310_v30, %v2309_v29  ;;  %v5147_v28 = vcombine.high %v2468_v0, %v2472_v22  ;;  %v2459_v29 = vld [vmem:[%s6467_s4 + $0x280] sm:$0xff]  ;;  %v2287_v22 = vld [vmem:[%s771_s10] sm:$0x3]  ;;  %s7561_s10 = sld [smem:[#allocation25_spill]] }
 0x90f   : > { %v2463_v30 = vld [vmem:[%s6467_s4 + $0x2a0] sm:$0xff] }
 0x910   : > { %2316 = vadd.xlane.f32.xlu1 %v2315_v35  ;;  %v2299_v43 = vpop.xlane.xlu0 %2298  ;;  %v2311_v44 = vmul.f32 %v6923_v31, %v6923_v31  ;;  %v2312_v45 = vmul.f32 %v6926_v32, %v6926_v32  ;;  %3264 = vmatprep.subr.bf16.mxu0 %v5147_v28  ;;  %v2460_v35 = vld [vmem:[%s6467_s4 + $0x288] sm:$0xff]  ;;  %v2288_v28 = vld [vmem:[%s775_s22] sm:$0x3] }
 0x911   : > { %v2302_v37 = vmul.f32 0.00390625, %v2299_v43  ;;  %3265 = vmatpush2.bf16.msra.mxu0 %v5146_v57  ;;  %v5137_v43 = vcombine.high %v2459_v29, %v2463_v30 }
 0x912   : > { %v2318_v46 = vadd.f32 %v2312_v45, %v2311_v44  ;;  %v2464_v44 = vld [vmem:[%s6467_s4 + $0x2a8] sm:$0xff]  ;;  %v5136_v45 = vcombine.low %v2459_v29, %v2463_v30  ;;  %v2345_v30 = vrot.slane %v2287_v22, %v6655_v53 }
 0x913   : > { %v6933_v48 = vsub.f32 %v6865_v5, %v2302_v37  ;;  %v6936_v49 = vsub.f32 %v6870_v61, %v2302_v37  ;;  %v5138_v37 = vcombine.low %v2460_v35, %v2464_v44  ;;  %3215 = vmatprep.subr.bf16.mxu1 %v5137_v43 }
 0x914   : > { %2319 = vadd.xlane.f32.xlu0 %v2318_v46  ;;  %v5139_v46 = vcombine.high %v2460_v35, %v2464_v44  ;;  %3216 = vmatpush2.bf16.msra.mxu1 %v5136_v45  ;;  %v2349_v35 = vrot.slane %v2287_v22, %v6652_v52  ;;  %v2362_v44 = vrot.slane %v2288_v28, %v6655_v53  ;;  %v2405_v22 = vld [vmem:[%s6467_s4 + $0xd0] sm:$0xff] }
 0x915   : > { %v2313_v50 = vmul.f32 %v6933_v48, %v6933_v48  ;;  %v2314_v62 = vmul.f32 %v6936_v49, %v6936_v49  ;;  %v2366_v45 = vrot.slane %v2288_v28, %v6652_v52  ;;  %v2409_v28 = vld [vmem:[%s6467_s4 + $0xf0] sm:$0xff] }
 0x916   : > { %3266 = vmatprep.subr.bf16.mxu0 %v5139_v46 }
 0x917   : > { %v2321_v2 = vsel %vm816_vm0, %v2313_v50, 0.0  ;;  %v2322_v3 = vsel %vm816_vm0, %v2314_v62, 0.0  ;;  %v2451_v50 = vld [vmem:[%s6467_s4 + $0x240] sm:$0xff]  ;;  %3267 = vmatpush2.bf16.msra.mxu0 %v5138_v37 }
 0x918   : > { %v2323_v40 = vadd.f32 %v2322_v3, %v2321_v2  ;;  %v2455_v62 = vld [vmem:[%s6467_s4 + $0x260] sm:$0xff]  ;;  %v2452_v2 = vld [vmem:[%s6467_s4 + $0x248] sm:$0xff] }
 0x919   : > { %v5129_v3 = vcombine.high %v2451_v50, %v2455_v62  ;;  %v5128_v41 = vcombine.low %v2451_v50, %v2455_v62 }
 0x91a   : > { %2324 = vadd.xlane.f32.xlu1 %v2323_v40  ;;  %v2456_v40 = vld [vmem:[%s6467_s4 + $0x268] sm:$0xff] }
 0x91b   : > { %v5130_v6 = vcombine.low %v2452_v2, %v2456_v40  ;;  %v5131_v7 = vcombine.high %v2452_v2, %v2456_v40  ;;  %3217 = vmatprep.subr.bf16.mxu1 %v5129_v3  ;;  %v2429_v2 = vld [vmem:[%s6467_s4 + $0x190] sm:$0xff] }
 0x91c   : > { %3218 = vmatpush2.bf16.msra.mxu1 %v5128_v41 }
 0x91d   : > { %3268 = vmatprep.subr.bf16.mxu0 %v5131_v7  ;;  %3219 = vmatprep.subr.bf16.mxu1 %v5121_v20  ;;  %v2433_v7 = vld [vmem:[%s6467_s4 + $0x1b0] sm:$0xff] }
 0x91e   : > { %3269 = vmatpush2.bf16.msra.mxu0 %v5130_v6  ;;  %v5109_v21 = vcombine.high %v2429_v2, %v2433_v7 }
 0x91f   : > { %3270 = vmatprep.subr.bf16.mxu0 %v5123_v12 }
 0x920   : > { %3220 = vmatpush2.bf16.msra.mxu1 %v5120_v56 }
 0x921   : > { %3291 = vmatprep.subr.bf16.mxu1 %v5117_v13  ;;  %v2422_v13 = vld [vmem:[%s6467_s4 + $0x158] sm:$0xff] }
 0x922   : > { %3271 = vmatpush2.bf16.msra.mxu0 %v5122_v25  ;;  %v5111_v25 = vcombine.high %v2430_v8, %v2434_v42 }
 0x923   : > { %3342 = vmatprep.subr.bf16.mxu0 %v5119_v47 }
 0x999   : > { %v2317_v63 = vpop.xlane.xlu1 %2316 }
 0x99a   : > { %v2326_v15 = vmul.f32 0.00390625, %v2317_v63 }
 0x99c   : > { %v2329_v16 = vadd.f32 1e-06, %v2326_v15 }
 0x99d   : > { %v2320_v17 = vpop.xlane.xlu0 %2319 }
 0x99e   : > { %5890 = vrsqrt.f32 %v2329_v16  ;;  %v2327_v18 = vmul.f32 0.00390625, %v2320_v17  ;;  %v5101_v16 = vcombine.high %v2421_v4, %v2425_v23 }
 0x9a0   : > { %v2330_v1 = vadd.f32 1e-06, %v2327_v18  ;;  %v2413_v18 = vld [vmem:[%s6467_s4 + $0x110] sm:$0xff] }
 0x9a2   : > { %5892 = vrsqrt.f32 %v2330_v1  ;;  %v2417_v1 = vld [vmem:[%s6467_s4 + $0x130] sm:$0xff] }
 0x9a3   : > { %v2325_v19 = vpop.xlane.xlu1 %2324 }
 0x9a4   : > { %v2328_v0 = vmul.f32 0.00390625, %v2325_v19  ;;  %v2414_v19 = vld [vmem:[%s6467_s4 + $0x118] sm:$0xff] }
 0x9a6   : > { %v2331_v59 = vadd.f32 1e-06, %v2328_v0  ;;  %v2418_v0 = vld [vmem:[%s6467_s4 + $0x138] sm:$0xff] }
 0x9a8   : > { %5894 = vrsqrt.f32 %v2331_v59 }
 0x9ab   : > { %v5891_v24 = vpop.eup %5890 }
 0x9ac   : > { %v2335_v57 = vmul.f32 %v5891_v24, %v6913_v26  ;;  %v2336_v29 = vmul.f32 %v5891_v24, %v6916_v27  ;;  %v5093_v24 = vcombine.high %v2413_v18, %v2417_v1 }
 0x9ae   : > { %v2353_v46 = vmul.f32 %v2349_v35, %v2336_v29  ;;  %v2352_v50 = vmul.f32 %v2345_v30, %v2335_v57  ;;  %v5095_v57 = vcombine.high %v2414_v19, %v2418_v0  ;;  %v2406_v29 = vld [vmem:[%s6467_s4 + $0xd8] sm:$0xff] }
 0x9af   : > { %v5893_v43 = vpop.eup %5892 }
 0x9b0   : > { %v2337_v26 = vmul.f32 %v5893_v43, %v6923_v31  ;;  %v2338_v37 = vmul.f32 %v5893_v43, %v6926_v32  ;;  %v2370_v3 = vadd.f32 %v2366_v45, %v2353_v46  ;;  %v2369_v41 = vadd.f32 %v2362_v44, %v2352_v50  ;;  %v2398_v46 = vld [vmem:[%s6467_s4 + $0x98] sm:$0xff] }
 0x9b1   : > { %v5094_v43 = vcombine.low %v2414_v19, %v2418_v0  ;;  %v2402_v50 = vld [vmem:[%s6467_s4 + $0xb8] sm:$0xff] }
 0x9b2   : > { %v2355_v62 = vmul.f32 %v2349_v35, %v2338_v37  ;;  %v2354_v27 = vmul.f32 %v2345_v30, %v2337_v26  ;;  %v2397_v26 = vld [vmem:[%s6467_s4 + $0x90] sm:$0xff]  ;;  %v5078_v42 = vcombine.low %v2398_v46, %v2402_v50  ;;  %v2494_v19 = vld [vmem:[%s6467_s4 + $0x398] sm:$0xff] }
 0x9b3   : > { %v2401_v37 = vld [vmem:[%s6467_s4 + $0xb0] sm:$0xff]  ;;  %v2498_v0 = vld [vmem:[%s6467_s4 + $0x3b8] sm:$0xff] }
 0x9b4   : > { %v2372_v40 = vadd.f32 %v2366_v45, %v2355_v62  ;;  %v2371_v6 = vadd.f32 %v2362_v44, %v2354_v27  ;;  %v5084_v62 = vcombine.low %v2405_v22, %v2409_v28  ;;  %v5076_v8 = vcombine.low %v2397_v26, %v2401_v37 }
 0x9b5   : > { %v5895_v10 = vpop.eup %5894 }
 0x9b6   : > { %v2376_v31 = vpack.c.bf16 %v2372_v40, %v2370_v3  ;;  %v7010_v56 = vpack.c.bf16 %v2371_v6, %v2369_v41  ;;  %v2340_v32 = vmul.f32 %v5895_v10, %v6936_v49  ;;  %v2339_v20 = vmul.f32 %v5895_v10, %v6933_v48  ;;  %v2426_v49 = vld [vmem:[%s6467_s4 + $0x178] sm:$0xff]  ;;  %v2389_v40 = vld [vmem:[%s6467_s4 + $0x50] sm:$0xff] }
 0x9b7   : > { %v5108_v48 = vcombine.low %v2429_v2, %v2433_v7  ;;  %v5103_v17 = vcombine.high %v2422_v13, %v2426_v49  ;;  %v5077_v2 = vcombine.high %v2397_v26, %v2401_v37  ;;  %v5079_v3 = vcombine.high %v2398_v46, %v2402_v50  ;;  %v2393_v41 = vld [vmem:[%s6467_s4 + $0x70] sm:$0xff]  ;;  %v2390_v6 = vld [vmem:[%s6467_s4 + $0x58] sm:$0xff] }
 0x9b8   : > { %3221 = vmatprep.mubr.bf16.mxu1 %v2376_v31  ;;  %3272 = vmatprep.mubr.bf16.mxu0 %v2376_v31  ;;  %v2357_v12 = vmul.f32 %v2349_v35, %v2340_v32  ;;  %v2356_v60 = vmul.f32 %v2345_v30, %v2339_v20  ;;  %v2410_v30 = vld [vmem:[%s6467_s4 + $0xf8] sm:$0xff]  ;;  %v5092_v35 = vcombine.low %v2413_v18, %v2417_v1  ;;  %v2381_v32 = vld [vmem:[%s6467_s4 + $0x10] sm:$0xff] }
 0x9b9   : > { %3222 = vmatmul.mubr.bf16.vlgmr.msra.gmra.mxu1 %v7010_v56  ;;  %3273 = vmatmul.mubr.bf16.vlgmr.msra.gmra.mxu0 %v7010_v56  ;;  %v5086_v27 = vcombine.low %v2406_v29, %v2410_v30  ;;  %v2394_v7 = vld [vmem:[%s6467_s4 + $0x78] sm:$0xff]  ;;  %v5069_v10 = vcombine.high %v2389_v40, %v2393_v41  ;;  %v2385_v20 = vld [vmem:[%s6467_s4 + $0x30] sm:$0xff] }
 0x9ba   : > { %3292 = vmatpush1.bf16.msra.mxu1 %v5116_v11  ;;  %3343 = vmatpush1.bf16.msra.mxu0 %v5118_v14  ;;  %v2374_v47 = vadd.f32 %v2366_v45, %v2357_v12  ;;  %v2373_v63 = vadd.f32 %v2362_v44, %v2356_v60  ;;  %v5100_v11 = vcombine.low %v2421_v4, %v2425_v23  ;;  %v2493_v18 = vld [vmem:[%s6467_s4 + $0x390] sm:$0xff]  ;;  %v2478_v46 = vld [vmem:[%s6467_s4 + $0x318] sm:$0xff] }
 0x9bb   : > { %3293 = vmatprep.subr.bf16.mxu1 %v5109_v21  ;;  %3344 = vmatprep.subr.bf16.mxu0 %v5111_v25  ;;  %v5102_v14 = vcombine.low %v2422_v13, %v2426_v49  ;;  %v5085_v44 = vcombine.high %v2405_v22, %v2409_v28  ;;  %v5087_v45 = vcombine.high %v2406_v29, %v2410_v30  ;;  %v2382_v21 = vld [vmem:[%s6467_s4 + $0x18] sm:$0xff]  ;;  %v2501_v13 = vld [vmem:[%s6467_s4 + $0x3d0] sm:$0xff] }
 0x9bc   : > { %v7020_v15 = vpack.c.bf16 %v2374_v47, %v2374_v47  ;;  %v7028_v59 = vpack.c.bf16 %v2373_v63, %v2373_v63  ;;  %v2386_v25 = vld [vmem:[%s6467_s4 + $0x38] sm:$0xff]  ;;  %v5068_v12 = vcombine.low %v2389_v40, %v2393_v41  ;;  %v5070_v4 = vcombine.low %v2390_v6, %v2394_v7  ;;  %v2505_v49 = vld [vmem:[%s6467_s4 + $0x3f0] sm:$0xff] }
 0x9bd   : > { %v5061_v60 = vcombine.high %v2381_v32, %v2385_v20  ;;  %v5063_v23 = vcombine.high %v2382_v21, %v2386_v25  ;;  %v5060_v47 = vcombine.low %v2381_v32, %v2385_v20  ;;  %v5062_v63 = vcombine.low %v2382_v21, %v2386_v25  ;;  %v2497_v1 = vld [vmem:[%s6467_s4 + $0x3b0] sm:$0xff]  ;;  %v2486_v29 = vld [vmem:[%s6467_s4 + $0x358] sm:$0xff] }
 0x9be   : > { %3294 = vmatpush1.bf16.msra.mxu1 %v5108_v48  ;;  %3345 = vmatpush1.bf16.msra.mxu0 %v5110_v55  ;;  %v2502_v48 = vld [vmem:[%s6467_s4 + $0x3d8] sm:$0xff]  ;;  %v5173_v22 = vcombine.high %v2493_v18, %v2497_v1  ;;  %v2489_v28 = vld [vmem:[%s6467_s4 + $0x370] sm:$0xff] }
 0x9bf   : > { %3231 = vmatprep.mubr.bf16.mxu1 %v7020_v15  ;;  %3282 = vmatprep.mubr.bf16.mxu0 %v7020_v15  ;;  %v2506_v55 = vld [vmem:[%s6467_s4 + $0x3f8] sm:$0xff]  ;;  %v2477_v26 = vld [vmem:[%s6467_s4 + $0x310] sm:$0xff] }
 0x9c0   : > { %3295 = vmatprep.subr.bf16.mxu1 %v5101_v16  ;;  %3346 = vmatprep.subr.bf16.mxu0 %v5103_v17  ;;  %v5181_v16 = vcombine.high %v2501_v13, %v2505_v49  ;;  %v5183_v17 = vcombine.high %v2502_v48, %v2506_v55  ;;  %v2490_v30 = vld [vmem:[%s6467_s4 + $0x378] sm:$0xff]  ;;  %v2481_v37 = vld [vmem:[%s6467_s4 + $0x330] sm:$0xff] }
 0x9c1   : > { %3232 = vmatmul.mubr.bf16.gmra.mxu1 %v7028_v59  ;;  %3283 = vmatmul.mubr.bf16.gmra.mxu0 %v7028_v59  ;;  %v2482_v50 = vld [vmem:[%s6467_s4 + $0x338] sm:$0xff]  ;;  %v2469_v40 = vld [vmem:[%s6467_s4 + $0x2d0] sm:$0xff] }
 0x9c2   : > { %3296 = vmatpush1.bf16.msra.mxu1 %v5100_v11  ;;  %3347 = vmatpush1.bf16.msra.mxu0 %v5102_v14  ;;  %v5180_v11 = vcombine.low %v2501_v13, %v2505_v49  ;;  %v5182_v14 = vcombine.low %v2502_v48, %v2506_v55  ;;  %v2473_v41 = vld [vmem:[%s6467_s4 + $0x2f0] sm:$0xff]  ;;  %v2462_v21 = vld [vmem:[%s6467_s4 + $0x298] sm:$0xff] }
 0x9c3   : > { %3323 = vmatprep.mubr.bf16.mxu1 %v2376_v31  ;;  %3374 = vmatprep.mubr.bf16.mxu0 %v2376_v31  ;;  %v5071_v31 = vcombine.high %v2390_v6, %v2394_v7  ;;  %v2470_v6 = vld [vmem:[%s6467_s4 + $0x2d8] sm:$0xff]  ;;  %v2461_v32 = vld [vmem:[%s6467_s4 + $0x290] sm:$0xff] }
 0x9c4   : > { %3297 = vmatprep.subr.bf16.mxu1 %v5093_v24  ;;  %3348 = vmatprep.subr.bf16.mxu0 %v5095_v57  ;;  %v5175_v24 = vcombine.high %v2494_v19, %v2498_v0  ;;  %v2485_v57 = vld [vmem:[%s6467_s4 + $0x350] sm:$0xff]  ;;  %v2474_v7 = vld [vmem:[%s6467_s4 + $0x2f8] sm:$0xff] }
 0x9c5   : > { %v2465_v20 = vld [vmem:[%s6467_s4 + $0x2b0] sm:$0xff]  ;;  %v2466_v25 = vld [vmem:[%s6467_s4 + $0x2b8] sm:$0xff] }
 0x9c6   : > { %3298 = vmatpush1.bf16.msra.mxu1 %v5092_v35  ;;  %3349 = vmatpush1.bf16.msra.mxu0 %v5094_v43  ;;  %v5172_v35 = vcombine.low %v2493_v18, %v2497_v1  ;;  %v5174_v43 = vcombine.low %v2494_v19, %v2498_v0  ;;  %v2453_v13 = vld [vmem:[%s6467_s4 + $0x250] sm:$0xff]  ;;  %v2454_v48 = vld [vmem:[%s6467_s4 + $0x258] sm:$0xff] }
 0x9c7   : > { %3299 = vmatprep.subr.bf16.mxu1 %v5085_v44  ;;  %3350 = vmatprep.subr.bf16.mxu0 %v5087_v45  ;;  %v5165_v44 = vcombine.high %v2485_v57, %v2489_v28  ;;  %v5167_v45 = vcombine.high %v2486_v29, %v2490_v30  ;;  %v2457_v49 = vld [vmem:[%s6467_s4 + $0x270] sm:$0xff]  ;;  %v2458_v55 = vld [vmem:[%s6467_s4 + $0x278] sm:$0xff] }
 0x9c8   : > { %v2445_v18 = vld [vmem:[%s6467_s4 + $0x210] sm:$0xff]  ;;  %v2446_v19 = vld [vmem:[%s6467_s4 + $0x218] sm:$0xff] }
 0x9c9   : > { %v2449_v1 = vld [vmem:[%s6467_s4 + $0x230] sm:$0xff]  ;;  %v2450_v0 = vld [vmem:[%s6467_s4 + $0x238] sm:$0xff] }
 0x9ca   : > { %3300 = vmatpush1.bf16.msra.mxu1 %v5084_v62  ;;  %3351 = vmatpush1.bf16.msra.mxu0 %v5086_v27  ;;  %v5164_v62 = vcombine.low %v2485_v57, %v2489_v28  ;;  %v5166_v27 = vcombine.low %v2486_v29, %v2490_v30  ;;  %v5124_v57 = vcombine.low %v2445_v18, %v2449_v1  ;;  %v5670_v29 = vld [vmem:[%s6475_s14 + $0x74] ss:$8 sps:$4 sm:$0xff]  }
 0x9cb   : > { %3301 = vmatprep.subr.bf16.mxu1 %v5077_v2  ;;  %3352 = vmatprep.subr.bf16.mxu0 %v5079_v3  ;;  %v5157_v2 = vcombine.high %v2477_v26, %v2481_v37  ;;  %v5159_v3 = vcombine.high %v2478_v46, %v2482_v50  ;;  %v5126_v28 = vcombine.low %v2446_v19, %v2450_v0  ;;  %v5673_v30 = vld [vmem:[%s6475_s14 + $0x174] ss:$8 sps:$4 sm:$0xff]  }
 0x9ce   : > { %3302 = vmatpush1.bf16.msra.mxu1 %v5076_v8  ;;  %3353 = vmatpush1.bf16.msra.mxu0 %v5078_v42  ;;  %v5156_v8 = vcombine.low %v2477_v26, %v2481_v37  ;;  %v5158_v42 = vcombine.low %v2478_v46, %v2482_v50  ;;  %v5674_v26 = vld [vmem:[%s6475_s14 + $0x60] ss:$8 sps:$4 sm:$0xff]   ;;  %v5682_v46 = vld [vmem:[%s6475_s14 + $0x54] ss:$8 sps:$4 sm:$0xff]  }
 0x9cf   : > { %3303 = vmatprep.subr.bf16.mxu1 %v5069_v10  ;;  %3354 = vmatprep.subr.bf16.mxu0 %v5071_v31  ;;  %v5149_v10 = vcombine.high %v2469_v40, %v2473_v41  ;;  %v5151_v31 = vcombine.high %v2470_v6, %v2474_v7  ;;  %v5677_v37 = vld [vmem:[%s6475_s14 + $0x160] ss:$8 sps:$4 sm:$0xff]   ;;  %v5685_v50 = vld [vmem:[%s6475_s14 + $0x154] ss:$8 sps:$4 sm:$0xff]  }
 0x9d2   : > { %3304 = vmatpush1.bf16.msra.mxu1 %v5068_v12  ;;  %3355 = vmatpush1.bf16.msra.mxu0 %v5070_v4  ;;  %v5148_v12 = vcombine.low %v2469_v40, %v2473_v41  ;;  %v5150_v4 = vcombine.low %v2470_v6, %v2474_v7  ;;  %v5694_v40 = vld [vmem:[%s6475_s14 + $0x34] ss:$8 sps:$4 sm:$0xff]   ;;  %v5692_v6 = vld [vmem:[%s6475_s14 + $0x30] ss:$8 sps:$4 sm:$0xff]  }
 0x9d3   : > { %3305 = vmatprep.subr.bf16.mxu1 %v5061_v60  ;;  %3356 = vmatprep.subr.bf16.mxu0 %v5063_v23  ;;  %v5141_v60 = vcombine.high %v2461_v32, %v2465_v20  ;;  %v5143_v23 = vcombine.high %v2462_v21, %v2466_v25  ;;  %v5697_v41 = vld [vmem:[%s6475_s14 + $0x134] ss:$8 sps:$4 sm:$0xff]   ;;  %v5695_v7 = vld [vmem:[%s6475_s14 + $0x130] ss:$8 sps:$4 sm:$0xff]  }
 0x9d6   : > { %3306 = vmatpush1.bf16.msra.mxu1 %v5060_v47  ;;  %3357 = vmatpush1.bf16.msra.mxu0 %v5062_v63  ;;  %v5140_v47 = vcombine.low %v2461_v32, %v2465_v20  ;;  %v5142_v63 = vcombine.low %v2462_v21, %v2466_v25  ;;  %v5709_v32 = vld [vmem:[%s6475_s14 + $0x114] ss:$8 sps:$4 sm:$0xff]   ;;  %v5704_v20 = vld [vmem:[%s6475_s14 + $0x10] ss:$8 sps:$4 sm:$0xff]   ;;  %v5712_v25 = vld [vmem:[%s6475_s14 + $0x4] ss:$8 sps:$4 sm:$0xff]  }
 0x9d7   : > { %3307 = vmatprep.subr.bf16.mxu1 %v5181_v16  ;;  %3358 = vmatprep.subr.bf16.mxu0 %v5183_v17  ;;  %v5133_v16 = vcombine.high %v2453_v13, %v2457_v49  ;;  %v5135_v17 = vcombine.high %v2454_v48, %v2458_v55  ;;  %v5707_v21 = vld [vmem:[%s6475_s14 + $0x110] ss:$8 sps:$4 sm:$0xff]  }
 0x9da   : > { %3308 = vmatpush2.bf16.msra.mxu1 %v5180_v11  ;;  %3359 = vmatpush2.bf16.msra.mxu0 %v5182_v14  ;;  %v5132_v11 = vcombine.low %v2453_v13, %v2457_v49  ;;  %v5134_v14 = vcombine.low %v2454_v48, %v2458_v55  ;;  %v5721_v13 = vld [vmem:[%s6475_s14 + $0x1f4] ss:$8 sps:$4 sm:$0xff]   ;;  %v5716_v49 = vld [vmem:[%s6475_s14 + $0xf0] ss:$8 sps:$4 sm:$0xff]   ;;  %v5724_v55 = vld [vmem:[%s6475_s14 + $0xe4] ss:$8 sps:$4 sm:$0xff]  }
 0x9db   : > { %3309 = vmatprep.subr.bf16.mxu1 %v5173_v22  ;;  %3360 = vmatprep.subr.bf16.mxu0 %v5175_v24  ;;  %v5125_v22 = vcombine.high %v2445_v18, %v2449_v1  ;;  %v5127_v24 = vcombine.high %v2446_v19, %v2450_v0  ;;  %v5719_v48 = vld [vmem:[%s6475_s14 + $0x1f0] ss:$8 sps:$4 sm:$0xff]   ;;  %v5733_v18 = vld [vmem:[%s6475_s14 + $0x1d4] ss:$8 sps:$4 sm:$0xff]   ;;  %v5736_v0 = vld [vmem:[%s6475_s14 + $0xc4] ss:$8 sps:$4 sm:$0xff]  }
 0x9dc   : > { %v5728_v1 = vld [vmem:[%s6475_s14 + $0xd0] ss:$8 sps:$4 sm:$0xff]  }
 0x9dd   : > { %v5731_v19 = vld [vmem:[%s6475_s14 + $0x1d0] ss:$8 sps:$4 sm:$0xff]  }
 0x9de   : > { %3310 = vmatpush2.bf16.msra.mxu1 %v5172_v35  ;;  %3361 = vmatpush2.bf16.msra.mxu0 %v5174_v43  ;;  %v5668_v35 = vld [vmem:[%s6475_s14 + $0x70] ss:$8 sps:$4 sm:$0xff]  }
 0x9df   : > { %3311 = vmatprep.subr.bf16.mxu1 %v5165_v44  ;;  %3362 = vmatprep.subr.bf16.mxu0 %v5167_v45  ;;  %v5671_v43 = vld [vmem:[%s6475_s14 + $0x170] ss:$8 sps:$4 sm:$0xff]   ;;  %v5676_v44 = vld [vmem:[%s6475_s14 + $0x64] ss:$8 sps:$4 sm:$0xff]  }
 0x9e0   : > { %v5679_v45 = vld [vmem:[%s6475_s14 + $0x164] ss:$8 sps:$4 sm:$0xff]  }
 0x9e2   : > { %3312 = vmatpush2.bf16.msra.mxu1 %v5164_v62  ;;  %3363 = vmatpush2.bf16.msra.mxu0 %v5166_v27  ;;  %v5683_v62 = vld [vmem:[%s6475_s14 + $0x150] ss:$8 sps:$4 sm:$0xff]   ;;  %v5691_v27 = vld [vmem:[%s6475_s14 + $0x144] ss:$8 sps:$4 sm:$0xff]  }
 0x9e3   : > { %3313 = vmatprep.subr.bf16.mxu1 %v5157_v2  ;;  %3364 = vmatprep.subr.bf16.mxu0 %v5159_v3  ;;  %v5686_v2 = vld [vmem:[%s6475_s14 + $0x40] ss:$8 sps:$4 sm:$0xff]  }
 0x9e4   : > { %v5689_v3 = vld [vmem:[%s6475_s14 + $0x140] ss:$8 sps:$4 sm:$0xff]  }
 0x9e6   : > { %3314 = vmatpush2.bf16.msra.mxu1 %v5156_v8  ;;  %3365 = vmatpush2.bf16.msra.mxu0 %v5158_v42  ;;  %v5703_v8 = vld [vmem:[%s6475_s14 + $0x124] ss:$8 sps:$4 sm:$0xff]   ;;  %v5698_v42 = vld [vmem:[%s6475_s14 + $0x20] ss:$8 sps:$4 sm:$0xff]  }
 0x9e7   : > { %3315 = vmatprep.subr.bf16.mxu1 %v5149_v10  ;;  %3366 = vmatprep.subr.bf16.mxu0 %v5151_v31  ;;  %v5701_v10 = vld [vmem:[%s6475_s14 + $0x120] ss:$8 sps:$4 sm:$0xff]   ;;  %v5706_v31 = vld [vmem:[%s6475_s14 + $0x14] ss:$8 sps:$4 sm:$0xff]  }
 0x9ea   : > { %3316 = vmatpush2.bf16.msra.mxu1 %v5148_v12  ;;  %3367 = vmatpush2.bf16.msra.mxu0 %v5150_v4  ;;  %v5715_v12 = vld [vmem:[%s6475_s14 + $0x104] ss:$8 sps:$4 sm:$0xff]   ;;  %v5710_v4 = vld [vmem:[%s6475_s14] ss:$8 sps:$4 sm:$0xff]  }
 0x9eb   : > { %3317 = vmatprep.subr.bf16.mxu1 %v5141_v60  ;;  %3368 = vmatprep.subr.bf16.mxu0 %v5143_v23  ;;  %v5713_v60 = vld [vmem:[%s6475_s14 + $0x100] ss:$8 sps:$4 sm:$0xff]   ;;  %v5718_v23 = vld [vmem:[%s6475_s14 + $0xf4] ss:$8 sps:$4 sm:$0xff]  }
 0x9ee   : > { %3318 = vmatpush2.bf16.msra.mxu1 %v5140_v47  ;;  %3369 = vmatpush2.bf16.msra.mxu0 %v5142_v63  ;;  %v5727_v47 = vld [vmem:[%s6475_s14 + $0x1e4] ss:$8 sps:$4 sm:$0xff]   ;;  %v5722_v63 = vld [vmem:[%s6475_s14 + $0xe0] ss:$8 sps:$4 sm:$0xff]  }
 0x9ef   : > { %3319 = vmatprep.subr.bf16.mxu1 %v5133_v16  ;;  %3370 = vmatprep.subr.bf16.mxu0 %v5135_v17  ;;  %v5725_v16 = vld [vmem:[%s6475_s14 + $0x1e0] ss:$8 sps:$4 sm:$0xff]   ;;  %v5730_v17 = vld [vmem:[%s6475_s14 + $0xd4] ss:$8 sps:$4 sm:$0xff]  }
 0x9f2   : > { %3320 = vmatpush2.bf16.msra.mxu1 %v5132_v11  ;;  %3371 = vmatpush2.bf16.msra.mxu0 %v5134_v14  ;;  %v5739_v11 = vld [vmem:[%s6475_s14 + $0x1c4] ss:$8 sps:$4 sm:$0xff]   ;;  %v5734_v14 = vld [vmem:[%s6475_s14 + $0xc0] ss:$8 sps:$4 sm:$0xff]  }
 0x9f3   : > { %3321 = vmatprep.subr.bf16.mxu1 %v5125_v22  ;;  %3372 = vmatprep.subr.bf16.mxu0 %v5127_v24  ;;  %v5737_v22 = vld [vmem:[%s6475_s14 + $0x1c0] ss:$8 sps:$4 sm:$0xff]   ;;  %v5742_v24 = vld [vmem:[%s6475_s14 + $0xb4] ss:$8 sps:$4 sm:$0xff]  }
 0x9f6   : > { %3322 = vmatpush2.bf16.msra.mxu1 %v5124_v57  ;;  %3373 = vmatpush2.bf16.msra.mxu0 %v5126_v28  ;;  %v5745_v57 = vld [vmem:[%s6475_s14 + $0x1b4] ss:$8 sps:$4 sm:$0xff]   ;;  %v5740_v28 = vld [vmem:[%s6475_s14 + $0xb0] ss:$8 sps:$4 sm:$0xff]  }
 0x9f7   : > { %4405 = vmatprep.subr.bf16.mxu1 %v5670_v29  ;;  %4456 = vmatprep.subr.bf16.mxu0 %v5673_v30  ;;  %v5743_v29 = vld [vmem:[%s6475_s14 + $0x1b0] ss:$8 sps:$4 sm:$0xff]   ;;  %v5748_v30 = vld [vmem:[%s6475_s14 + $0xa4] ss:$8 sps:$4 sm:$0xff]  }
 0x9f9   : > { %3324 = vmatmul.mubr.bf16.vlgmr.msra.gmra.mxu1 %v7010_v56  ;;  %3375 = vmatmul.mubr.bf16.vlgmr.msra.gmra.mxu0 %v7010_v56  ;;  %v5680_v56 = vld [vmem:[%s6475_s14 + $0x50] ss:$8 sps:$4 sm:$0xff]  }
 0x9fa   : > { %3333 = vmatprep.mubr.bf16.mxu1 %v7020_v15  ;;  %3384 = vmatprep.mubr.bf16.mxu0 %v7020_v15  ;;  %v5688_v15 = vld [vmem:[%s6475_s14 + $0x44] ss:$8 sps:$4 sm:$0xff]  }
 0x9fb   : > { %4406 = vmatpush1.bf16.msra.mxu1 %v5668_v35  ;;  %4457 = vmatpush1.bf16.msra.mxu0 %v5671_v43  ;;  %v5751_v35 = vld [vmem:[%s6475_s14 + $0x1a4] ss:$8 sps:$4 sm:$0xff]   ;;  %v5746_v43 = vld [vmem:[%s6475_s14 + $0xa0] ss:$8 sps:$4 sm:$0xff]  }
 0x9fc   : > { %4407 = vmatprep.subr.bf16.mxu1 %v5676_v44  ;;  %4458 = vmatprep.subr.bf16.mxu0 %v5679_v45  ;;  %v5749_v44 = vld [vmem:[%s6475_s14 + $0x1a0] ss:$8 sps:$4 sm:$0xff]   ;;  %v5754_v45 = vld [vmem:[%s6475_s14 + $0x94] ss:$8 sps:$4 sm:$0xff]  }
 0x9ff   : > { %4408 = vmatpush1.bf16.msra.mxu1 %v5674_v26  ;;  %4459 = vmatpush1.bf16.msra.mxu0 %v5677_v37  ;;  %v5757_v26 = vld [vmem:[%s6475_s14 + $0x194] ss:$8 sps:$4 sm:$0xff]   ;;  %v5752_v37 = vld [vmem:[%s6475_s14 + $0x90] ss:$8 sps:$4 sm:$0xff]  }
 0xa00   : > { %4409 = vmatprep.subr.bf16.mxu1 %v5682_v46  ;;  %4460 = vmatprep.subr.bf16.mxu0 %v5685_v50  ;;  %v5755_v46 = vld [vmem:[%s6475_s14 + $0x190] ss:$8 sps:$4 sm:$0xff]   ;;  %v5760_v50 = vld [vmem:[%s6475_s14 + $0x84] ss:$8 sps:$4 sm:$0xff]  }
 0xa01   : > { %3334 = vmatmul.mubr.bf16.gmra.mxu1 %v7028_v59  ;;  %3385 = vmatmul.mubr.bf16.gmra.mxu0 %v7028_v59  ;;  %v5700_v59 = vld [vmem:[%s6475_s14 + $0x24] ss:$8 sps:$4 sm:$0xff]  }
 0xa03   : > { %4410 = vmatpush1.bf16.msra.mxu1 %v5680_v56  ;;  %4461 = vmatpush1.bf16.msra.mxu0 %v5683_v62  ;;  %v5763_v56 = vld [vmem:[%s6475_s14 + $0x184] ss:$8 sps:$4 sm:$0xff]   ;;  %v5758_v62 = vld [vmem:[%s6475_s14 + $0x80] ss:$8 sps:$4 sm:$0xff]  }
 0xa04   : > { %4411 = vmatprep.subr.bf16.mxu1 %v5688_v15  ;;  %4462 = vmatprep.subr.bf16.mxu0 %v5691_v27  ;;  %v5761_v15 = vld [vmem:[%s6475_s14 + $0x180] ss:$8 sps:$4 sm:$0xff]   ;;  %v5766_v27 = vld [vmem:[%s6475_s14 + $0x274] ss:$8 sps:$4 sm:$0xff]  }
 0xa07   : > { %4412 = vmatpush1.bf16.msra.mxu1 %v5686_v2  ;;  %4463 = vmatpush1.bf16.msra.mxu0 %v5689_v3  ;;  %v5769_v2 = vld [vmem:[%s6475_s14 + $0x374] ss:$8 sps:$4 sm:$0xff]   ;;  %v7153_v3 = vld [vmem:[%s7561_s10] sm:$0xff] }
 0xa08   : > { %4413 = vmatprep.subr.bf16.mxu1 %v5694_v40  ;;  %4464 = vmatprep.subr.bf16.mxu0 %v5697_v41  ;;  %v2512_v40 = vrot.slane %v7153_v3, %v6655_v53  ;;  %v7160_v41 = vrot.slane %v7153_v3, %v1010_v9 }
 0xa0b   : > { %4414 = vmatpush1.bf16.msra.mxu1 %v5692_v6  ;;  %4465 = vmatpush1.bf16.msra.mxu0 %v5695_v7  ;;  %v7164_v6 = vrot.slane %v7153_v3, %v6652_v52  ;;  %v7169_v7 = vrot.slane %v7153_v3, %v1014_v58 }
 0xa0c   : > { %4415 = vmatprep.subr.bf16.mxu1 %v5700_v59  ;;  %4466 = vmatprep.subr.bf16.mxu0 %v5703_v8 }
 0xa0f   : > { %4416 = vmatpush1.bf16.msra.mxu1 %v5698_v42  ;;  %4467 = vmatpush1.bf16.msra.mxu0 %v5701_v10 }
 0xa10   : > { %4417 = vmatprep.subr.bf16.mxu1 %v5706_v31  ;;  %4468 = vmatprep.subr.bf16.mxu0 %v5709_v32 }
 0xa13   : > { %4418 = vmatpush1.bf16.msra.mxu1 %v5704_v20  ;;  %4469 = vmatpush1.bf16.msra.mxu0 %v5707_v21 }
 0xa14   : > { %4419 = vmatprep.subr.bf16.mxu1 %v5712_v25  ;;  %4470 = vmatprep.subr.bf16.mxu0 %v5715_v12 }
 0xa17   : > { %4420 = vmatpush1.bf16.msra.mxu1 %v5710_v4  ;;  %4471 = vmatpush1.bf16.msra.mxu0 %v5713_v60 }
 0xa18   : > { %4421 = vmatprep.subr.bf16.mxu1 %v5718_v23  ;;  %4472 = vmatprep.subr.bf16.mxu0 %v5721_v13 }
 0xa1b   : > { %4422 = vmatpush2.bf16.msra.mxu1 %v5716_v49  ;;  %4473 = vmatpush2.bf16.msra.mxu0 %v5719_v48 }
 0xa1c   : > { %4423 = vmatprep.subr.bf16.mxu1 %v5724_v55  ;;  %4474 = vmatprep.subr.bf16.mxu0 %v5727_v47 }
 0xa1f   : > { %4424 = vmatpush2.bf16.msra.mxu1 %v5722_v63  ;;  %4475 = vmatpush2.bf16.msra.mxu0 %v5725_v16 }
 0xa20   : > { %4425 = vmatprep.subr.bf16.mxu1 %v5730_v17  ;;  %4476 = vmatprep.subr.bf16.mxu0 %v5733_v18 }
 0xa23   : > { %4426 = vmatpush2.bf16.msra.mxu1 %v5728_v1  ;;  %4477 = vmatpush2.bf16.msra.mxu0 %v5731_v19 }
 0xa24   : > { %4427 = vmatprep.subr.bf16.mxu1 %v5736_v0  ;;  %4478 = vmatprep.subr.bf16.mxu0 %v5739_v11 }
 0xa27   : > { %4428 = vmatpush2.bf16.msra.mxu1 %v5734_v14  ;;  %4479 = vmatpush2.bf16.msra.mxu0 %v5737_v22 }
 0xa28   : > { %4429 = vmatprep.subr.bf16.mxu1 %v5742_v24  ;;  %4480 = vmatprep.subr.bf16.mxu0 %v5745_v57 }
 0xa2b   : > { %4430 = vmatpush2.bf16.msra.mxu1 %v5740_v28  ;;  %4481 = vmatpush2.bf16.msra.mxu0 %v5743_v29 }
 0xa2c   : > { %4431 = vmatprep.subr.bf16.mxu1 %v5748_v30  ;;  %4482 = vmatprep.subr.bf16.mxu0 %v5751_v35 }
 0xa2f   : > { %4432 = vmatpush2.bf16.msra.mxu1 %v5746_v43  ;;  %4483 = vmatpush2.bf16.msra.mxu0 %v5749_v44 }
 0xa30   : > { %4433 = vmatprep.subr.bf16.mxu1 %v5754_v45  ;;  %4484 = vmatprep.subr.bf16.mxu0 %v5757_v26 }
 0xa33   : > { %4434 = vmatpush2.bf16.msra.mxu1 %v5752_v37  ;;  %4485 = vmatpush2.bf16.msra.mxu0 %v5755_v46 }
 0xa34   : > { %4435 = vmatprep.subr.bf16.mxu1 %v5760_v50  ;;  %4486 = vmatprep.subr.bf16.mxu0 %v5763_v56 }
 0xa37   : > { %4436 = vmatpush2.bf16.msra.mxu1 %v5758_v62  ;;  %4487 = vmatpush2.bf16.msra.mxu0 %v5761_v15 }
 0xa38   : > { %4507 = vmatprep.subr.bf16.mxu1 %v5766_v27  ;;  %4558 = vmatprep.subr.bf16.mxu0 %v5769_v2 }
 0xa79   : > { %v3223_v59 = vpop.f32.mrf.mxu1  ;;  %v3274_v8 = vpop.f32.mrf.mxu0 }
 0xa7a   : > { %v7171_v42 = vadd.f32 %v3223_v59, %v2512_v40  ;;  %v7174_v10 = vadd.f32 %v3274_v8, %v7160_v41 }
 0xa7b   : > { %v3225_v31 = vpop.f32.mrf.mxu1  ;;  %v3276_v32 = vpop.f32.mrf.mxu0 }
 0xa7c   : > { %v3393_v9 = vmul.f32 %v7171_v42, %v7171_v42  ;;  %v3395_v20 = vmul.f32 %v7174_v10, %v7174_v10  ;;  %v7181_v21 = vadd.f32 %v3225_v31, %v7164_v6  ;;  %v7184_v58 = vadd.f32 %v3276_v32, %v7169_v7 }
 0xa7d   : > { %v3227_v25 = vpop.f32.mrf.mxu1  ;;  %v3278_v12 = vpop.f32.mrf.mxu0 }
 0xa7e   : > { %v3417_v4 = vmul.f32 %v3393_v9, %v7171_v42  ;;  %v3419_v60 = vmul.f32 %v3395_v20, %v7174_v10  ;;  %v3394_v23 = vmul.f32 %v7181_v21, %v7181_v21  ;;  %v3396_v13 = vmul.f32 %v7184_v58, %v7184_v58 }
 0xa7f   : > { %v7192_v49 = vadd.f32 %v3227_v25, %v2512_v40  ;;  %v7195_v48 = vadd.f32 %v3278_v12, %v7160_v41  ;;  %v3229_v55 = vpop.f32.mrf.mxu1  ;;  %v3280_v47 = vpop.f32.mrf.mxu0 }
 0xa80   : > { %v3441_v63 = vmul.f32 0.044715, %v3417_v4  ;;  %v3443_v16 = vmul.f32 0.044715, %v3419_v60  ;;  %v3418_v17 = vmul.f32 %v3394_v23, %v7181_v21  ;;  %v3420_v18 = vmul.f32 %v3396_v13, %v7184_v58 }
 0xa81   : > { %v3401_v1 = vmul.f32 %v7192_v49, %v7192_v49  ;;  %v3403_v19 = vmul.f32 %v7195_v48, %v7195_v48  ;;  %v7204_v0 = vadd.f32 %v3229_v55, %v7164_v6  ;;  %v7207_v11 = vadd.f32 %v3280_v47, %v7169_v7  ;;  %v3233_v14 = vpop.f32.mrf.mxu1  ;;  %v3284_v22 = vpop.f32.mrf.mxu0 }
 0xa82   : > { %v3465_v24 = vadd.f32 %v3441_v63, %v7171_v42  ;;  %v3467_v57 = vadd.f32 %v3443_v16, %v7174_v10  ;;  %v3442_v28 = vmul.f32 0.044715, %v3418_v17  ;;  %v3444_v29 = vmul.f32 0.044715, %v3420_v18 }
 0xa83   : > { %v3425_v30 = vmul.f32 %v3401_v1, %v7192_v49  ;;  %v3427_v35 = vmul.f32 %v3403_v19, %v7195_v48  ;;  %v3402_v43 = vmul.f32 %v7204_v0, %v7204_v0  ;;  %v3404_v44 = vmul.f32 %v7207_v11, %v7207_v11  ;;  %v3235_v45 = vpop.f32.mrf.mxu1  ;;  %v3286_v26 = vpop.f32.mrf.mxu0 }
 0xa84   : > { %v3489_v37 = vmul.f32 0.7978846, %v3465_v24  ;;  %v3491_v46 = vmul.f32 0.7978846, %v3467_v57  ;;  %v3466_v50 = vadd.f32 %v3442_v28, %v7181_v21  ;;  %v3468_v56 = vadd.f32 %v3444_v29, %v7184_v58 }
 0xa85   : > { %v3449_v62 = vmul.f32 0.044715, %v3425_v30  ;;  %v3451_v15 = vmul.f32 0.044715, %v3427_v35  ;;  %v3426_v27 = vmul.f32 %v3402_v43, %v7204_v0  ;;  %v3428_v2 = vmul.f32 %v3404_v44, %v7207_v11  ;;  %v3237_v59 = vpop.f32.mrf.mxu1  ;;  %v3288_v8 = vpop.f32.mrf.mxu0 }
 0xa86   : > { %5896 = vtanh.f32 %v3489_v37  ;;  %v3490_v31 = vmul.f32 0.7978846, %v3466_v50  ;;  %v3492_v32 = vmul.f32 0.7978846, %v3468_v56  ;;  %v7221_v9 = vadd.f32 %v3233_v14, %v2512_v40 }
 0xa87   : > { %5898 = vtanh.f32 %v3491_v46  ;;  %v3473_v20 = vadd.f32 %v3449_v62, %v7192_v49  ;;  %v3475_v25 = vadd.f32 %v3451_v15, %v7195_v48  ;;  %v3450_v12 = vmul.f32 0.044715, %v3426_v27  ;;  %v3238_v4 = vpop.f32.mrf.mxu1  ;;  %v3289_v60 = vpop.f32.mrf.mxu0 }
 0xa88   : > { %5900 = vtanh.f32 %v3490_v31  ;;  %v3452_v23 = vmul.f32 0.044715, %v3428_v2  ;;  %v3409_v13 = vmul.f32 %v7221_v9, %v7221_v9  ;;  %v7228_v55 = vadd.f32 %v3284_v22, %v7160_v41 }
 0xa89   : > { %5902 = vtanh.f32 %v3492_v32  ;;  %v3497_v47 = vmul.f32 0.7978846, %v3473_v20  ;;  %v3499_v40 = vmul.f32 0.7978846, %v3475_v25  ;;  %v3474_v63 = vadd.f32 %v3450_v12, %v7204_v0 }
 0xa8a   : > { %v3476_v16 = vadd.f32 %v3452_v23, %v7207_v11  ;;  %v3433_v17 = vmul.f32 %v3409_v13, %v7221_v9  ;;  %v3411_v18 = vmul.f32 %v7228_v55, %v7228_v55  ;;  %v7236_v1 = vadd.f32 %v3235_v45, %v7164_v6 }
 0xa8b   : > { %5904 = vtanh.f32 %v3497_v47  ;;  %v3498_v19 = vmul.f32 0.7978846, %v3474_v63  ;;  %v7239_v41 = vadd.f32 %v3286_v26, %v7169_v7 }
 0xa8c   : > { %5906 = vtanh.f32 %v3499_v40  ;;  %v3500_v14 = vmul.f32 0.7978846, %v3476_v16  ;;  %v3457_v22 = vmul.f32 0.044715, %v3433_v17  ;;  %v3435_v24 = vmul.f32 %v3411_v18, %v7228_v55 }
 0xa8d   : > { %5908 = vtanh.f32 %v3498_v19  ;;  %v3410_v57 = vmul.f32 %v7236_v1, %v7236_v1  ;;  %v3412_v28 = vmul.f32 %v7239_v41, %v7239_v41 }
 0xa8e   : > { %5910 = vtanh.f32 %v3500_v14  ;;  %v3481_v6 = vadd.f32 %v3457_v22, %v7221_v9  ;;  %v3459_v29 = vmul.f32 0.044715, %v3435_v24 }
 0xa8f   : > { %v3434_v30 = vmul.f32 %v3410_v57, %v7236_v1  ;;  %v3436_v7 = vmul.f32 %v3412_v28, %v7239_v41 }
 0xa90   : > { %v3505_v35 = vmul.f32 0.7978846, %v3481_v6  ;;  %v3483_v43 = vadd.f32 %v3459_v29, %v7228_v55 }
 0xa91   : > { %v3458_v44 = vmul.f32 0.044715, %v3434_v30  ;;  %v3460_v45 = vmul.f32 0.044715, %v3436_v7 }
 0xa92   : > { %5912 = vtanh.f32 %v3505_v35  ;;  %v3507_v26 = vmul.f32 0.7978846, %v3483_v43 }
 0xa93   : > { %v5897_v37 = vpop.eup %5896  ;;  %v3482_v46 = vadd.f32 %v3458_v44, %v7236_v1  ;;  %v3484_v50 = vadd.f32 %v3460_v45, %v7239_v41 }
 0xa94   : > { %v5899_v56 = vpop.eup %5898  ;;  %5914 = vtanh.f32 %v3507_v26  ;;  %v3537_v31 = vadd.f32 1.0, %v5897_v37  ;;  %v5764_v26 = vld [vmem:[%s6475_s14 + $0x270] ss:$8 sps:$4 sm:$0xff]  }
 0xa95   : > { %v5901_v62 = vpop.eup %5900  ;;  %v3506_v15 = vmul.f32 0.7978846, %v3482_v46  ;;  %v3508_v27 = vmul.f32 0.7978846, %v3484_v50  ;;  %v3539_v25 = vadd.f32 1.0, %v5899_v56 }
 0xa96   : > { %v5903_v2 = vpop.eup %5902  ;;  %v3538_v59 = vadd.f32 1.0, %v5901_v62  ;;  %v3561_v63 = vmul.f32 0.5, %v3537_v31  ;;  %v5767_v46 = vld [vmem:[%s6475_s14 + $0x370] ss:$8 sps:$4 sm:$0xff]   ;;  %v5770_v62 = vld [vmem:[%s6475_s14 + $0x260] ss:$8 sps:$4 sm:$0xff]  }
 0xa97   : > { %5916 = vtanh.f32 %v3506_v15  ;;  %v3540_v32 = vadd.f32 1.0, %v5903_v2  ;;  %v3563_v19 = vmul.f32 0.5, %v3539_v25  ;;  %v5773_v2 = vld [vmem:[%s6475_s14 + $0x360] ss:$8 sps:$4 sm:$0xff]   ;;  %v5781_v31 = vld [vmem:[%s6475_s14 + $0x354] ss:$8 sps:$4 sm:$0xff]  }
 0xa98   : > { %v5905_v8 = vpop.eup %5904  ;;  %5918 = vtanh.f32 %v3508_v27  ;;  %v3562_v40 = vmul.f32 0.5, %v3538_v59  ;;  %v3585_v30 = vmul.f32 %v3561_v63, %v7171_v42  ;;  %v5775_v42 = vld [vmem:[%s6475_s14 + $0x364] ss:$8 sps:$4 sm:$0xff]   ;;  %v5778_v59 = vld [vmem:[%s6475_s14 + $0x254] ss:$8 sps:$4 sm:$0xff]  }
 0xa99   : > { %v5907_v20 = vpop.eup %5906  ;;  %v3545_v12 = vadd.f32 1.0, %v5905_v8  ;;  %v3564_v18 = vmul.f32 0.5, %v3540_v32  ;;  %v5782_v63 = vld [vmem:[%s6475_s14 + $0x240] ss:$8 sps:$4 sm:$0xff]  }
 0xa9a   : > { %v5909_v4 = vpop.eup %5908  ;;  %v3547_v60 = vadd.f32 1.0, %v5907_v20  ;;  %v3586_v6 = vmul.f32 %v3562_v40, %v7181_v21  ;;  %v5772_v21 = vld [vmem:[%s6475_s14 + $0x264] ss:$8 sps:$4 sm:$0xff]   ;;  %v5779_v40 = vld [vmem:[%s6475_s14 + $0x350] ss:$8 sps:$4 sm:$0xff]  }
 0xa9b   : > { %v5911_v23 = vpop.eup %5910  ;;  %v3569_v13 = vmul.f32 0.5, %v3545_v12  ;;  %v3546_v47 = vadd.f32 1.0, %v5909_v4  ;;  %v3588_v7 = vmul.f32 %v3564_v18, %v7184_v58  ;;  %v5776_v12 = vld [vmem:[%s6475_s14 + $0x250] ss:$8 sps:$4 sm:$0xff]   ;;  %v5793_v18 = vld [vmem:[%s6475_s14 + $0x334] ss:$8 sps:$4 sm:$0xff]  }
 0xa9c   : > { %v3571_v16 = vmul.f32 0.5, %v3547_v60  ;;  %v3548_v17 = vadd.f32 1.0, %v5911_v23 }
 0xa9d   : > { %v3570_v14 = vmul.f32 0.5, %v3546_v47  ;;  %v3593_v22 = vmul.f32 %v3569_v13, %v7192_v49  ;;  %v3587_v49 = vmul.f32 %v3563_v19, %v7174_v10  ;;  %v5784_v13 = vld [vmem:[%s6475_s14 + $0x244] ss:$8 sps:$4 sm:$0xff]  }
 0xa9e   : > { %v3572_v24 = vmul.f32 0.5, %v3548_v17  ;;  %v3595_v28 = vmul.f32 %v3571_v16, %v7195_v48  ;;  %v5785_v16 = vld [vmem:[%s6475_s14 + $0x340] ss:$8 sps:$4 sm:$0xff]   ;;  %v5788_v17 = vld [vmem:[%s6475_s14 + $0x230] ss:$8 sps:$4 sm:$0xff]  }
 0xa9f   : > { %v5913_v57 = vpop.eup %5912  ;;  %v3594_v29 = vmul.f32 %v3570_v14, %v7204_v0  ;;  %v3609_v37 = vpack.c.bf16 %v3593_v22, %v3585_v30  ;;  %v5796_v19 = vld [vmem:[%s6475_s14 + $0x224] ss:$8 sps:$4 sm:$0xff]   ;;  %v2535_v14 = vsub.s32 6, %v6649_v51  ;;  %v5791_v22 = vld [vmem:[%s6475_s14 + $0x330] ss:$8 sps:$4 sm:$0xff]  }
 0xaa0   : > { %v3596_v35 = vmul.f32 %v3572_v24, %v7207_v11  ;;  %v3553_v43 = vadd.f32 1.0, %v5913_v57  ;;  %v3611_v0 = vpack.c.bf16 %v3595_v28, %v3587_v49  ;;  %v2539_v24 = vsub.s32 7, %v6649_v51  ;;  %v5794_v57 = vld [vmem:[%s6475_s14 + $0x220] ss:$8 sps:$4 sm:$0xff]   ;;  %v5799_v28 = vld [vmem:[%s6475_s14 + $0x324] ss:$8 sps:$4 sm:$0xff]  }
 0xaa1   : > { %v5915_v44 = vpop.eup %5914  ;;  %v3610_v45 = vpack.c.bf16 %v3594_v29, %v3586_v6  ;;  %v7290_v6 = vrot.slane %v7153_v3, %v1018_v39  ;;  %v7293_v29 = vrot.slane %v7153_v3, %v2535_v14  ;;  %v5802_v30 = vld [vmem:[%s6475_s14 + $0x214] ss:$8 sps:$4 sm:$0xff]   ;;  %v5800_v49 = vld [vmem:[%s6475_s14 + $0x210] ss:$8 sps:$4 sm:$0xff]   ;;  %v5808_v51 = vld [vmem:[%s6475_s14 + $0x204] ss:$8 sps:$4 sm:$0xff]  }
 0xaa2   : > { %v3612_v48 = vpack.c.bf16 %v3596_v35, %v3588_v7  ;;  %v3555_v50 = vadd.f32 1.0, %v5915_v44  ;;  %v3577_v11 = vmul.f32 0.5, %v3553_v43  ;;  %v5797_v7 = vld [vmem:[%s6475_s14 + $0x320] ss:$8 sps:$4 sm:$0xff]   ;;  %v7300_v35 = vrot.slane %v7153_v3, %v1022_v36 }
 0xaa3   : > { %4437 = vmatprep.mubr.bf16.mxu1 %v3610_v45  ;;  %v7303_v43 = vrot.slane %v7153_v3, %v2539_v24  ;;  %v5805_v45 = vld [vmem:[%s6475_s14 + $0x314] ss:$8 sps:$4 sm:$0xff]  }
 0xaa4   : > { %v5917_v58 = vpop.eup %5916  ;;  %4488 = vmatprep.mubr.bf16.mxu0 %v3612_v48  ;;  %4438 = vmatmul.mubr.bf16.vlgmr.msra.gmra.mxu1 %v3609_v37  ;;  %v3579_v15 = vmul.f32 0.5, %v3555_v50  ;;  %v3601_v20 = vmul.f32 %v3577_v11, %v7221_v9  ;;  %v5811_v11 = vld [vmem:[%s6475_s14 + $0x304] ss:$8 sps:$4 sm:$0xff]  }
 0xaa5   : > { %v5919_v56 = vpop.eup %5918  ;;  %4489 = vmatmul.mubr.bf16.vlgmr.msra.gmra.mxu0 %v3611_v0  ;;  %4508 = vmatpush1.bf16.msra.mxu1 %v5764_v26  ;;  %v3554_v10 = vadd.f32 1.0, %v5917_v58  ;;  %v5803_v0 = vld [vmem:[%s6475_s14 + $0x310] ss:$8 sps:$4 sm:$0xff]  }
 0xaa6   : > { %4559 = vmatpush1.bf16.msra.mxu0 %v5767_v46  ;;  %v3556_v27 = vadd.f32 1.0, %v5919_v56  ;;  %4509 = vmatprep.subr.bf16.mxu1 %v5772_v21  ;;  %v3603_v4 = vmul.f32 %v3579_v15, %v7228_v55  ;;  %v3617_v9 = vpack.c.bf16 %v3601_v20, %v3601_v20  ;;  %v5787_v55 = vld [vmem:[%s6475_s14 + $0x344] ss:$8 sps:$4 sm:$0xff]  }
 0xaa7   : > { %v3578_v8 = vmul.f32 0.5, %v3554_v10  ;;  %4560 = vmatprep.subr.bf16.mxu0 %v5775_v42 }
 0xaa8   : > { %v3580_v32 = vmul.f32 0.5, %v3556_v27  ;;  %v5806_v27 = vld [vmem:[%s6475_s14 + $0x200] ss:$8 sps:$4 sm:$0xff]  }
 0xaa9   : > { %v3602_v25 = vmul.f32 %v3578_v8, %v7236_v1  ;;  %4510 = vmatpush1.bf16.msra.mxu1 %v5770_v62  ;;  %v3619_v1 = vpack.c.bf16 %v3603_v4, %v3603_v4 }
 0xaaa   : > { %v3604_v60 = vmul.f32 %v3580_v32, %v7239_v41  ;;  %4561 = vmatpush1.bf16.msra.mxu0 %v5773_v2  ;;  %4511 = vmatprep.subr.bf16.mxu1 %v5778_v59  ;;  %v5790_v41 = vld [vmem:[%s6475_s14 + $0x234] ss:$8 sps:$4 sm:$0xff]  }
 0xaab   : > { %v3618_v23 = vpack.c.bf16 %v3602_v25, %v3602_v25  ;;  %4562 = vmatprep.subr.bf16.mxu0 %v5781_v31  ;;  %v5814_v32 = vld [vmem:[%s6475_s14 + $0x2f4] ss:$8 sps:$4 sm:$0xff]  }
 0xaac   : > { %v3620_v47 = vpack.c.bf16 %v3604_v60, %v3604_v60  ;;  %v5809_v60 = vld [vmem:[%s6475_s14 + $0x300] ss:$8 sps:$4 sm:$0xff]  }
 0xaad   : > { %4447 = vmatprep.mubr.bf16.mxu1 %v3618_v23  ;;  %4512 = vmatpush1.bf16.msra.mxu1 %v5776_v12 }
 0xaae   : > { %4498 = vmatprep.mubr.bf16.mxu0 %v3620_v47  ;;  %4448 = vmatmul.mubr.bf16.gmra.mxu1 %v3617_v9 }
 0xaaf   : > { %4499 = vmatmul.mubr.bf16.gmra.mxu0 %v3619_v1  ;;  %4513 = vmatprep.subr.bf16.mxu1 %v5784_v13 }
 0xab0   : > { %4563 = vmatpush1.bf16.msra.mxu0 %v5779_v40 }
 0xab1   : > { %4564 = vmatprep.subr.bf16.mxu0 %v5787_v55  ;;  %4514 = vmatpush1.bf16.msra.mxu1 %v5782_v63  ;;  %v5817_v63 = vld [vmem:[%s6475_s14 + $0x3f4] ss:$8 sps:$4 sm:$0xff]  }
 0xab2   : > { %4515 = vmatprep.subr.bf16.mxu1 %v5790_v41 }
 0xab4   : > { %4565 = vmatpush1.bf16.msra.mxu0 %v5785_v16 }
 0xab5   : > { %4566 = vmatprep.subr.bf16.mxu0 %v5793_v18  ;;  %4516 = vmatpush1.bf16.msra.mxu1 %v5788_v17  ;;  %v5812_v18 = vld [vmem:[%s6475_s14 + $0x2f0] ss:$8 sps:$4 sm:$0xff]  }
 0xab6   : > { %4517 = vmatprep.subr.bf16.mxu1 %v5796_v19 }
 0xab8   : > { %4567 = vmatpush1.bf16.msra.mxu0 %v5791_v22 }
 0xab9   : > { %4568 = vmatprep.subr.bf16.mxu0 %v5799_v28  ;;  %4518 = vmatpush1.bf16.msra.mxu1 %v5794_v57  ;;  %v3325_v39 = vpop.f32.mrf.mxu1  ;;  %v3376_v44 = vpop.f32.mrf.mxu0 }
 0xaba   : > { %v7308_v26 = vadd.f32 %v3325_v39, %v7290_v6  ;;  %v7311_v37 = vadd.f32 %v3376_v44, %v7293_v29  ;;  %4519 = vmatprep.subr.bf16.mxu1 %v5802_v30  ;;  %v5820_v30 = vld [vmem:[%s6475_s14 + $0x2e4] ss:$8 sps:$4 sm:$0xff]  }
 0xabb   : > { %v3327_v36 = vpop.f32.mrf.mxu1  ;;  %v3378_v48 = vpop.f32.mrf.mxu0 }
 0xabc   : > { %4569 = vmatpush1.bf16.msra.mxu0 %v5797_v7  ;;  %v3397_v3 = vmul.f32 %v7308_v26, %v7308_v26  ;;  %v3399_v46 = vmul.f32 %v7311_v37, %v7311_v37  ;;  %v7319_v21 = vadd.f32 %v3327_v36, %v7300_v35  ;;  %v7322_v50 = vadd.f32 %v3378_v48, %v7303_v43 }
 0xabd   : > { %4570 = vmatprep.subr.bf16.mxu0 %v5805_v45  ;;  %4520 = vmatpush1.bf16.msra.mxu1 %v5800_v49  ;;  %v3329_v42 = vpop.f32.mrf.mxu1  ;;  %v3380_v58 = vpop.f32.mrf.mxu0  ;;  %v5815_v45 = vld [vmem:[%s6475_s14 + $0x3f0] ss:$8 sps:$4 sm:$0xff]  }
 0xabe   : > { %v3421_v56 = vmul.f32 %v3397_v3, %v7308_v26  ;;  %v3423_v10 = vmul.f32 %v3399_v46, %v7311_v37  ;;  %v3398_v62 = vmul.f32 %v7319_v21, %v7319_v21  ;;  %v3400_v15 = vmul.f32 %v7322_v50, %v7322_v50  ;;  %4521 = vmatprep.subr.bf16.mxu1 %v5808_v51 }
 0xabf   : > { %v7334_v2 = vadd.f32 %v3329_v42, %v7290_v6  ;;  %v7337_v59 = vadd.f32 %v3380_v58, %v7293_v29  ;;  %v3331_v8 = vpop.f32.mrf.mxu1  ;;  %v3382_v31 = vpop.f32.mrf.mxu0  ;;  %v5823_v42 = vld [vmem:[%s6475_s14 + $0x3e4] ss:$8 sps:$4 sm:$0xff]  }
 0xac0   : > { %v3445_v20 = vmul.f32 0.044715, %v3421_v56  ;;  %v3447_v25 = vmul.f32 0.044715, %v3423_v10  ;;  %v3422_v12 = vmul.f32 %v3398_v62, %v7319_v21  ;;  %v3424_v4 = vmul.f32 %v3400_v15, %v7322_v50  ;;  %4571 = vmatpush1.bf16.msra.mxu0 %v5803_v0  ;;  %v5818_v10 = vld [vmem:[%s6475_s14 + $0x2e0] ss:$8 sps:$4 sm:$0xff]  }
 0xac1   : > { %v3405_v23 = vmul.f32 %v7334_v2, %v7334_v2  ;;  %v3407_v13 = vmul.f32 %v7337_v59, %v7337_v59  ;;  %v7348_v47 = vadd.f32 %v3331_v8, %v7300_v35  ;;  %v7351_v40 = vadd.f32 %v3382_v31, %v7303_v43  ;;  %4572 = vmatprep.subr.bf16.mxu0 %v5811_v11  ;;  %v3335_v9 = vpop.f32.mrf.mxu1  ;;  %v3386_v1 = vpop.f32.mrf.mxu0 }
 0xac2   : > { %v3469_v55 = vadd.f32 %v3445_v20, %v7308_v26  ;;  %v3471_v41 = vadd.f32 %v3447_v25, %v7311_v37  ;;  %v3446_v16 = vmul.f32 0.044715, %v3422_v12  ;;  %v3448_v17 = vmul.f32 0.044715, %v3424_v4  ;;  %4522 = vmatpush1.bf16.msra.mxu1 %v5806_v27  ;;  %v5821_v12 = vld [vmem:[%s6475_s14 + $0x3e0] ss:$8 sps:$4 sm:$0xff]  }
 0xac3   : > { %v3429_v19 = vmul.f32 %v3405_v23, %v7334_v2  ;;  %v3431_v14 = vmul.f32 %v3407_v13, %v7337_v59  ;;  %v3406_v22 = vmul.f32 %v7348_v47, %v7348_v47  ;;  %v3408_v24 = vmul.f32 %v7351_v40, %v7351_v40  ;;  %v3337_v57 = vpop.f32.mrf.mxu1  ;;  %v3388_v28 = vpop.f32.mrf.mxu0  ;;  %4523 = vmatprep.subr.bf16.mxu1 %v5814_v32  ;;  %v5826_v32 = vld [vmem:[%s6475_s14 + $0x2d4] ss:$8 sps:$4 sm:$0xff]  }
 0xac4   : > { %v3493_v7 = vmul.f32 0.7978846, %v3469_v55  ;;  %v3495_v39 = vmul.f32 0.7978846, %v3471_v41  ;;  %v3470_v44 = vadd.f32 %v3446_v16, %v7319_v21  ;;  %v3472_v49 = vadd.f32 %v3448_v17, %v7322_v50  ;;  %4573 = vmatpush1.bf16.msra.mxu0 %v5809_v60  ;;  %v5829_v13 = vld [vmem:[%s6475_s14 + $0x3d4] ss:$8 sps:$4 sm:$0xff]  }
 0xac5   : > { %v3453_v51 = vmul.f32 0.044715, %v3429_v19  ;;  %v3455_v36 = vmul.f32 0.044715, %v3431_v14  ;;  %v3430_v48 = vmul.f32 %v3406_v22, %v7348_v47  ;;  %v3432_v3 = vmul.f32 %v3408_v24, %v7351_v40  ;;  %4574 = vmatprep.subr.bf16.mxu0 %v5817_v63  ;;  %v3339_v46 = vpop.f32.mrf.mxu1  ;;  %v3390_v0 = vpop.f32.mrf.mxu0  ;;  %v5832_v17 = vld [vmem:[%s6475_s14 + $0x2c4] ss:$8 sps:$4 sm:$0xff]  }
 0xac6   : > { %5920 = vtanh.f32 %v3493_v7  ;;  %v3494_v58 = vmul.f32 0.7978846, %v3470_v44  ;;  %v3496_v11 = vmul.f32 0.7978846, %v3472_v49  ;;  %v7371_v56 = vadd.f32 %v3335_v9, %v7290_v6  ;;  %4524 = vmatpush2.bf16.msra.mxu1 %v5812_v18  ;;  %v5835_v24 = vld [vmem:[%s6475_s14 + $0x3c4] ss:$8 sps:$4 sm:$0xff]  }
 0xac7   : > { %5922 = vtanh.f32 %v3495_v39  ;;  %v3477_v62 = vadd.f32 %v3453_v51, %v7334_v2  ;;  %v3479_v15 = vadd.f32 %v3455_v36, %v7337_v59  ;;  %v3454_v27 = vmul.f32 0.044715, %v3430_v48  ;;  %v3340_v8 = vpop.f32.mrf.mxu1  ;;  %v3391_v31 = vpop.f32.mrf.mxu0  ;;  %4525 = vmatprep.subr.bf16.mxu1 %v5820_v30  ;;  %v5830_v30 = vld [vmem:[%s6475_s14 + $0x2c0] ss:$8 sps:$4 sm:$0xff]   ;;  %v5838_v44 = vld [vmem:[%s6475_s14 + $0x2b4] ss:$8 sps:$4 sm:$0xff]  }
 0xac8   : > { %5924 = vtanh.f32 %v3494_v58  ;;  %v3456_v20 = vmul.f32 0.044715, %v3432_v3  ;;  %v3413_v6 = vmul.f32 %v7371_v56, %v7371_v56  ;;  %v7380_v25 = vadd.f32 %v3386_v1, %v7293_v29  ;;  %4575 = vmatpush2.bf16.msra.mxu0 %v5815_v45  ;;  %v5824_v1 = vld [vmem:[%s6475_s14 + $0x2d0] ss:$8 sps:$4 sm:$0xff]   ;;  %v5833_v51 = vld [vmem:[%s6475_s14 + $0x3c0] ss:$8 sps:$4 sm:$0xff]  }
 0xac9   : > { %5926 = vtanh.f32 %v3496_v11  ;;  %v3501_v4 = vmul.f32 0.7978846, %v3477_v62  ;;  %v3503_v60 = vmul.f32 0.7978846, %v3479_v15  ;;  %v3478_v23 = vadd.f32 %v3454_v27, %v7348_v47  ;;  %4576 = vmatprep.subr.bf16.mxu0 %v5823_v42  ;;  %v5841_v3 = vld [vmem:[%s6475_s14 + $0x3b4] ss:$8 sps:$4 sm:$0xff]  }
 0xaca   : > { %v3480_v9 = vadd.f32 %v3456_v20, %v7351_v40  ;;  %v3437_v63 = vmul.f32 %v3413_v6, %v7371_v56  ;;  %v3415_v55 = vmul.f32 %v7380_v25, %v7380_v25  ;;  %v7390_v29 = vadd.f32 %v3337_v57, %v7300_v35  ;;  %4526 = vmatpush2.bf16.msra.mxu1 %v5818_v10  ;;  %v5827_v35 = vld [vmem:[%s6475_s14 + $0x3d0] ss:$8 sps:$4 sm:$0xff]   ;;  %v5844_v10 = vld [vmem:[%s6475_s14 + $0x2a4] ss:$8 sps:$4 sm:$0xff]   ;;  %v5842_v6 = vld [vmem:[%s6475_s14 + $0x2a0] ss:$8 sps:$4 sm:$0xff]  }
 0xacb   : > { %5928 = vtanh.f32 %v3501_v4  ;;  %v3502_v41 = vmul.f32 0.7978846, %v3478_v23  ;;  %v7394_v16 = vadd.f32 %v3388_v28, %v7303_v43  ;;  %4527 = vmatprep.subr.bf16.mxu1 %v5826_v32  ;;  %v5836_v0 = vld [vmem:[%s6475_s14 + $0x2b0] ss:$8 sps:$4 sm:$0xff]   ;;  %v5847_v32 = vld [vmem:[%s6475_s14 + $0x3a4] ss:$8 sps:$4 sm:$0xff]  }
 0xacc   : > { %5930 = vtanh.f32 %v3503_v60  ;;  %v3504_v18 = vmul.f32 0.7978846, %v3480_v9  ;;  %v3461_v19 = vmul.f32 0.044715, %v3437_v63  ;;  %v3439_v14 = vmul.f32 %v3415_v55, %v7380_v25  ;;  %4577 = vmatpush2.bf16.msra.mxu0 %v5821_v12  ;;  %v5839_v15 = vld [vmem:[%s6475_s14 + $0x3b0] ss:$8 sps:$4 sm:$0xff]  }
 0xacd   : > { %5932 = vtanh.f32 %v3502_v41  ;;  %v3414_v22 = vmul.f32 %v7390_v29, %v7390_v29  ;;  %v3416_v43 = vmul.f32 %v7394_v16, %v7394_v16  ;;  %4578 = vmatprep.subr.bf16.mxu0 %v5829_v13  ;;  %v5850_v12 = vld [vmem:[%s6475_s14 + $0x294] ss:$8 sps:$4 sm:$0xff]   ;;  %v5845_v23 = vld [vmem:[%s6475_s14 + $0x3a0] ss:$8 sps:$4 sm:$0xff]  }
 0xace   : > { %5934 = vtanh.f32 %v3504_v18  ;;  %v3485_v57 = vadd.f32 %v3461_v19, %v7371_v56  ;;  %v3463_v28 = vmul.f32 0.044715, %v3439_v14  ;;  %4528 = vmatpush2.bf16.msra.mxu1 %v5824_v1  ;;  %v5853_v1 = vld [vmem:[%s6475_s14 + $0x394] ss:$8 sps:$4 sm:$0xff]   ;;  %v5848_v18 = vld [vmem:[%s6475_s14 + $0x290] ss:$8 sps:$4 sm:$0xff]  }
 0xacf   : > { %v3438_v7 = vmul.f32 %v3414_v22, %v7390_v29  ;;  %v3440_v39 = vmul.f32 %v3416_v43, %v7394_v16  ;;  %4529 = vmatprep.subr.bf16.mxu1 %v5832_v17  ;;  %v5856_v22 = vld [vmem:[%s6475_s14 + $0x284] ss:$8 sps:$4 sm:$0xff]  }
 0xad0   : > { %v3509_v49 = vmul.f32 0.7978846, %v3485_v57  ;;  %v3487_v45 = vadd.f32 %v3463_v28, %v7380_v25  ;;  %4579 = vmatpush2.bf16.msra.mxu0 %v5827_v35  ;;  %v5851_v57 = vld [vmem:[%s6475_s14 + $0x390] ss:$8 sps:$4 sm:$0xff]  }
 0xad1   : > { %v3462_v36 = vmul.f32 0.044715, %v3438_v7  ;;  %v3464_v48 = vmul.f32 0.044715, %v3440_v39  ;;  %4580 = vmatprep.subr.bf16.mxu0 %v5835_v24 }
 0xad2   : > { %5936 = vtanh.f32 %v3509_v49  ;;  %v3511_v46 = vmul.f32 0.7978846, %v3487_v45  ;;  %4530 = vmatpush2.bf16.msra.mxu1 %v5830_v30  ;;  %v5854_v45 = vld [vmem:[%s6475_s14 + $0x280] ss:$8 sps:$4 sm:$0xff]  }
 0xad3   : > { %v5921_v42 = vpop.eup %5920  ;;  %v3486_v58 = vadd.f32 %v3462_v36, %v7390_v29  ;;  %v3488_v11 = vadd.f32 %v3464_v48, %v7394_v16  ;;  %4531 = vmatprep.subr.bf16.mxu1 %v5838_v44  ;;  %v5859_v44 = vld [vmem:[%s6475_s14 + $0x384] ss:$8 sps:$4 sm:$0xff]  }
 0xad4   : > { %v5923_v62 = vpop.eup %5922  ;;  %5938 = vtanh.f32 %v3511_v46  ;;  %4581 = vmatpush2.bf16.msra.mxu0 %v5833_v51  ;;  %v3541_v63 = vadd.f32 1.0, %v5921_v42  ;;  %v5857_v42 = vld [vmem:[%s6475_s14 + $0x380] ss:$8 sps:$4 sm:$0xff]  }
 0xad5   : > { %v5925_v27 = vpop.eup %5924  ;;  %v3510_v8 = vmul.f32 0.7978846, %v3486_v58  ;;  %v3512_v31 = vmul.f32 0.7978846, %v3488_v11  ;;  %4582 = vmatprep.subr.bf16.mxu0 %v5841_v3  ;;  %v3543_v14 = vadd.f32 1.0, %v5923_v62 }
 0xad6   : > { %v5927_v20 = vpop.eup %5926  ;;  %4532 = vmatpush2.bf16.msra.mxu1 %v5836_v0  ;;  %v3542_v4 = vadd.f32 1.0, %v5925_v27  ;;  %v3565_v7 = vmul.f32 0.5, %v3541_v63 }
 0xad7   : > { %5940 = vtanh.f32 %v3510_v8  ;;  %4533 = vmatprep.subr.bf16.mxu1 %v5844_v10  ;;  %v3544_v13 = vadd.f32 1.0, %v5927_v20  ;;  %v3567_v48 = vmul.f32 0.5, %v3543_v14 }
 0xad8   : > { %v5929_v60 = vpop.eup %5928  ;;  %5942 = vtanh.f32 %v3512_v31  ;;  %4583 = vmatpush2.bf16.msra.mxu0 %v5839_v15  ;;  %v3566_v24 = vmul.f32 0.5, %v3542_v4  ;;  %v3589_v15 = vmul.f32 %v3565_v7, %v7308_v26  ;;  %v3753_v7 = vld [vmem:[%s779_s18] sm:$0x3] }
 0xad9   : > { %v5931_v9 = vpop.eup %5930  ;;  %v3549_v55 = vadd.f32 1.0, %v5929_v60  ;;  %4584 = vmatprep.subr.bf16.mxu0 %v5847_v32  ;;  %v3568_v30 = vmul.f32 0.5, %v3544_v13 }
 0xada   : > { %v5933_v41 = vpop.eup %5932  ;;  %v3551_v17 = vadd.f32 1.0, %v5931_v9  ;;  %4534 = vmatpush2.bf16.msra.mxu1 %v5842_v6  ;;  %v3590_v46 = vmul.f32 %v3566_v24, %v7319_v21  ;;  %v3591_v21 = vmul.f32 %v3567_v48, %v7311_v37 }
 0xadb   : > { %v5935_v19 = vpop.eup %5934  ;;  %v3573_v35 = vmul.f32 0.5, %v3549_v55  ;;  %4535 = vmatprep.subr.bf16.mxu1 %v5850_v12  ;;  %v3550_v43 = vadd.f32 1.0, %v5933_v41  ;;  %v3592_v58 = vmul.f32 %v3568_v30, %v7322_v50 }
 0xadc   : > { %4585 = vmatpush2.bf16.msra.mxu0 %v5845_v23  ;;  %v3552_v28 = vadd.f32 1.0, %v5935_v19  ;;  %v3575_v39 = vmul.f32 0.5, %v3551_v17 }
 0xadd   : > { %4586 = vmatprep.subr.bf16.mxu0 %v5853_v1  ;;  %v3574_v49 = vmul.f32 0.5, %v3550_v43  ;;  %v3597_v3 = vmul.f32 %v3573_v35, %v7334_v2 }
 0xade   : > { %4536 = vmatpush2.bf16.msra.mxu1 %v5848_v18  ;;  %v3576_v51 = vmul.f32 0.5, %v3552_v28  ;;  %v3599_v27 = vmul.f32 %v3575_v39, %v7337_v59  ;;  %v3758_v39 = vrot.slane %v3753_v7, %v6655_v53 }
 0xadf   : > { %v5937_v36 = vpop.eup %5936  ;;  %4537 = vmatprep.subr.bf16.mxu1 %v5856_v22  ;;  %v3598_v0 = vmul.f32 %v3574_v49, %v7348_v47  ;;  %v3613_v47 = vpack.c.bf16 %v3597_v3, %v3589_v15 }
 0xae0   : > { %4587 = vmatpush2.bf16.msra.mxu0 %v5851_v57  ;;  %v3600_v11 = vmul.f32 %v3576_v51, %v7351_v40  ;;  %v3557_v10 = vadd.f32 1.0, %v5937_v36  ;;  %v3615_v20 = vpack.c.bf16 %v3599_v27, %v3591_v21 }
 0xae1   : > { %v5939_v62 = vpop.eup %5938  ;;  %4588 = vmatprep.subr.bf16.mxu0 %v5859_v44  ;;  %v3614_v8 = vpack.c.bf16 %v3598_v0, %v3590_v46  ;;  %v3762_v44 = vrot.slane %v3753_v7, %v6652_v52 }
 0xae2   : > { %4538 = vmatpush2.bf16.msra.mxu1 %v5854_v45  ;;  %v3616_v2 = vpack.c.bf16 %v3600_v11, %v3592_v58  ;;  %v3559_v31 = vadd.f32 1.0, %v5939_v62  ;;  %v3581_v50 = vmul.f32 0.5, %v3557_v10 }
 0xae3   : > { %4539 = vmatprep.mubr.bf16.mxu1 %v3614_v8 }
 0xae4   : > { %v5941_v32 = vpop.eup %5940  ;;  %4589 = vmatpush2.bf16.msra.mxu0 %v5857_v42  ;;  %4590 = vmatprep.mubr.bf16.mxu0 %v3616_v2  ;;  %v3583_v26 = vmul.f32 0.5, %v3559_v31  ;;  %v3605_v60 = vmul.f32 %v3581_v50, %v7371_v56 }
 0xae5   : > { %v5943_v40 = vpop.eup %5942  ;;  %4540 = vmatmul.mubr.bf16.vlgmr.msra.gmra.mxu1 %v3613_v47  ;;  %v3558_v6 = vadd.f32 1.0, %v5941_v32 }
 0xae6   : > { %v3560_v12 = vadd.f32 1.0, %v5943_v40  ;;  %v3607_v37 = vmul.f32 %v3583_v26, %v7380_v25  ;;  %v3621_v55 = vpack.c.bf16 %v3605_v60, %v3605_v60 }
 0xae7   : > { %4591 = vmatmul.mubr.bf16.vlgmr.msra.gmra.mxu0 %v3615_v20  ;;  %v3582_v59 = vmul.f32 0.5, %v3558_v6 }
 0xae8   : > { %v3584_v4 = vmul.f32 0.5, %v3560_v12  ;;  %v3623_v1 = vpack.c.bf16 %v3607_v37, %v3607_v37 }
 0xae9   : > { %v3606_v23 = vmul.f32 %v3582_v59, %v7390_v29 }
 0xaea   : > { %v3608_v13 = vmul.f32 %v3584_v4, %v7394_v16 }
 0xaeb   : > { %v3622_v9 = vpack.c.bf16 %v3606_v23, %v3606_v23 }
 0xaec   : > { %v3624_v63 = vpack.c.bf16 %v3608_v13, %v3608_v13 }
 0xaed   : > { %4549 = vmatprep.mubr.bf16.mxu1 %v3622_v9 }
 0xaee   : > { %4600 = vmatprep.mubr.bf16.mxu0 %v3624_v63  ;;  %4550 = vmatmul.mubr.bf16.gmra.mxu1 %v3621_v55 }
 0xaef   : > { %4601 = vmatmul.mubr.bf16.gmra.mxu0 %v3623_v1 }
 0xb64   : > { %v4439_v41 = vpop.f32.mrf.mxu1 }
 0xb65   : > { %v4490_v17 = vpop.f32.mrf.mxu0  ;;  %v4440_v49 = vadd.f32 %v4439_v41, %v3758_v39 }
 0xb66   : > { %v4441_v18 = vpop.f32.mrf.mxu1 }
 0xb67   : > { %v4492_v19 = vpop.f32.mrf.mxu0  ;;  %v4442_v45 = vadd.f32 %v4441_v18, %v3762_v44  ;;  %v4491_v51 = vadd.f32 %v4490_v17, %v4440_v49 }
 0xb68   : > { %v4443_v56 = vpop.f32.mrf.mxu1 }
 0xb69   : > { %v4494_v14 = vpop.f32.mrf.mxu0  ;;  %v4444_v36 = vadd.f32 %v4443_v56, %v3758_v39  ;;  %v4493_v3 = vadd.f32 %v4492_v19, %v4442_v45 }
 0xb6a   : > { %v4445_v29 = vpop.f32.mrf.mxu1 }
 0xb6b   : > { %v4496_v35 = vpop.f32.mrf.mxu0  ;;  %v4446_v46 = vadd.f32 %v4445_v29, %v3762_v44  ;;  %v4495_v11 = vadd.f32 %v4494_v14, %v4444_v36 }
 0xb6d   : > { %v4497_v8 = vadd.f32 %v4496_v35, %v4446_v46 }
 0xb6e   : > { %v4449_v25 = vpop.f32.mrf.mxu1 }
 0xb6f   : > { %v4500_v22 = vpop.f32.mrf.mxu0  ;;  %v4450_v15 = vadd.f32 %v4449_v25, %v3758_v39 }
 0xb70   : > { %v4451_v16 = vpop.f32.mrf.mxu1 }
 0xb71   : > { %v4502_v43 = vpop.f32.mrf.mxu0  ;;  %v4452_v21 = vadd.f32 %v4451_v16, %v3762_v44  ;;  %v4501_v6 = vadd.f32 %v4500_v22, %v4450_v15 }
 0xb72   : > { %v4453_v24 = vpop.f32.mrf.mxu1 }
 0xb73   : > { %v4504_v57 = vpop.f32.mrf.mxu0 }
 0xb74   : > { %v4454_v28 = vpop.f32.mrf.mxu1 }
 0xb75   : > { %v4505_v30 = vpop.f32.mrf.mxu0 }
 0xba5   : > { %v4541_v48 = vpop.f32.mrf.mxu1 }
 0xba6   : > { %v4542_v0 = vadd.f32 %v4541_v48, %v4491_v51 }
 0xba7   : > { %v4592_v42 = vpop.f32.mrf.mxu0  ;;  %v4543_v58 = vpop.f32.mrf.mxu1 }
 0xba8   : > { %v4593_v10 = vadd.f32 %v4592_v42, %v4542_v0  ;;  %v4544_v62 = vadd.f32 %v4543_v58, %v4493_v3 }
 0xba9   : > { %v4594_v27 = vpop.f32.mrf.mxu0  ;;  %v4545_v53 = vpop.f32.mrf.mxu1 }
 0xbaa   : > { %v4609_v52 = vadd.f32 %v4593_v10, %v6849_v33  ;;  %v4595_v2 = vadd.f32 %v4594_v27, %v4544_v62  ;;  %v4546_v31 = vadd.f32 %v4545_v53, %v4495_v11  ;;  %v4503_v33 = vadd.f32 %v4502_v43, %v4452_v21 }
 0xbab   : > { %v4596_v47 = vpop.f32.mrf.mxu0  ;;  %v4547_v32 = vpop.f32.mrf.mxu1 }
 0xbac   : > { %4615 = vst [vmem:[%s6517_s27] sm:$0xff] %v4609_v52  ;;  %v4610_v50 = vadd.f32 %v4595_v2, %v6851_v34  ;;  %v4597_v40 = vadd.f32 %v4596_v47, %v4546_v31  ;;  %v4548_v20 = vadd.f32 %v4547_v32, %v4497_v8 }
 0xbad   : > { %v4598_v26 = vpop.f32.mrf.mxu0 }
 0xbae   : > { %4616 = vst [vmem:[%s6517_s27 + $0x8] sm:$0xff] %v4610_v50  ;;  %v4611_v12 = vadd.f32 %v4597_v40, %v6859_v38  ;;  %v4599_v59 = vadd.f32 %v4598_v26, %v4548_v20  ;;  %v4551_v4 = vpop.f32.mrf.mxu1 }
 0xbaf   : > { %v4552_v60 = vadd.f32 %v4551_v4, %v4501_v6  ;;  %v4602_v23 = vpop.f32.mrf.mxu0 }
 0xbb0   : > { %4617 = vst [vmem:[%s6517_s27 + $0x10] sm:$0xff] %v4611_v12  ;;  %v4612_v37 = vadd.f32 %v4599_v59, %v6861_v54  ;;  %v4553_v13 = vpop.f32.mrf.mxu1 }
 0xbb1   : > { %v4603_v34 = vadd.f32 %v4602_v23, %v4552_v60  ;;  %v4554_v9 = vadd.f32 %v4553_v13, %v4503_v33  ;;  %v4604_v63 = vpop.f32.mrf.mxu0 }
 0xbb2   : > { %4618 = vst [vmem:[%s6517_s27 + $0x18] sm:$0xff] %v4612_v37  ;;  %v4555_v55 = vpop.f32.mrf.mxu1 }
 0xbb3   : > { %v4613_v1 = vadd.f32 %v4603_v34, %v6865_v5  ;;  %v4605_v41 = vadd.f32 %v4604_v63, %v4554_v9  ;;  %v4606_v38 = vpop.f32.mrf.mxu0 }
 0xbb4   : > { %v4556_v17 = vpop.f32.mrf.mxu1 }
 0xbb5   : > { %4619 = vst [vmem:[%s6517_s27 + $0x20] sm:$0x1] %v4613_v1  ;;  %v4614_v18 = vadd.f32 %v4605_v41, %v6870_v61  ;;  %v4607_v19 = vpop.f32.mrf.mxu0 }
 0xbb7   : > { %4620 = vst [vmem:[%s6517_s27 + $0x28] sm:$0x1] %v4614_v18 }
 0xbb8 PF: > { %s7563_s1 = sld [smem:[#allocation21_spill]] }
 0xbb9   : > { %s7564_s25 = sld [smem:[#allocation16_spill]] }
 0xbba   : > { %s7565_s26 = sld [smem:[#allocation17_spill]] }
 0xbbb   : > { %s7566_s27 = sld [smem:[#allocation24_spill]] }
 0xbbc   : > { %s7567_s28 = sld [smem:[#allocation19_spill]] }
 0xbbd   : > { %s7568_s29 = sld [smem:[#allocation20_spill]] }
 0xbbe   : > { %s35_s15 = sadd.s32 1, %s7563_s1   ;;  %s7569_s30 = sld [smem:[#allocation22_spill]] }
 0xbbf   : > { %p32_p7 = scmp.ge.s32.totalorder %s35_s15, 10   ;;  %s7570_s14 = sld [smem:[#allocation23_spill]] }
 0xbc1   :  { %34 = sbr.rel (!%p32_p7) target bundleno = 26 (0x1a), region = 198 }
 0xbc6   :  { %4642 = vsyncpa [#allocation3], 1 }
 0xbc7   :  { %4644 = vsyncpa [#allocation3 + $0x1], 1 }
 0xbc8   :  { %4645 = vsyncpa [#allocation5], 1 }
 0xbc9   :  { %4647 = vsyncpa [#allocation5 + $0x1], 1 }
 0xbca   :  { %4648 = vsyncpa [#allocation8], 1 }
 0xbcb   :  { %4650 = vsyncpa [#allocation8 + $0x1], 1 }
 0xbcc   :  { %4651 = vsyncpa [#allocation11], 1 }
 0xbcd   :  { %4653 = vsyncpa [#allocation11 + $0x1], 1 }

</bundles_post_ra>
